<compile_context>
chip_gen: v7x
topology: tpu7x:2x2x1
jax: 0.10.0
libtpu: 0.0.40
codegen_flags: <defaults>
</compile_context>

<pallas_src>
import functools

import jax
import jax.numpy as jnp
from jax import lax
from jax.experimental import pallas as pl
from jax.experimental.pallas import tpu as pltpu

N_GROUPS = 32
EPS = 1e-5


def _pick_row_chunk(H, W, max_acc_rows=1024):
    """Smallest divisor of H giving >=128 accumulator rows, capped at max_acc_rows."""
    divs = [d for d in range(1, H + 1) if H % d == 0]
    ok = [d for d in divs if d * W <= max_acc_rows]
    if not ok:
        return 1
    good = [d for d in ok if d * W >= 128]
    return min(good) if good else max(ok)


def _final_layer_kernel(x_ref, gamma_ref, beta_ref, gsum_ref, gbc_ref, w_ref, bias_ref,
                        out_ref, slab_ref, *, H, W, row_chunk):
    """One batch element per grid step.

    x_ref:     (1, H*W, Cin)   input (f32 or bf16)
    gamma_ref: (1, Cin), beta_ref: (1, Cin)   GroupNorm affine (f32)
    gsum_ref:  (Cin, G)  channel->group mean reducer (1/group_size within group)
    gbc_ref:   (G, Cin)  group->channel broadcaster (1.0 within group)
    w_ref:     (3, 3*Cin, Cout)  conv taps, bf16, K-stacked over kx per ky slab
    bias_ref:  (1, Cout) f32
    out_ref:   (1, H*W, Cout)  f32 output
    slab_ref:  ((H+2)*W, 3*Cin) bf16 scratch: row-padded, kx-stacked activations
    """
    Cin = x_ref.shape[2]
    Cout = out_ref.shape[2]
    HW = H * W

    # Zero only the two W-row padding blocks (every step: scratch is per-core and
    # the batch axis may be split across cores).
    zpad = jnp.zeros((W, 3 * Cin), jnp.bfloat16)
    slab_ref[0:W, :] = zpad
    slab_ref[(H + 1) * W:(H + 2) * W, :] = zpad

    # ---- GroupNorm (32 groups), two-pass (centered) variance in f32 ----
    xf = x_ref[0].astype(jnp.float32)                                  # (HW, Cin)
    mean_c = jnp.mean(xf, axis=0, keepdims=True)                       # (1, Cin)
    gmean = jnp.dot(
        jnp.dot(mean_c, gsum_ref[...], preferred_element_type=jnp.float32),
        gbc_ref[...], preferred_element_type=jnp.float32)              # per-group mean
    xc = xf - gmean
    msq_c = jnp.mean(xc * xc, axis=0, keepdims=True)                   # centered 2nd moment
    gvar = jnp.dot(
        jnp.dot(msq_c, gsum_ref[...], preferred_element_type=jnp.float32),
        gbc_ref[...], preferred_element_type=jnp.float32)              # per-group variance
    scale = lax.rsqrt(gvar + EPS) * gamma_ref[...]                     # (1, Cin)
    y = xc * scale + beta_ref[...]

    # ---- SiLU ----
    y = y * jax.nn.sigmoid(y)                                          # (HW, Cin) f32

    # ---- Build the kx-stacked padded slab in place ----
    # Column-in-image index, (HW, 1): broadcast in the where (no full-slab modulo).
    col = lax.broadcasted_iota(jnp.int32, (HW, 1), 0) % W
    # Sublane rolls of the *unpadded* image slab: the wrap rows (pixel 0 <-> pixel
    # HW-1) are exactly the column-masked border lanes, so wrapped values never
    # survive.  Rolls done in f32 (packed-dtype sublane rotate would relayout anyway).
    left = jnp.where(col == 0, 0.0, pltpu.roll(y, shift=1, axis=0))        # kx = 0
    right = jnp.where(col == W - 1, 0.0, pltpu.roll(y, shift=HW - 1, axis=0))  # kx = 2
    slab_ref[W:(H + 1) * W, :] = jnp.concatenate(
        [left.astype(jnp.bfloat16), y.astype(jnp.bfloat16), right.astype(jnp.bfloat16)],
        axis=-1)

    # ---- Conv2d 3x3 pad=1: per row chunk, 3 matmuls (one per ky) with K = 3*Cin ----
    bias = bias_ref[...]                                               # (1, Cout)
    chunk_rows = row_chunk * W
    n_chunks = H // row_chunk

    def chunk_body(ci, carry):
        base = pl.multiple_of(ci * chunk_rows, chunk_rows)
        acc = jnp.zeros((chunk_rows, Cout), jnp.float32)
        for ky in range(3):
            lhs = slab_ref[pl.ds(base + ky * W, chunk_rows), :]        # (chunk_rows, 3*Cin) bf16
            acc = acc + jnp.dot(lhs, w_ref[ky], preferred_element_type=jnp.float32)
        out_ref[0, pl.ds(base, chunk_rows), :] = (acc + bias).astype(out_ref.dtype)
        return carry

    lax.fori_loop(0, n_chunks, chunk_body, 0, unroll=n_chunks <= 8)


@jax.jit
def final_layer(x_nhwc, gamma, beta, w_oihw, bias):
    """x_nhwc: (N, H, W, Cin).  w_oihw: (Cout, Cin, 3, 3).  Returns (N, H, W, Cout) f32."""
    N, H, W, Cin = x_nhwc.shape
    Cout = w_oihw.shape[0]
    assert Cin % N_GROUPS == 0, "GroupNorm(32) requires Cin % 32 == 0"
    G = N_GROUPS
    gsize = Cin // G

    # Thin group-reduce / group-broadcast selectors (replace the Cin x Cin matrix).
    grp = jnp.arange(Cin) // gsize
    onehot = (grp[:, None] == jnp.arange(G)[None, :])
    gsum = onehot.astype(jnp.float32) / gsize          # (Cin, G)
    gbc = onehot.T.astype(jnp.float32)                 # (G, Cin)

    gamma2 = gamma.reshape(1, Cin).astype(jnp.float32)
    beta2 = beta.reshape(1, Cin).astype(jnp.float32)

    # (Cout, Cin, 3, 3) -> (ky, kx, Cin, Cout) -> (3, 3*Cin, Cout): K-stacked over kx.
    w3 = jnp.transpose(w_oihw, (2, 3, 1, 0)).reshape(3, 3 * Cin, Cout).astype(jnp.bfloat16)
    bias2 = bias.reshape(1, Cout).astype(jnp.float32)

    row_chunk = _pick_row_chunk(H, W)
    kernel = functools.partial(_final_layer_kernel, H=H, W=W, row_chunk=row_chunk)

    x_flat = x_nhwc.reshape(N, H * W, Cin)             # free reshape outside the kernel

    out_flat = pl.pallas_call(
        kernel,
        out_shape=jax.ShapeDtypeStruct((N, H * W, Cout), jnp.float32),
        grid=(N,),
        in_specs=[
            pl.BlockSpec((1, H * W, Cin), lambda n: (n, 0, 0)),
            pl.BlockSpec((1, Cin), lambda n: (0, 0), pipeline_mode=pl.Buffered(1)),
            pl.BlockSpec((1, Cin), lambda n: (0, 0), pipeline_mode=pl.Buffered(1)),
            pl.BlockSpec((Cin, G), lambda n: (0, 0), pipeline_mode=pl.Buffered(1)),
            pl.BlockSpec((G, Cin), lambda n: (0, 0), pipeline_mode=pl.Buffered(1)),
            pl.BlockSpec((3, 3 * Cin, Cout), lambda n: (0, 0, 0), pipeline_mode=pl.Buffered(1)),
            pl.BlockSpec((1, Cout), lambda n: (0, 0), pipeline_mode=pl.Buffered(1)),
        ],
        out_specs=pl.BlockSpec((1, H * W, Cout), lambda n: (n, 0, 0)),
        scratch_shapes=[pltpu.VMEM(((H + 2) * W, 3 * Cin), jnp.bfloat16)],
        compiler_params=pltpu.CompilerParams(
            dimension_semantics=("parallel",),
            vmem_limit_bytes=32 * 1024 * 1024),
    )(x_flat, gamma2, beta2, gsum, gbc, w3, bias2)

    return out_flat.reshape(N, H, W, Cout)


def _reference(x_nhwc, gamma, beta, w_oihw, bias):
    """Pure-JAX f32 reference (NHWC), matches PyTorch GroupNorm/SiLU/Conv2d semantics."""
    N, H, W, C = x_nhwc.shape
    Cout = w_oihw.shape[0]
    g = C // N_GROUPS
    xg = x_nhwc.reshape(N, H, W, N_GROUPS, g)
    mean = xg.mean(axis=(1, 2, 4), keepdims=True)
    var = ((xg - mean) ** 2).mean(axis=(1, 2, 4), keepdims=True)
    xn = ((xg - mean) / jnp.sqrt(var + EPS)).reshape(N, H, W, C)
    y = xn * gamma.reshape(1, 1, 1, C) + beta.reshape(1, 1, 1, C)
    y = y * jax.nn.sigmoid(y)
    yp = jnp.pad(y, ((0, 0), (1, 1), (1, 1), (0, 0)))
    w_taps = jnp.transpose(w_oihw, (2, 3, 1, 0)).reshape(9, C, Cout)
    out = jnp.zeros((N, H, W, Cout), dtype=jnp.float32)
    for k in range(9):
        dy, dx = k // 3, k % 3
        out = out + jnp.einsum("nhwc,co->nhwo",
                               yp[:, dy:dy + H, dx:dx + W, :], w_taps[k])
    return out + bias.reshape(1, 1, 1, Cout)


if __name__ == "__main__":
    # Small shapes consistent with the module: GroupNorm(32, Cin) needs Cin % 32 == 0.
    N, Cin, Cout, H, W = 2, 64, 32, 16, 16

    key = jax.random.PRNGKey(0)
    k_x, k_g, k_b, k_w, k_bias = jax.random.split(key, 5)

    # PyTorch input would be NCHW (N, Cin, H, W); we build NHWC directly.
    x_nhwc = jax.random.normal(k_x, (N, H, W, Cin), dtype=jnp.float32)

    # Deterministic synthetic parameters (shapes match nn.GroupNorm / nn.Conv2d).
    gamma = 1.0 + 0.1 * jax.random.normal(k_g, (Cin,), dtype=jnp.float32)
    beta = 0.1 * jax.random.normal(k_b, (Cin,), dtype=jnp.float32)
    w_oihw = 0.1 * jax.random.normal(k_w, (Cout, Cin, 3, 3), dtype=jnp.float32)
    bias = 0.1 * jax.random.normal(k_bias, (Cout,), dtype=jnp.float32)

    out = final_layer(x_nhwc, gamma, beta, w_oihw, bias)
    out = jax.block_until_ready(out)

    ref = _reference(x_nhwc, gamma, beta, w_oihw, bias)
    assert out.shape == (N, H, W, Cout), out.shape
    # Tolerance covers the deliberate bf16 cast of the conv matmul operands.
    err = float(jnp.max(jnp.abs(out - ref)))
    assert jnp.allclose(out, ref, atol=3e-2, rtol=1e-2), err

    print("KERNEL_OK")
</pallas_src>

<mosaic_0001>
module attributes {stable_mosaic.version = 11 : i64} {
  func.func @_final_layer_kernel(%arg0: i32, %arg1: memref<1x256x64xf32, #tpu.memory_space<vmem>>, %arg2: memref<1x64xf32, #tpu.memory_space<vmem>>, %arg3: memref<1x64xf32, #tpu.memory_space<vmem>>, %arg4: memref<64x32xf32, #tpu.memory_space<vmem>>, %arg5: memref<32x64xf32, #tpu.memory_space<vmem>>, %arg6: memref<3x192x32xbf16, #tpu.memory_space<vmem>>, %arg7: memref<1x32xf32, #tpu.memory_space<vmem>>, %arg8: memref<1x256x32xf32, #tpu.memory_space<vmem>>, %arg9: memref<288x192xbf16, #tpu.memory_space<vmem>>) attributes {dimension_semantics = [#tpu.dimension_semantics<parallel>], iteration_bounds = array<i64: 2>, scalar_prefetch = 0 : i64, scratch_operands = 1 : i64, tpu.core_type = #tpu.core_type<tc>, window_params = [{transform_indices = @transform_0, window_bounds = array<i64: 1, 256, 64>}, {pipeline_mode = #tpu.pipeline_mode<synchronous>, transform_indices = @transform_1, window_bounds = array<i64: 1, 64>}, {pipeline_mode = #tpu.pipeline_mode<synchronous>, transform_indices = @transform_2, window_bounds = array<i64: 1, 64>}, {pipeline_mode = #tpu.pipeline_mode<synchronous>, transform_indices = @transform_3, window_bounds = array<i64: 64, 32>}, {pipeline_mode = #tpu.pipeline_mode<synchronous>, transform_indices = @transform_4, window_bounds = array<i64: 32, 64>}, {pipeline_mode = #tpu.pipeline_mode<synchronous>, transform_indices = @transform_5, window_bounds = array<i64: 3, 192, 32>}, {pipeline_mode = #tpu.pipeline_mode<synchronous>, transform_indices = @transform_6, window_bounds = array<i64: 1, 32>}, {transform_indices = @transform_7, window_bounds = array<i64: 1, 256, 32>}]} {
    %cst = arith.constant 0.000000e+00 : bf16
    %0 = vector.broadcast %cst : bf16 to vector<16x192xbf16>
    %c0 = arith.constant 0 : index
    %c0_0 = arith.constant 0 : index
    %1 = vector.load %arg9[%c0, %c0_0] : memref<288x192xbf16, #tpu.memory_space<vmem>>, vector<16x192xbf16>
    tpu.vector_store %arg9[%c0, %c0_0], %0 {strides = array<i32>} : memref<288x192xbf16, #tpu.memory_space<vmem>>, vector<16x192xbf16>,
    %c272 = arith.constant 272 : index
    %c0_1 = arith.constant 0 : index
    %2 = vector.load %arg9[%c272, %c0_1] : memref<288x192xbf16, #tpu.memory_space<vmem>>, vector<16x192xbf16>
    tpu.vector_store %arg9[%c272, %c0_1], %0 {strides = array<i32>} : memref<288x192xbf16, #tpu.memory_space<vmem>>, vector<16x192xbf16>,
    %c0_2 = arith.constant 0 : index
    %c0_3 = arith.constant 0 : index
    %c0_4 = arith.constant 0 : index
    %3 = vector.load %arg1[%c0_2, %c0_3, %c0_4] : memref<1x256x64xf32, #tpu.memory_space<vmem>>, vector<1x256x64xf32>
    %4 = vector.shape_cast %3 : vector<1x256x64xf32> to vector<256x64xf32>
    %cst_5 = arith.constant dense<0.000000e+00> : vector<64xf32>
    %5 = vector.multi_reduction <add>, %4, %cst_5 [0] : vector<256x64xf32> to vector<64xf32>
    %6 = vector.shape_cast %5 : vector<64xf32> to vector<1x64xf32>
    %cst_6 = arith.constant 2.560000e+02 : f32
    %7 = vector.broadcast %cst_6 : f32 to vector<1x64xf32>
    %8 = arith.divf %6, %7 : vector<1x64xf32>
    %c0_7 = arith.constant 0 : index
    %c0_8 = arith.constant 0 : index
    %9 = vector.load %arg4[%c0_7, %c0_8] : memref<64x32xf32, #tpu.memory_space<vmem>>, vector<64x32xf32>
    %cst_9 = arith.constant dense<0.000000e+00> : vector<1x32xf32>
    %10 = tpu.matmul %8, %9, %cst_9 {dimension_numbers = #tpu.dot_dimension_numbers<[1], [0], [0], [1], [0, 0, 1, 1], [], []>} : vector<1x64xf32>, vector<64x32xf32>, vector<1x32xf32> -> vector<1x32xf32>
    %c0_10 = arith.constant 0 : index
    %c0_11 = arith.constant 0 : index
    %11 = vector.load %arg5[%c0_10, %c0_11] : memref<32x64xf32, #tpu.memory_space<vmem>>, vector<32x64xf32>
    %cst_12 = arith.constant dense<0.000000e+00> : vector<1x64xf32>
    %12 = tpu.matmul %10, %11, %cst_12 {dimension_numbers = #tpu.dot_dimension_numbers<[1], [0], [0], [1], [0, 0, 1, 1], [], []>} : vector<1x32xf32>, vector<32x64xf32>, vector<1x64xf32> -> vector<1x64xf32>
    %13 = vector.broadcast %12 : vector<1x64xf32> to vector<256x64xf32>
    %14 = arith.subf %4, %13 : vector<256x64xf32>
    %15 = arith.mulf %14, %14 : vector<256x64xf32>
    %cst_13 = arith.constant dense<0.000000e+00> : vector<64xf32>
    %16 = vector.multi_reduction <add>, %15, %cst_13 [0] : vector<256x64xf32> to vector<64xf32>
    %17 = vector.shape_cast %16 : vector<64xf32> to vector<1x64xf32>
    %cst_14 = arith.constant 2.560000e+02 : f32
    %18 = vector.broadcast %cst_14 : f32 to vector<1x64xf32>
    %19 = arith.divf %17, %18 : vector<1x64xf32>
    %c0_15 = arith.constant 0 : index
    %c0_16 = arith.constant 0 : index
    %20 = vector.load %arg4[%c0_15, %c0_16] : memref<64x32xf32, #tpu.memory_space<vmem>>, vector<64x32xf32>
    %cst_17 = arith.constant dense<0.000000e+00> : vector<1x32xf32>
    %21 = tpu.matmul %19, %20, %cst_17 {dimension_numbers = #tpu.dot_dimension_numbers<[1], [0], [0], [1], [0, 0, 1, 1], [], []>} : vector<1x64xf32>, vector<64x32xf32>, vector<1x32xf32> -> vector<1x32xf32>
    %c0_18 = arith.constant 0 : index
    %c0_19 = arith.constant 0 : index
    %22 = vector.load %arg5[%c0_18, %c0_19] : memref<32x64xf32, #tpu.memory_space<vmem>>, vector<32x64xf32>
    %cst_20 = arith.constant dense<0.000000e+00> : vector<1x64xf32>
    %23 = tpu.matmul %21, %22, %cst_20 {dimension_numbers = #tpu.dot_dimension_numbers<[1], [0], [0], [1], [0, 0, 1, 1], [], []>} : vector<1x32xf32>, vector<32x64xf32>, vector<1x64xf32> -> vector<1x64xf32>
    %cst_21 = arith.constant 9.99999974E-6 : f32
    %24 = vector.broadcast %cst_21 : f32 to vector<1x64xf32>
    %25 = arith.addf %23, %24 : vector<1x64xf32>
    %26 = math.rsqrt %25 : vector<1x64xf32>
    %c0_22 = arith.constant 0 : index
    %c0_23 = arith.constant 0 : index
    %27 = vector.load %arg2[%c0_22, %c0_23] : memref<1x64xf32, #tpu.memory_space<vmem>>, vector<1x64xf32>
    %28 = arith.mulf %26, %27 : vector<1x64xf32>
    %29 = vector.broadcast %28 : vector<1x64xf32> to vector<256x64xf32>
    %30 = arith.mulf %14, %29 : vector<256x64xf32>
    %c0_24 = arith.constant 0 : index
    %c0_25 = arith.constant 0 : index
    %31 = vector.load %arg3[%c0_24, %c0_25] : memref<1x64xf32, #tpu.memory_space<vmem>>, vector<1x64xf32>
    %32 = vector.broadcast %31 : vector<1x64xf32> to vector<256x64xf32>
    %33 = arith.addf %30, %32 : vector<256x64xf32>
    %34 = arith.negf %33 : vector<256x64xf32>
    %35 = math.exp %34 : vector<256x64xf32>
    %cst_26 = arith.constant 1.000000e+00 : f32
    %36 = vector.broadcast %cst_26 : f32 to vector<256x64xf32>
    %37 = arith.addf %36, %35 : vector<256x64xf32>
    %38 = arith.divf %36, %37 : vector<256x64xf32>
    %39 = arith.mulf %33, %38 : vector<256x64xf32>
    %40 = tpu.iota {dimensions = array<i32: 0>} : vector<256x1xi32>
    %c16_i32 = arith.constant 16 : i32
    %c0_i32 = arith.constant 0 : i32
    %41 = arith.cmpi eq, %c16_i32, %c0_i32 : i32
    %c1_i32 = arith.constant 1 : i32
    %42 = arith.select %41, %c1_i32, %c16_i32 : i32
    %43 = vector.broadcast %42 : i32 to vector<256x1xi32>
    %44 = arith.remsi %40, %43 : vector<256x1xi32>
    %c0_i32_27 = arith.constant 0 : i32
    %45 = vector.broadcast %c0_i32_27 : i32 to vector<256x1xi32>
    %46 = arith.cmpi ne, %44, %45 : vector<256x1xi32>
    %c0_i32_28 = arith.constant 0 : i32
    %47 = vector.broadcast %c0_i32_28 : i32 to vector<256x1xi32>
    %48 = arith.cmpi slt, %44, %47 : vector<256x1xi32>
    %c0_i32_29 = arith.constant 0 : i32
    %49 = arith.cmpi slt, %42, %c0_i32_29 : i32
    %50 = vector.broadcast %49 : i1 to vector<256x1xi1>
    %51 = vector.broadcast %50 : vector<256x1xi1> to vector<256x1xi1>
    %52 = arith.xori %48, %51 : vector<256x1xi1>
    %53 = arith.andi %52, %46 : vector<256x1xi1>
    %54 = vector.broadcast %42 : i32 to vector<256x1xi32>
    %55 = arith.addi %44, %54 : vector<256x1xi32>
    %56 = arith.select %53, %55, %44 : vector<256x1xi1>, vector<256x1xi32>
    %c0_i32_30 = arith.constant 0 : i32
    %57 = vector.broadcast %c0_i32_30 : i32 to vector<256x1xi32>
    %58 = arith.cmpi eq, %56, %57 : vector<256x1xi32>
    %c1_i32_31 = arith.constant 1 : i32
    %59 = tpu.dynamic_rotate %39 by %c1_i32_31 dim 0 : vector<256x64xf32>, i32 -> vector<256x64xf32>
    %cst_32 = arith.constant 0.000000e+00 : f32
    %60 = vector.shape_cast %58 : vector<256x1xi1> to vector<256x1xi1>
    %61 = vector.broadcast %60 : vector<256x1xi1> to vector<256x64xi1>
    %62 = vector.broadcast %cst_32 : f32 to vector<256x64xf32>
    %63 = arith.select %61, %62, %59 : vector<256x64xi1>, vector<256x64xf32>
    %c15_i32 = arith.constant 15 : i32
    %64 = vector.broadcast %c15_i32 : i32 to vector<256x1xi32>
    %65 = arith.cmpi eq, %56, %64 : vector<256x1xi32>
    %c255_i32 = arith.constant 255 : i32
    %66 = tpu.dynamic_rotate %39 by %c255_i32 dim 0 : vector<256x64xf32>, i32 -> vector<256x64xf32>
    %cst_33 = arith.constant 0.000000e+00 : f32
    %67 = vector.shape_cast %65 : vector<256x1xi1> to vector<256x1xi1>
    %68 = vector.broadcast %67 : vector<256x1xi1> to vector<256x64xi1>
    %69 = vector.broadcast %cst_33 : f32 to vector<256x64xf32>
    %70 = arith.select %68, %69, %66 : vector<256x64xi1>, vector<256x64xf32>
    %71 = arith.truncf %63 : vector<256x64xf32> to vector<256x64xbf16>
    %72 = arith.truncf %39 : vector<256x64xf32> to vector<256x64xbf16>
    %73 = arith.truncf %70 : vector<256x64xf32> to vector<256x64xbf16>
    %74 = tpu.concatenate %71, %72, %73 in 1 : vector<256x64xbf16>, vector<256x64xbf16>, vector<256x64xbf16> -> vector<256x192xbf16>
    %c16 = arith.constant 16 : index
    %c0_34 = arith.constant 0 : index
    %75 = vector.load %arg9[%c16, %c0_34] : memref<288x192xbf16, #tpu.memory_space<vmem>>, vector<256x192xbf16>
    tpu.vector_store %arg9[%c16, %c0_34], %74 {strides = array<i32>} : memref<288x192xbf16, #tpu.memory_space<vmem>>, vector<256x192xbf16>,
    %c0_35 = arith.constant 0 : index
    %c0_36 = arith.constant 0 : index
    %76 = vector.load %arg7[%c0_35, %c0_36] : memref<1x32xf32, #tpu.memory_space<vmem>>, vector<1x32xf32>
    %c0_i32_37 = arith.constant 0 : i32
    %c128_i32 = arith.constant 128 : i32
    %77 = arith.muli %c0_i32_37, %c128_i32 : i32
    %78 = tpu.assume_multiple %77, 128 : i32
    %cst_38 = arith.constant 0.000000e+00 : f32
    %79 = vector.broadcast %cst_38 : f32 to vector<128x32xf32>
    %c0_i32_39 = arith.constant 0 : i32
    %80 = arith.addi %78, %c0_i32_39 : i32
    %81 = arith.index_cast %80 : i32 to index
    %c0_40 = arith.constant 0 : index
    %82 = vector.load %arg9[%81, %c0_40] : memref<288x192xbf16, #tpu.memory_space<vmem>>, vector<128x192xbf16>
    %c0_41 = arith.constant 0 : index
    %c0_42 = arith.constant 0 : index
    %c0_43 = arith.constant 0 : index
    %83 = vector.load %arg6[%c0_41, %c0_42, %c0_43] : memref<3x192x32xbf16, #tpu.memory_space<vmem>>, vector<1x192x32xbf16>
    %84 = vector.shape_cast %83 : vector<1x192x32xbf16> to vector<192x32xbf16>
    %cst_44 = arith.constant dense<0.000000e+00> : vector<128x32xf32>
    %85 = tpu.matmul %82, %84, %cst_44 {dimension_numbers = #tpu.dot_dimension_numbers<[1], [0], [0], [1], [0, 0, 1, 1], [], []>} : vector<128x192xbf16>, vector<192x32xbf16>, vector<128x32xf32> -> vector<128x32xf32>
    %86 = arith.addf %79, %85 : vector<128x32xf32>
    %c16_i32_45 = arith.constant 16 : i32
    %87 = arith.addi %78, %c16_i32_45 : i32
    %88 = arith.index_cast %87 : i32 to index
    %c0_46 = arith.constant 0 : index
    %89 = vector.load %arg9[%88, %c0_46] : memref<288x192xbf16, #tpu.memory_space<vmem>>, vector<128x192xbf16>
    %c1 = arith.constant 1 : index
    %c0_47 = arith.constant 0 : index
    %c0_48 = arith.constant 0 : index
    %90 = vector.load %arg6[%c1, %c0_47, %c0_48] : memref<3x192x32xbf16, #tpu.memory_space<vmem>>, vector<1x192x32xbf16>
    %91 = vector.shape_cast %90 : vector<1x192x32xbf16> to vector<192x32xbf16>
    %cst_49 = arith.constant dense<0.000000e+00> : vector<128x32xf32>
    %92 = tpu.matmul %89, %91, %cst_49 {dimension_numbers = #tpu.dot_dimension_numbers<[1], [0], [0], [1], [0, 0, 1, 1], [], []>} : vector<128x192xbf16>, vector<192x32xbf16>, vector<128x32xf32> -> vector<128x32xf32>
    %93 = arith.addf %86, %92 : vector<128x32xf32>
    %c32_i32 = arith.constant 32 : i32
    %94 = arith.addi %78, %c32_i32 : i32
    %95 = arith.index_cast %94 : i32 to index
    %c0_50 = arith.constant 0 : index
    %96 = vector.load %arg9[%95, %c0_50] : memref<288x192xbf16, #tpu.memory_space<vmem>>, vector<128x192xbf16>
    %c2 = arith.constant 2 : index
    %c0_51 = arith.constant 0 : index
    %c0_52 = arith.constant 0 : index
    %97 = vector.load %arg6[%c2, %c0_51, %c0_52] : memref<3x192x32xbf16, #tpu.memory_space<vmem>>, vector<1x192x32xbf16>
    %98 = vector.shape_cast %97 : vector<1x192x32xbf16> to vector<192x32xbf16>
    %cst_53 = arith.constant dense<0.000000e+00> : vector<128x32xf32>
    %99 = tpu.matmul %96, %98, %cst_53 {dimension_numbers = #tpu.dot_dimension_numbers<[1], [0], [0], [1], [0, 0, 1, 1], [], []>} : vector<128x192xbf16>, vector<192x32xbf16>, vector<128x32xf32> -> vector<128x32xf32>
    %100 = arith.addf %93, %99 : vector<128x32xf32>
    %101 = vector.broadcast %76 : vector<1x32xf32> to vector<128x32xf32>
    %102 = arith.addf %100, %101 : vector<128x32xf32>
    %c0_54 = arith.constant 0 : index
    %103 = arith.index_cast %78 : i32 to index
    %c0_55 = arith.constant 0 : index
    %104 = vector.load %arg8[%c0_54, %103, %c0_55] : memref<1x256x32xf32, #tpu.memory_space<vmem>>, vector<1x128x32xf32>
    %105 = vector.shape_cast %104 : vector<1x128x32xf32> to vector<128x32xf32>
    %106 = vector.shape_cast %102 : vector<128x32xf32> to vector<1x128x32xf32>
    tpu.vector_store %arg8[%c0_54, %103, %c0_55], %106 {strides = array<i32>} : memref<1x256x32xf32, #tpu.memory_space<vmem>>, vector<1x128x32xf32>,
    %c1_i32_56 = arith.constant 1 : i32
    %c128_i32_57 = arith.constant 128 : i32
    %107 = arith.muli %c1_i32_56, %c128_i32_57 : i32
    %108 = tpu.assume_multiple %107, 128 : i32
    %cst_58 = arith.constant 0.000000e+00 : f32
    %109 = vector.broadcast %cst_58 : f32 to vector<128x32xf32>
    %c0_i32_59 = arith.constant 0 : i32
    %110 = arith.addi %108, %c0_i32_59 : i32
    %111 = arith.index_cast %110 : i32 to index
    %c0_60 = arith.constant 0 : index
    %112 = vector.load %arg9[%111, %c0_60] : memref<288x192xbf16, #tpu.memory_space<vmem>>, vector<128x192xbf16>
    %c0_61 = arith.constant 0 : index
    %c0_62 = arith.constant 0 : index
    %c0_63 = arith.constant 0 : index
    %113 = vector.load %arg6[%c0_61, %c0_62, %c0_63] : memref<3x192x32xbf16, #tpu.memory_space<vmem>>, vector<1x192x32xbf16>
    %114 = vector.shape_cast %113 : vector<1x192x32xbf16> to vector<192x32xbf16>
    %cst_64 = arith.constant dense<0.000000e+00> : vector<128x32xf32>
    %115 = tpu.matmul %112, %114, %cst_64 {dimension_numbers = #tpu.dot_dimension_numbers<[1], [0], [0], [1], [0, 0, 1, 1], [], []>} : vector<128x192xbf16>, vector<192x32xbf16>, vector<128x32xf32> -> vector<128x32xf32>
    %116 = arith.addf %109, %115 : vector<128x32xf32>
    %c16_i32_65 = arith.constant 16 : i32
    %117 = arith.addi %108, %c16_i32_65 : i32
    %118 = arith.index_cast %117 : i32 to index
    %c0_66 = arith.constant 0 : index
    %119 = vector.load %arg9[%118, %c0_66] : memref<288x192xbf16, #tpu.memory_space<vmem>>, vector<128x192xbf16>
    %c1_67 = arith.constant 1 : index
    %c0_68 = arith.constant 0 : index
    %c0_69 = arith.constant 0 : index
    %120 = vector.load %arg6[%c1_67, %c0_68, %c0_69] : memref<3x192x32xbf16, #tpu.memory_space<vmem>>, vector<1x192x32xbf16>
    %121 = vector.shape_cast %120 : vector<1x192x32xbf16> to vector<192x32xbf16>
    %cst_70 = arith.constant dense<0.000000e+00> : vector<128x32xf32>
    %122 = tpu.matmul %119, %121, %cst_70 {dimension_numbers = #tpu.dot_dimension_numbers<[1], [0], [0], [1], [0, 0, 1, 1], [], []>} : vector<128x192xbf16>, vector<192x32xbf16>, vector<128x32xf32> -> vector<128x32xf32>
    %123 = arith.addf %116, %122 : vector<128x32xf32>
    %c32_i32_71 = arith.constant 32 : i32
    %124 = arith.addi %108, %c32_i32_71 : i32
    %125 = arith.index_cast %124 : i32 to index
    %c0_72 = arith.constant 0 : index
    %126 = vector.load %arg9[%125, %c0_72] : memref<288x192xbf16, #tpu.memory_space<vmem>>, vector<128x192xbf16>
    %c2_73 = arith.constant 2 : index
    %c0_74 = arith.constant 0 : index
    %c0_75 = arith.constant 0 : index
    %127 = vector.load %arg6[%c2_73, %c0_74, %c0_75] : memref<3x192x32xbf16, #tpu.memory_space<vmem>>, vector<1x192x32xbf16>
    %128 = vector.shape_cast %127 : vector<1x192x32xbf16> to vector<192x32xbf16>
    %cst_76 = arith.constant dense<0.000000e+00> : vector<128x32xf32>
    %129 = tpu.matmul %126, %128, %cst_76 {dimension_numbers = #tpu.dot_dimension_numbers<[1], [0], [0], [1], [0, 0, 1, 1], [], []>} : vector<128x192xbf16>, vector<192x32xbf16>, vector<128x32xf32> -> vector<128x32xf32>
    %130 = arith.addf %123, %129 : vector<128x32xf32>
    %131 = vector.broadcast %76 : vector<1x32xf32> to vector<128x32xf32>
    %132 = arith.addf %130, %131 : vector<128x32xf32>
    %c0_77 = arith.constant 0 : index
    %133 = arith.index_cast %108 : i32 to index
    %c0_78 = arith.constant 0 : index
    %134 = vector.load %arg8[%c0_77, %133, %c0_78] : memref<1x256x32xf32, #tpu.memory_space<vmem>>, vector<1x128x32xf32>
    %135 = vector.shape_cast %134 : vector<1x128x32xf32> to vector<128x32xf32>
    %136 = vector.shape_cast %132 : vector<128x32xf32> to vector<1x128x32xf32>
    tpu.vector_store %arg8[%c0_77, %133, %c0_78], %136 {strides = array<i32>} : memref<1x256x32xf32, #tpu.memory_space<vmem>>, vector<1x128x32xf32>,
    %c2_i32 = arith.constant 2 : i32
    return
  }
  func.func @transform_0(%arg0: i32) -> (i32, i32, i32) {
    %c0_i32 = arith.constant 0 : i32
    %c0_i32_0 = arith.constant 0 : i32
    %c0_i32_1 = arith.constant 0 : i32
    return %arg0, %c0_i32, %c0_i32_0 : i32, i32, i32
  }
  func.func @transform_1(%arg0: i32) -> (i32, i32) {
    %c0_i32 = arith.constant 0 : i32
    %c0_i32_0 = arith.constant 0 : i32
    %c0_i32_1 = arith.constant 0 : i32
    return %c0_i32, %c0_i32_0 : i32, i32
  }
  func.func @transform_2(%arg0: i32) -> (i32, i32) {
    %c0_i32 = arith.constant 0 : i32
    %c0_i32_0 = arith.constant 0 : i32
    %c0_i32_1 = arith.constant 0 : i32
    return %c0_i32, %c0_i32_0 : i32, i32
  }
  func.func @transform_3(%arg0: i32) -> (i32, i32) {
    %c0_i32 = arith.constant 0 : i32
    %c0_i32_0 = arith.constant 0 : i32
    %c0_i32_1 = arith.constant 0 : i32
    return %c0_i32, %c0_i32_0 : i32, i32
  }
  func.func @transform_4(%arg0: i32) -> (i32, i32) {
    %c0_i32 = arith.constant 0 : i32
    %c0_i32_0 = arith.constant 0 : i32
    %c0_i32_1 = arith.constant 0 : i32
    return %c0_i32, %c0_i32_0 : i32, i32
  }
  func.func @transform_5(%arg0: i32) -> (i32, i32, i32) {
    %c0_i32 = arith.constant 0 : i32
    %c0_i32_0 = arith.constant 0 : i32
    %c0_i32_1 = arith.constant 0 : i32
    %c0_i32_2 = arith.constant 0 : i32
    return %c0_i32, %c0_i32_0, %c0_i32_1 : i32, i32, i32
  }
  func.func @transform_6(%arg0: i32) -> (i32, i32) {
    %c0_i32 = arith.constant 0 : i32
    %c0_i32_0 = arith.constant 0 : i32
    %c0_i32_1 = arith.constant 0 : i32
    return %c0_i32, %c0_i32_0 : i32, i32
  }
  func.func @transform_7(%arg0: i32) -> (i32, i32, i32) {
    %c0_i32 = arith.constant 0 : i32
    %c0_i32_0 = arith.constant 0 : i32
    %c0_i32_1 = arith.constant 0 : i32
    return %arg0, %c0_i32, %c0_i32_0 : i32, i32, i32
  }
}

</mosaic_0001>

<bundles_post_ra>
// kernel: final_layer.1
= control target key start
LH: loop header
LB: loop body
LE: loop exit
PB: predicated region body
PF: predicated region fallthrough
CT: control target
= control target key end

     0   :  { %12 = vsyncpa [#allocation4], 0  ;;  %s6917_s0 = inlined_call_operand.vmem [shape: f32[2,256,64], index: 0, kind: input, shape index: {}]   ;;  %s6918_s1 = inlined_call_operand.vmem [shape: f32[1,64], index: 1, kind: input, shape index: {}]   ;;  %s6919_s2 = inlined_call_operand.vmem [shape: f32[1,64], index: 2, kind: input, shape index: {}]   ;;  %s6920_s3 = inlined_call_operand.vmem [shape: f32[64,32], index: 3, kind: input, shape index: {}]   ;;  %s6921_s4 = inlined_call_operand.vmem [shape: f32[32,64], index: 4, kind: input, shape index: {}]   ;;  %s6922_s5 = inlined_call_operand.vmem [shape: bf16[3,192,32], index: 5, kind: input, shape index: {}]   ;;  %s6923_s6 = inlined_call_operand.vmem [shape: f32[1,32], index: 6, kind: input, shape index: {}]   ;;  %s6924_s7 = inlined_call_operand.hbm [shape: f32[2,256,32], index: 7, kind: output, shape index: {}]  }
   0x1   :  { %14 = vsyncpa [#allocation4 + $0x1], 0  ;;  %s4514_s24 = smov 0   ;;  %s4516_s25 = smov 0  }
   0x2   :  { %s4518_s26 = smov 0   ;;  %s4520_s27 = smov 0  }
   0x3 LB: > { %s4535_s28 = sadd.s32 4294967295, %s4464_s27   ;;  %s3745_s29 = sadd.s32 4294967294, %s4464_s27   ;;  %s4464_s27 = sphi %s4520_s27, %s7192_s27   ;;  %s4460_s26 = sphi %s4518_s26, %s7191_s26   ;;  %s4456_s25 = sphi %s4516_s25, %s7190_s25   ;;  %s4452_s24 = sphi %s4514_s24, %s7189_s24  }
   0x4   : > { %s4539_s30 = sadd.s32 1, %s4464_s27   ;;  %s179_s8 = sadd.s32 1, %s4460_s26 }
   0x5   : > { %s176_s9 = ssub.s32 %s4464_s27, %s4539_s30  ;;  %p189_p0 = scmp.ne.s32.totalorder %s4460_s26, %s4456_s25 }
   0x6   : > { %p177_p1 = scmp.eq.s32.totalorder %s176_s9, 0  ;;  %p190_p2 = scmp.eq.s32.totalorder %s4535_s28, 1 }
   0x7   : > { %p195_p3 = scmp.ne.s32.totalorder %s4456_s25, %s4452_s24  ;;  %p196_p4 = scmp.eq.s32.totalorder %s3745_s29, 1 }
   0x8   : > { %s4550_s10 = scalar_select %p177_p1, %s4460_s26, %s179_s8  }
   0x9   : > { %p4552_p5 = por %p190_p2, %p189_p0  ;;  %p4556_p6 = por %p196_p4, %p195_p3 }
   0xa   : > { %p3748_p7 = scmp.ge.s32.totalorder %s4464_s27, 1  ;;  %p240_p8 = scmp.lt.s32.totalorder %s4464_s27, 3 }
   0xc   : > { %p241_p9 = pnand %p3748_p7, %p240_p8 }
   0xe   : > { %244 = sbr.rel (%p241_p9) target bundleno = 1627 (0x65b), region = 48 }
  0x15   : > { %v386_v0 = vld [vmem:[%s6920_s3] sm:$0xff]  ;;  %v387_v1 = vld [vmem:[%s6920_s3 + $0x8] sm:$0xff]  ;;  %v388_v2 = vld [vmem:[%s6920_s3 + $0x10] sm:$0xff]  ;;  %v6930_v3 = vmov 0.0|0.0   ;;  %vm4467_vm0 = vmmov 0   ;;  %v6925_v6 = vmov 0.0  }
  0x16   : > { %4117 = vmatprep.subr.bf16.mxu0 %v6930_v3  ;;  %v4572_v4 = vpack.c.bf16 %v387_v1, %v386_v0  ;;  %v389_v5 = vld [vmem:[%s6920_s3 + $0x18] sm:$0xff]  ;;  %4073 = vmatprep.mubr.msk.f32.mxu0 %vm4467_vm0, %v6925_v6  ;;  %p272_p10 = scmp.lt.s32.totalorder %s4535_s28, 1  ;;  %v390_v7 = vld [vmem:[%s6920_s3 + $0x20] sm:$0xff]  ;;  %v391_v8 = vld [vmem:[%s6920_s3 + $0x28] sm:$0xff]  ;;  %vm279_vm1 = vcmask 523264   ;;  %vm471_vm2 = vcmask 261120  }
  0x17   : > { %4129 = vmatprep.subr.bf16.mxu1 %v6930_v3  ;;  %v467_v9 = vld [vmem:[%s6921_s4] sm:$0xff]  ;;  %4084 = vmatprep.mubr.msk.f32.mxu1 %vm4467_vm0, %v6925_v6  ;;  %v4593_v10 = vpack.c.bf16 %v389_v5, %v388_v2  ;;  %v468_v11 = vld [vmem:[%s6921_s4 + $0x8] sm:$0xff]  ;;  %v469_v12 = vld [vmem:[%s6921_s4 + $0x10] sm:$0xff]  ;;  %v4623_v18 = vpack.c.bf16 %v391_v8, %v390_v7  ;;  %s269_s23 = sand.u32 1, %s4456_s25   ;;  %s4471_s20 = smov [#allocation3]  }
  0x18   : > { %4119 = vmatpush3.bf16.msra.mxu0 %v4572_v4  ;;  %s273_s13 = scalar_select %p272_p10, %s4535_s28, 1  ;;  %v470_v13 = vld [vmem:[%s6921_s4 + $0x18] sm:$0xff]  ;;  %v4606_v14 = vpack.c.bf16 %v468_v11, %v467_v9  ;;  %v392_v15 = vld [vmem:[%s6920_s3 + $0x30] sm:$0xff] }
  0x19   : > { %4120 = vmatprep.subr.bf16.mxu0 %v6930_v3  ;;  %v393_v16 = vld [vmem:[%s6920_s3 + $0x38] sm:$0xff]  ;;  %v4620_v17 = vpack.c.bf16 %v470_v13, %v469_v12  ;;  %s3749_s8 = sshll.u32 %s269_s23, 8  ;;  %s4406_s21 = sshll.u32 %s4471_s20, 4  ;;  %s4407_s21 = int_to_ptr.vmem [resolvable:$false] %s4406_s21 }
  0x1a   : > { %s4027_s29 = sshll.u32 %s273_s13, 8  ;;  %4131 = vmatpush3.bf16.msra.mxu1 %v4606_v14  ;;  %v4662_v33 = vpack.c.bf16 %v393_v16, %v392_v15  ;;  %s4028_s13 = sshll.u32 %s4535_s28, 12 }
  0x1b   : > { %s4617_s14 = scalar_lea.vmem %s6917_s0, %s4027_s29  ;;  %4132 = vmatprep.subr.bf16.mxu1 %v6930_v3  ;;  %s4470_s29 = smov 64  }
  0x1c   : > { %4122 = vmatpush3.bf16.msra.mxu0 %v4593_v10  ;;  %v4626_v19 = vld [vmem:[%s4617_s14] sm:$0xff]  ;;  %v4629_v20 = vld [vmem:[%s4617_s14 + $0x8] sm:$0xff]  ;;  %v4632_v21 = vld [vmem:[%s4617_s14 + $0x10] sm:$0xff]  ;;  %s6865_s18 = scalar_lea.hbm %s6924_s7, %s4028_s13  ;;  %s6876_s28 = scalar_lea.sflag [#allocation4], %s269_s23 }
  0x1d   : > { %4123 = vmatprep.subr.bf16.mxu0 %v6930_v3  ;;  %v4637_v22 = vld [vmem:[%s4617_s14 + $0x18] sm:$0xff]  ;;  %v4640_v23 = vld [vmem:[%s4617_s14 + $0x20] sm:$0xff]  ;;  %v4643_v24 = vld [vmem:[%s4617_s14 + $0x28] sm:$0xff]  ;;  %v315_v25 = vsel %vm279_vm1, %v4626_v19, 0.0  ;;  %v316_v26 = vsel %vm279_vm1, %v4629_v20, 0.0  ;;  %v318_v27 = vsel %vm279_vm1, %v4632_v21, 0.0 }
  0x1e   : > { %v4652_v28 = vld [vmem:[%s4617_s14 + $0x30] sm:$0xff]  ;;  %v4655_v29 = vld [vmem:[%s4617_s14 + $0x38] sm:$0xff]  ;;  %v4658_v30 = vld [vmem:[%s4617_s14 + $0x40] sm:$0xff]  ;;  %v317_v31 = vadd.f32 %v316_v26, %v315_v25  ;;  %v320_v32 = vsel %vm279_vm1, %v4637_v22, 0.0  ;;  %v322_v37 = vsel %vm279_vm1, %v4640_v23, 0.0  ;;  %v324_v38 = vsel %vm279_vm1, %v4643_v24, 0.0  ;;  %4134 = vmatpush3.bf16.msra.mxu1 %v4620_v17 }
  0x1f   : > { %v4665_v34 = vld [vmem:[%s4617_s14 + $0x48] sm:$0xff]  ;;  %v4668_v35 = vld [vmem:[%s4617_s14 + $0x50] sm:$0xff]  ;;  %v4671_v36 = vld [vmem:[%s4617_s14 + $0x58] sm:$0xff]  ;;  %v326_v39 = vsel %vm279_vm1, %v4652_v28, 0.0  ;;  %v328_v44 = vsel %vm279_vm1, %v4655_v29, 0.0  ;;  %v330_v45 = vsel %vm279_vm1, %v4658_v30, 0.0  ;;  %4135 = vmatprep.subr.bf16.mxu1 %v6930_v3 }
  0x20   : > { %4125 = vmatpush3.bf16.msra.mxu0 %v4623_v18  ;;  %v4682_v40 = vld [vmem:[%s4617_s14 + $0x60] sm:$0xff]  ;;  %v4685_v41 = vld [vmem:[%s4617_s14 + $0x68] sm:$0xff]  ;;  %v4688_v42 = vld [vmem:[%s4617_s14 + $0x70] sm:$0xff]  ;;  %v319_v43 = vadd.f32 %v318_v27, %v317_v31  ;;  %v332_v46 = vsel %vm279_vm1, %v4665_v34, 0.0  ;;  %v334_v50 = vsel %vm279_vm1, %v4668_v35, 0.0  ;;  %v336_v51 = vsel %vm279_vm1, %v4671_v36, 0.0 }
  0x21   : > { %4126 = vmatprep.subr.bf16.mxu0 %v6930_v3  ;;  %v4699_v47 = vld [vmem:[%s4617_s14 + $0x78] sm:$0xff]  ;;  %v4702_v48 = vld [vmem:[%s4617_s14 + $0x80] sm:$0xff]  ;;  %v4705_v49 = vld [vmem:[%s4617_s14 + $0x88] sm:$0xff]  ;;  %v338_v52 = vsel %vm279_vm1, %v4682_v40, 0.0  ;;  %v340_v57 = vsel %vm279_vm1, %v4685_v41, 0.0  ;;  %v342_v58 = vsel %vm279_vm1, %v4688_v42, 0.0 }
  0x22   : > { %6983 = vst [vmem:[#allocation6_spill] sm:$0xff] %v4699_v47  ;;  %6984 = vst [vmem:[#allocation7_spill] sm:$0xff] %v4702_v48  ;;  %v4714_v53 = vld [vmem:[%s4617_s14 + $0x90] sm:$0xff]  ;;  %v4717_v54 = vld [vmem:[%s4617_s14 + $0x98] sm:$0xff]  ;;  %v321_v56 = vadd.f32 %v320_v32, %v319_v43  ;;  %v344_v59 = vsel %vm279_vm1, %v4699_v47, 0.0  ;;  %v346_v63 = vsel %vm279_vm1, %v4702_v48, 0.0 }
  0x23   : > { %6985 = vst [vmem:[#allocation8_spill] sm:$0xff] %v4705_v49  ;;  %6986 = vst [vmem:[#allocation9_spill] sm:$0xff] %v4714_v53  ;;  %v4720_v55 = vld [vmem:[%s4617_s14 + $0xa0] sm:$0xff]  ;;  %v4729_v60 = vld [vmem:[%s4617_s14 + $0xa8] sm:$0xff]  ;;  %v348_v0 = vsel %vm279_vm1, %v4705_v49, 0.0  ;;  %v350_v1 = vsel %vm279_vm1, %v4714_v53, 0.0 }
  0x24   : > { %6987 = vst [vmem:[#allocation10_spill] sm:$0xff] %v4717_v54  ;;  %6988 = vst [vmem:[#allocation11_spill] sm:$0xff] %v4720_v55  ;;  %v4732_v61 = vld [vmem:[%s4617_s14 + $0xb0] sm:$0xff]  ;;  %v4735_v62 = vld [vmem:[%s4617_s14 + $0xb8] sm:$0xff]  ;;  %4128 = vmatpush3.bf16.msra.mxu0 %v4662_v33  ;;  %v323_v8 = vadd.f32 %v322_v37, %v321_v56  ;;  %v352_v9 = vsel %vm279_vm1, %v4717_v54, 0.0  ;;  %v354_v11 = vsel %vm279_vm1, %v4720_v55, 0.0 }
  0x25   : > { %6989 = vst [vmem:[#allocation12_spill] sm:$0xff] %v4729_v60  ;;  %6990 = vst [vmem:[#allocation13_spill] sm:$0xff] %v4732_v61  ;;  %v4745_v2 = vld [vmem:[%s4617_s14 + $0xc0] sm:$0xff]  ;;  %v4748_v5 = vld [vmem:[%s4617_s14 + $0xc8] sm:$0xff]  ;;  %v356_v12 = vsel %vm279_vm1, %v4729_v60, 0.0  ;;  %v358_v25 = vsel %vm279_vm1, %v4732_v61, 0.0  ;;  %4147 = vmatprep.subr.bf16.mxu0 %v6930_v3 }
  0x26   : > { %6991 = vst [vmem:[#allocation14_spill] sm:$0xff] %v4735_v62  ;;  %6992 = vst [vmem:[#allocation15_spill] sm:$0xff] %v4745_v2  ;;  %v4751_v7 = vld [vmem:[%s4617_s14 + $0xd0] sm:$0xff]  ;;  %v4760_v13 = vld [vmem:[%s4617_s14 + $0xd8] sm:$0xff]  ;;  %v360_v26 = vsel %vm279_vm1, %v4735_v62, 0.0  ;;  %v362_v27 = vsel %vm279_vm1, %v4745_v2, 0.0  ;;  %v325_v31 = vadd.f32 %v324_v38, %v323_v8 }
  0x27   : > { %6993 = vst [vmem:[#allocation16_spill] sm:$0xff] %v4748_v5  ;;  %6994 = vst [vmem:[#allocation17_spill] sm:$0xff] %v4751_v7  ;;  %v4763_v15 = vld [vmem:[%s4617_s14 + $0xe0] sm:$0xff]  ;;  %v4766_v16 = vld [vmem:[%s4617_s14 + $0xe8] sm:$0xff]  ;;  %v364_v32 = vsel %vm279_vm1, %v4748_v5, 0.0  ;;  %v366_v37 = vsel %vm279_vm1, %v4751_v7, 0.0 }
  0x28   : > { %6995 = vst [vmem:[#allocation18_spill] sm:$0xff] %v4760_v13  ;;  %6996 = vst [vmem:[#allocation19_spill] sm:$0xff] %v4763_v15  ;;  %v368_v43 = vsel %vm279_vm1, %v4760_v13, 0.0  ;;  %v370_v56 = vsel %vm279_vm1, %v4763_v15, 0.0  ;;  %v372_v6 = vsel %vm279_vm1, %v4766_v16, 0.0  ;;  %v327_v62 = vadd.f32 %v326_v39, %v325_v31  ;;  %s4408_s22 = scalar_lea.vmem %s4407_s21, 8192 }
  0x29   : > { %6997 = vst [vmem:[#allocation20_spill] sm:$0xff] %v4766_v16 }
  0x2a   : > { %v329_v2 = vadd.f32 %v328_v44, %v327_v62  ;;  %v6998_v62 = vmov 0.0  }
  0x2c   : > { %v331_v61 = vadd.f32 %v330_v45, %v329_v2  ;;  %v4786_v45 = vld [vmem:[%s4617_s14 + $0xf0] sm:$0xff] }
  0x2e   : > { %v333_v3 = vadd.f32 %v332_v46, %v331_v61 }
  0x30   : > { %v335_v38 = vadd.f32 %v334_v50, %v333_v3  ;;  %v4789_v50 = vld [vmem:[%s4617_s14 + $0xf8] sm:$0xff] }
  0x32   : > { %v337_v8 = vadd.f32 %v336_v51, %v335_v38 }
  0x34   : > { %v339_v5 = vadd.f32 %v338_v52, %v337_v8  ;;  %v374_v52 = vsel %vm279_vm1, %v4786_v45, 0.0 }
  0x36   : > { %v341_v60 = vadd.f32 %v340_v57, %v339_v5 }
  0x38   : > { %v343_v7 = vadd.f32 %v342_v58, %v341_v60 }
  0x3a   : > { %v345_v55 = vadd.f32 %v344_v59, %v343_v7 }
  0x3c   : > { %v347_v54 = vadd.f32 %v346_v63, %v345_v55 }
  0x3e   : > { %v349_v13 = vadd.f32 %v348_v0, %v347_v54 }
  0x40   : > { %v351_v53 = vadd.f32 %v350_v1, %v349_v13 }
  0x42   : > { %v353_v49 = vadd.f32 %v352_v9, %v351_v53  ;;  %v376_v53 = vsel %vm279_vm1, %v4789_v50, 0.0 }
  0x44   : > { %v355_v15 = vadd.f32 %v354_v11, %v353_v49 }
  0x46   : > { %v357_v48 = vadd.f32 %v356_v12, %v355_v15 }
  0x48   : > { %v359_v47 = vadd.f32 %v358_v25, %v357_v48 }
  0x4a   : > { %v361_v16 = vadd.f32 %v360_v26, %v359_v47 }
  0x4c   : > { %v363_v39 = vadd.f32 %v362_v27, %v361_v16 }
  0x4e   : > { %v365_v44 = vadd.f32 %v364_v32, %v363_v39 }
  0x50   : > { %v367_v3 = vadd.f32 %v366_v37, %v365_v44 }
  0x52   : > { %v369_v46 = vadd.f32 %v368_v43, %v367_v3 }
  0x54   : > { %v371_v51 = vadd.f32 %v370_v56, %v369_v46 }
  0x56   : > { %v373_v55 = vadd.f32 %v372_v6, %v371_v51  ;;  %v6999_v6 = vmov 0.0|0.0  }
  0x58   : > { %v375_v49 = vadd.f32 %v374_v52, %v373_v55 }
  0x5a   : > { %v377_v54 = vadd.f32 %v376_v53, %v375_v49 }
  0x5c   : > { %v378_v48 = vrot.slane %v377_v54, 4 }
  0x5e   : > { %v379_v47 = vadd.f32 %v378_v48, %v377_v54 }
  0x60   : > { %v380_v57 = vrot.slane %v379_v47, 2 }
  0x62   : > { %v381_v58 = vadd.f32 %v380_v57, %v379_v47 }
  0x64   : > { %v382_v59 = vrot.slane %v381_v58, 1 }
  0x66   : > { %v383_v60 = vadd.f32 %v382_v59, %v381_v58 }
  0x68   : > { %v385_v61 = vmul.f32 0.00390625, %v383_v60 }
  0x6a   : > { %4074 = vmatmul.mubr.msk.f32.vlgmr.msra.gmra.mrb[0].mxu0 %vm279_vm1, %v385_v61  ;;  %v7000_v61 = vld [vmem:[#allocation6_spill] sm:$0xff] }
  0x6b   : > { %4149 = vmatpush3.bf16.msra.mxu0 %v4606_v14  ;;  %4114 = vmatprep.mubr.msk.f32.mxu0 %vm4467_vm0, %v6998_v62  ;;  %v545_v14 = vlaneseq }
  0x6c   : > { %4150 = vmatprep.subr.bf16.mxu0 %v6999_v6 }
  0x6f   : > { %4152 = vmatpush3.bf16.msra.mxu0 %v4620_v17  ;;  %v4811_v17 = vshrl.u32 %v545_v14, 7 }
  0x71   : > { %v6944_v2 = vsub.s32 0, %v4811_v17  ;;  %vm1805_vm3 = vcmp.lt.s32.totalorder %v4811_v17, 7  ;;  %vm1612_vm9 = vcmp.lt.s32.totalorder %v4811_v17, 1 }
 0x13d   : > { %v463_v63 = vpop.f32.mrb[0].mxu0 }
 0x13e   : > { %v4075_v0 = vpop.f32.mrb[1].mxu0  ;;  %4085 = vmatmul.mubr.msk.f32.vlgmr.msra.gmra.mrb[0].mxu1 %vm471_vm2, %v463_v63 }
 0x13f   : > { %4137 = vmatpush3.bf16.msra.mxu1 %v4572_v4  ;;  %4103 = vmatprep.mubr.msk.f32.mxu1 %vm4467_vm0, %v6998_v62  ;;  %v7001_v0 = vld [vmem:[#allocation7_spill] sm:$0xff] }
 0x140   : > { %4138 = vmatprep.subr.bf16.mxu1 %v6999_v6 }
 0x143   : > { %4140 = vmatpush3.bf16.msra.mxu1 %v4593_v10 }
 0x144   : > { %4141 = vmatprep.subr.bf16.mxu1 %v6999_v6 }
 0x147   : > { %4143 = vmatpush3.bf16.msra.mxu1 %v4623_v18 }
 0x148   : > { %4144 = vmatprep.subr.bf16.mxu1 %v6999_v6 }
 0x14b   : > { %4146 = vmatpush3.bf16.msra.mxu1 %v4662_v33 }
 0x211   : > { %v541_v1 = vpop.f32.mrb[0].mxu1 }
 0x212   : > { %v4086_v4 = vpop.f32.mrb[1].mxu1  ;;  %v4816_v5 = vrot.slane %v541_v1, %v6944_v2  ;;  %v5214_v2 = vadd.s32 128, %v4811_v17 }
 0x214   : > { %v4820_v10 = vsub.f32 %v4626_v19, %v4816_v5  ;;  %v4824_v18 = vsub.f32 %v4629_v20, %v4816_v5  ;;  %v4828_v33 = vsub.f32 %v4632_v21, %v4816_v5  ;;  %v4832_v7 = vsub.f32 %v4637_v22, %v4816_v5  ;;  %7031 = vst [vmem:[#allocation22_spill] sm:$0xff] %v5214_v2 }
 0x215   : > { %v4840_v19 = vsub.f32 %v4640_v23, %v4816_v5  ;;  %v4846_v21 = vsub.f32 %v4643_v24, %v4816_v5  ;;  %v4854_v16 = vsub.f32 %v4652_v28, %v4816_v5  ;;  %v4861_v24 = vsub.f32 %v4655_v29, %v4816_v5 }
 0x216   : > { %v581_v9 = vmul.f32 %v4820_v10, %v4820_v10  ;;  %v582_v11 = vmul.f32 %v4824_v18, %v4824_v18  ;;  %v583_v20 = vmul.f32 %v4828_v33, %v4828_v33  ;;  %v584_v22 = vmul.f32 %v4832_v7, %v4832_v7 }
 0x217   : > { %v585_v23 = vmul.f32 %v4840_v19, %v4840_v19  ;;  %v586_v27 = vmul.f32 %v4846_v21, %v4846_v21  ;;  %v4868_v28 = vsub.f32 %v4658_v30, %v4816_v5  ;;  %v587_v37 = vmul.f32 %v4854_v16, %v4854_v16 }
 0x218   : > { %v613_v12 = vsel %vm279_vm1, %v581_v9, 0.0  ;;  %v614_v13 = vsel %vm279_vm1, %v582_v11, 0.0  ;;  %v616_v25 = vsel %vm279_vm1, %v583_v20, 0.0  ;;  %v618_v31 = vsel %vm279_vm1, %v584_v22, 0.0  ;;  %v7002_v9 = vld [vmem:[#allocation8_spill] sm:$0xff] }
 0x219   : > { %v615_v15 = vadd.f32 %v614_v13, %v613_v12  ;;  %v620_v43 = vsel %vm279_vm1, %v585_v23, 0.0  ;;  %v4875_v29 = vsub.f32 %v4665_v34, %v4816_v5  ;;  %v588_v38 = vmul.f32 %v4861_v24, %v4861_v24  ;;  %v7003_v13 = vld [vmem:[#allocation9_spill] sm:$0xff] }
 0x21a   : > { %v622_v8 = vsel %vm279_vm1, %v586_v27, 0.0  ;;  %v4882_v30 = vsub.f32 %v4668_v35, %v4816_v5  ;;  %v589_v44 = vmul.f32 %v4868_v28, %v4868_v28  ;;  %v624_v3 = vsel %vm279_vm1, %v587_v37, 0.0  ;;  %v7004_v27 = vld [vmem:[#allocation10_spill] sm:$0xff] }
 0x21b   : > { %v617_v26 = vadd.f32 %v616_v25, %v615_v15  ;;  %v4889_v34 = vsub.f32 %v4671_v36, %v4816_v5  ;;  %v590_v51 = vmul.f32 %v4875_v29, %v4875_v29  ;;  %v626_v52 = vsel %vm279_vm1, %v588_v38, 0.0 }
 0x21c   : > { %v4896_v35 = vsub.f32 %v4682_v40, %v4816_v5  ;;  %v591_v53 = vmul.f32 %v4882_v30, %v4882_v30  ;;  %v628_v49 = vsel %vm279_vm1, %v589_v44, 0.0  ;;  %v4903_v36 = vsub.f32 %v4685_v41, %v4816_v5 }
 0x21d   : > { %v619_v32 = vadd.f32 %v618_v31, %v617_v26  ;;  %v592_v48 = vmul.f32 %v4889_v34, %v4889_v34  ;;  %v630_v47 = vsel %vm279_vm1, %v590_v51, 0.0  ;;  %v4910_v40 = vsub.f32 %v4688_v42, %v4816_v5 }
 0x21e   : > { %v593_v58 = vmul.f32 %v4896_v35, %v4896_v35  ;;  %v632_v59 = vsel %vm279_vm1, %v591_v53, 0.0  ;;  %v4917_v41 = vsub.f32 %v7000_v61, %v4816_v5  ;;  %v594_v62 = vmul.f32 %v4903_v36, %v4903_v36  ;;  %v7007_v53 = vld [vmem:[#allocation13_spill] sm:$0xff] }
 0x21f   : > { %v621_v56 = vadd.f32 %v620_v43, %v619_v32  ;;  %v634_v6 = vsel %vm279_vm1, %v592_v48, 0.0  ;;  %v4924_v42 = vsub.f32 %v7001_v0, %v4816_v5  ;;  %v595_v14 = vmul.f32 %v4910_v40, %v4910_v40 }
 0x220   : > { %v636_v1 = vsel %vm279_vm1, %v593_v58, 0.0  ;;  %v4931_v11 = vsub.f32 %v7002_v9, %v4816_v5  ;;  %v596_v20 = vmul.f32 %v4917_v41, %v4917_v41  ;;  %v638_v22 = vsel %vm279_vm1, %v594_v62, 0.0  ;;  %v7009_v62 = vld [vmem:[#allocation15_spill] sm:$0xff] }
 0x221   : > { %v623_v39 = vadd.f32 %v622_v8, %v621_v56  ;;  %v4938_v15 = vsub.f32 %v7003_v13, %v4816_v5  ;;  %v597_v23 = vmul.f32 %v4924_v42, %v4924_v42  ;;  %v640_v25 = vsel %vm279_vm1, %v595_v14, 0.0  ;;  %v7005_v56 = vld [vmem:[#allocation11_spill] sm:$0xff] }
 0x222   : > { %v4945_v31 = vsub.f32 %v7004_v27, %v4816_v5  ;;  %v598_v32 = vmul.f32 %v4931_v11, %v4931_v11  ;;  %v642_v37 = vsel %vm279_vm1, %v596_v20, 0.0  ;;  %v4952_v38 = vsub.f32 %v7005_v56, %v4816_v5  ;;  %v7012_v27 = vld [vmem:[#allocation18_spill] sm:$0xff] }
 0x223   : > { %v625_v46 = vadd.f32 %v624_v3, %v623_v39  ;;  %v599_v8 = vmul.f32 %v4938_v15, %v4938_v15  ;;  %v644_v39 = vsel %vm279_vm1, %v597_v23, 0.0  ;;  %v7006_v3 = vld [vmem:[#allocation12_spill] sm:$0xff] }
 0x224   : > { %v600_v51 = vmul.f32 %v4945_v31, %v4945_v31 }
 0x225   : > { %v627_v55 = vadd.f32 %v626_v52, %v625_v46  ;;  %v4959_v46 = vsub.f32 %v7006_v3, %v4816_v5  ;;  %v646_v52 = vsel %vm279_vm1, %v598_v32, 0.0  ;;  %v648_v48 = vsel %vm279_vm1, %v599_v8, 0.0  ;;  %v7013_v8 = vld [vmem:[#allocation19_spill] sm:$0xff] }
 0x226   : > { %v5001_v32 = vsub.f32 %v7012_v27, %v4816_v5 }
 0x227   : > { %v629_v54 = vadd.f32 %v628_v49, %v627_v55  ;;  %v4966_v49 = vsub.f32 %v7007_v53, %v4816_v5 }
 0x228   : > { %v608_v53 = vmul.f32 %v5001_v32, %v5001_v32 }
 0x229   : > { %v631_v57 = vadd.f32 %v630_v47, %v629_v54  ;;  %v601_v54 = vmul.f32 %v4952_v38, %v4952_v38 }
 0x22b   : > { %v633_v60 = vadd.f32 %v632_v59, %v631_v57  ;;  %v7008_v57 = vld [vmem:[#allocation14_spill] sm:$0xff]  ;;  %v602_v59 = vmul.f32 %v4959_v46, %v4959_v46  ;;  %v652_v0 = vsel %vm279_vm1, %v601_v54, 0.0 }
 0x22c   : > { %v4973_v58 = vsub.f32 %v7008_v57, %v4816_v5 }
 0x22d   : > { %v635_v63 = vadd.f32 %v634_v6, %v633_v60  ;;  %v650_v60 = vsel %vm279_vm1, %v600_v51, 0.0  ;;  %v4980_v6 = vsub.f32 %v7009_v62, %v4816_v5  ;;  %v654_v20 = vsel %vm279_vm1, %v602_v59, 0.0 }
 0x22e   : > { %v604_v9 = vmul.f32 %v4973_v58, %v4973_v58 }
 0x22f   : > { %v637_v4 = vadd.f32 %v636_v1, %v635_v63  ;;  %v603_v63 = vmul.f32 %v4966_v49, %v4966_v49  ;;  %v7010_v1 = vld [vmem:[#allocation16_spill] sm:$0xff]  ;;  %v605_v23 = vmul.f32 %v4980_v6, %v4980_v6 }
 0x231   : > { %v639_v12 = vadd.f32 %v638_v22, %v637_v4  ;;  %v4987_v4 = vsub.f32 %v7010_v1, %v4816_v5  ;;  %v660_v3 = vsel %vm279_vm1, %v605_v23, 0.0 }
 0x233   : > { %v641_v26 = vadd.f32 %v640_v25, %v639_v12  ;;  %v7011_v12 = vld [vmem:[#allocation17_spill] sm:$0xff]  ;;  %v656_v25 = vsel %vm279_vm1, %v603_v63, 0.0  ;;  %v666_v63 = vsel %vm279_vm1, %v608_v53, 0.0  ;;  %v4200_v53 = vld [vmem:[%s6922_s5 + $0x8] sm:$0xff]  }
 0x234   : > { %v4994_v13 = vsub.f32 %v7011_v12, %v4816_v5 }
 0x235   : > { %v643_v43 = vadd.f32 %v642_v37, %v641_v26  ;;  %v606_v37 = vmul.f32 %v4987_v4, %v4987_v4 }
 0x237   : > { %v645_v44 = vadd.f32 %v644_v39, %v643_v43  ;;  %v658_v43 = vsel %vm279_vm1, %v604_v9, 0.0  ;;  %v5008_v39 = vsub.f32 %v7013_v8, %v4816_v5  ;;  %v662_v54 = vsel %vm279_vm1, %v606_v37, 0.0 }
 0x239   : > { %v647_v55 = vadd.f32 %v646_v52, %v645_v44  ;;  %v607_v44 = vmul.f32 %v4994_v13, %v4994_v13  ;;  %v7014_v52 = vld [vmem:[#allocation20_spill] sm:$0xff]  ;;  %v609_v57 = vmul.f32 %v5008_v39, %v5008_v39 }
 0x23b   : > { %v649_v47 = vadd.f32 %v648_v48, %v647_v55  ;;  %v5015_v55 = vsub.f32 %v7014_v52, %v4816_v5  ;;  %v664_v59 = vsel %vm279_vm1, %v607_v44, 0.0  ;;  %v6946_v52 = vmov 0  }
 0x23c   : > { %2506 = vmatprep.subr.bf16.mxu1 %v6946_v52  ;;  %278 = vst [vmem:[#allocation2] sm:$0xff] %v6946_v52  ;;  %280 = vst.msk [vmem:[#allocation2 + $0x8] sm:$0xff] %vm279_vm1, %v6946_v52  ;;  %2313 = vmatprep.subr.bf16.mxu0 %v6946_v52 }
 0x23d   : > { %v651_v61 = vadd.f32 %v650_v60, %v649_v47  ;;  %7015 = vst [vmem:[#allocation6_spill] sm:$0xff] %v5015_v55  ;;  %v5022_v47 = vsub.f32 %v4786_v45, %v4816_v5  ;;  %v610_v62 = vmul.f32 %v5015_v55, %v5015_v55  ;;  %282 = vst.msk [vmem:[#allocation2 + $0x118] sm:$0xff] %vm279_vm1, %v6946_v52  ;;  %v4217_v55 = vld [vmem:[%s6922_s5 + $0x90] sm:$0xff]  }
 0x23f   : > { %v653_v14 = vadd.f32 %v652_v0, %v651_v61  ;;  %v5029_v61 = vsub.f32 %v4789_v50, %v4816_v5  ;;  %v611_v45 = vmul.f32 %v5022_v47, %v5022_v47 }
 0x241   : > { %v655_v22 = vadd.f32 %v654_v20, %v653_v14  ;;  %v668_v14 = vsel %vm279_vm1, %v609_v57, 0.0  ;;  %v612_v9 = vmul.f32 %v5029_v61, %v5029_v61  ;;  %v670_v20 = vsel %vm279_vm1, %v610_v62, 0.0  ;;  %v4203_v57 = vld [vmem:[%s6922_s5 + $0x20] sm:$0xff]   ;;  %v4206_v62 = vld [vmem:[%s6922_s5 + $0x38] sm:$0xff]  }
 0x242   : > { %v672_v50 = vsel %vm279_vm1, %v611_v45, 0.0  ;;  %v4209_v45 = vld [vmem:[%s6922_s5 + $0x50] sm:$0xff]  }
 0x243   : > { %v657_v26 = vadd.f32 %v656_v25, %v655_v22  ;;  %v674_v12 = vsel %vm279_vm1, %v612_v9, 0.0  ;;  %v4211_v9 = vld [vmem:[%s6922_s5 + $0x60] sm:$0xff]  }
 0x245   : > { %v659_v56 = vadd.f32 %v658_v43, %v657_v26 }
 0x247   : > { %v661_v51 = vadd.f32 %v660_v3, %v659_v56 }
 0x249   : > { %v663_v48 = vadd.f32 %v662_v54, %v661_v51  ;;  %v4199_v51 = vld [vmem:[%s6922_s5] sm:$0xff]   ;;  %v4201_v54 = vld [vmem:[%s6922_s5 + $0x10] sm:$0xff]  }
 0x24b   : > { %v665_v60 = vadd.f32 %v664_v59, %v663_v48  ;;  %v4202_v48 = vld [vmem:[%s6922_s5 + $0x18] sm:$0xff]   ;;  %v4204_v59 = vld [vmem:[%s6922_s5 + $0x28] sm:$0xff]  }
 0x24d   : > { %v667_v0 = vadd.f32 %v666_v63, %v665_v60  ;;  %v4205_v60 = vld [vmem:[%s6922_s5 + $0x30] sm:$0xff]   ;;  %v4207_v63 = vld [vmem:[%s6922_s5 + $0x40] sm:$0xff]  }
 0x24f   : > { %v669_v1 = vadd.f32 %v668_v14, %v667_v0  ;;  %v4208_v0 = vld [vmem:[%s6922_s5 + $0x48] sm:$0xff]   ;;  %v4210_v14 = vld [vmem:[%s6922_s5 + $0x58] sm:$0xff]  }
 0x251   : > { %v671_v22 = vadd.f32 %v670_v20, %v669_v1  ;;  %v2131_v1 = vld [vmem:[#allocation2 + $0x8] sm:$0xff] }
 0x252   : > { %v4212_v20 = vld [vmem:[%s6922_s5 + $0x68] sm:$0xff]  }
 0x253   : > { %v673_v5 = vadd.f32 %v672_v50, %v671_v22  ;;  %v5108_v22 = vadd.s32 40, %v4811_v17 }
 0x255   : > { %v675_v23 = vadd.f32 %v674_v12, %v673_v5 }
 0x257   : > { %v676_v25 = vrot.slane %v675_v23, 4 }
 0x259   : > { %v677_v26 = vadd.f32 %v676_v25, %v675_v23  ;;  %v5112_v23 = vadd.s32 8, %v4811_v17  ;;  %v5115_v25 = vadd.s32 24, %v4811_v17 }
 0x25b   : > { %v678_v27 = vrot.slane %v677_v26, 2 }
 0x25d   : > { %v679_v37 = vadd.f32 %v678_v27, %v677_v26  ;;  %v5118_v26 = vadd.s32 56, %v4811_v17  ;;  %v5121_v27 = vadd.s32 72, %v4811_v17 }
 0x25f   : > { %v680_v43 = vrot.slane %v679_v37, 1 }
 0x261   : > { %v681_v56 = vadd.f32 %v680_v43, %v679_v37  ;;  %v5124_v37 = vadd.s32 88, %v4811_v17  ;;  %v4213_v43 = vld [vmem:[%s6922_s5 + $0x70] sm:$0xff]  }
 0x263   : > { %v682_v8 = vmul.f32 0.00390625, %v681_v56  ;;  %7016 = vst [vmem:[#allocation7_spill] sm:$0xff] %v5124_v37  ;;  %v5232_v56 = vadd.s32 224, %v4811_v17 }
 0x265   : > { %4104 = vmatmul.mubr.msk.f32.vlgmr.msra.gmra.mrb[2].mxu1 %vm279_vm1, %v682_v8  ;;  %v5131_v8 = vadd.s32 104, %v4811_v17  ;;  %7037 = vst [vmem:[#allocation28_spill] sm:$0xff] %v5232_v56 }
 0x266   : > { %2507 = vmatpush1.bf16.msra.mxu1 %v4199_v51  ;;  %3845 = vmatprep.mubr.msk.bf16.mxu1 %vm279_vm1, %v2131_v1  ;;  %v5141_v51 = vadd.s32 152, %v4811_v17  ;;  %v5195_v1 = vadd.s32 64, %v4811_v17 }
 0x267   : > { %2508 = vmatprep.subr.bf16.mxu1 %v6946_v52  ;;  %7017 = vst [vmem:[#allocation8_spill] sm:$0xff] %v5131_v8  ;;  %v5255_v8 = vld [vmem:[%s6919_s2] ss:$0 sm:$0xff] }
 0x268   : > { %7020 = vst [vmem:[#allocation11_spill] sm:$0xff] %v5141_v51  ;;  %7027 = vst [vmem:[#allocation18_spill] sm:$0xff] %v5195_v1 }
 0x26a   : > { %2509 = vmatpush1.bf16.msra.mxu1 %v4200_v53  ;;  %v5144_v53 = vadd.s32 168, %v4811_v17 }
 0x26b   : > { %2510 = vmatprep.subr.bf16.mxu1 %v6946_v52 }
 0x26c   : > { %7021 = vst [vmem:[#allocation12_spill] sm:$0xff] %v5144_v53 }
 0x26e   : > { %2511 = vmatpush1.bf16.msra.mxu1 %v4201_v54  ;;  %v5147_v54 = vadd.s32 184, %v4811_v17 }
 0x26f   : > { %2512 = vmatprep.subr.bf16.mxu1 %v6946_v52 }
 0x270   : > { %7022 = vst [vmem:[#allocation13_spill] sm:$0xff] %v5147_v54  ;;  %v4216_v54 = vld [vmem:[%s6922_s5 + $0x88] sm:$0xff]  }
 0x272   : > { %2513 = vmatpush1.bf16.msra.mxu1 %v4202_v48  ;;  %v5210_v48 = vadd.s32 144, %v4811_v17 }
 0x273   : > { %2514 = vmatprep.subr.bf16.mxu1 %v6946_v52 }
 0x274   : > { %7030 = vst [vmem:[#allocation21_spill] sm:$0xff] %v5210_v48 }
 0x276   : > { %2515 = vmatpush1.bf16.msra.mxu1 %v4203_v57  ;;  %v5220_v57 = vadd.s32 160, %v4811_v17 }
 0x277   : > { %2516 = vmatprep.subr.bf16.mxu1 %v6946_v52 }
 0x278   : > { %7033 = vst [vmem:[#allocation24_spill] sm:$0xff] %v5220_v57 }
 0x27a   : > { %2517 = vmatpush1.bf16.msra.mxu1 %v4204_v59  ;;  %v5152_v59 = vadd.s32 200, %v4811_v17 }
 0x27b   : > { %2518 = vmatprep.subr.bf16.mxu1 %v6946_v52 }
 0x27c   : > { %7023 = vst [vmem:[#allocation14_spill] sm:$0xff] %v5152_v59 }
 0x27e   : > { %2519 = vmatpush1.bf16.msra.mxu1 %v4205_v60  ;;  %v5155_v60 = vadd.s32 248, %v4811_v17 }
 0x27f   : > { %2520 = vmatprep.subr.bf16.mxu1 %v6946_v52 }
 0x280   : > { %7024 = vst [vmem:[#allocation15_spill] sm:$0xff] %v5155_v60  ;;  %v5229_v60 = vadd.s32 240, %v4811_v17 }
 0x282   : > { %2521 = vmatpush1.bf16.msra.mxu1 %v4206_v62  ;;  %v5185_v62 = vadd.s32 16, %v4811_v17  ;;  %7036 = vst [vmem:[#allocation27_spill] sm:$0xff] %v5229_v60 }
 0x283   : > { %2522 = vmatprep.subr.bf16.mxu1 %v6946_v52 }
 0x286   : > { %2523 = vmatpush1.bf16.msra.mxu1 %v4207_v63  ;;  %v5182_v63 = vadd.s32 48, %v4811_v17 }
 0x287   : > { %2524 = vmatprep.subr.bf16.mxu1 %v6946_v52 }
 0x28a   : > { %2525 = vmatpush1.bf16.msra.mxu1 %v4208_v0  ;;  %v830_v0 = vld [vmem:[%s6918_s1] sm:$0x1] }
 0x28b   : > { %2526 = vmatprep.subr.bf16.mxu1 %v6946_v52 }
 0x28e   : > { %2527 = vmatpush1.bf16.msra.mxu1 %v4209_v45  ;;  %v5161_v45 = vadd.s32 216, %v4811_v17 }
 0x28f   : > { %2528 = vmatprep.subr.bf16.mxu1 %v6946_v52 }
 0x290   : > { %7025 = vst [vmem:[#allocation16_spill] sm:$0xff] %v5161_v45  ;;  %v5217_v45 = vadd.s32 176, %v4811_v17 }
 0x292   : > { %2529 = vmatpush1.bf16.msra.mxu1 %v4210_v14  ;;  %v4214_v14 = vld [vmem:[%s6922_s5 + $0x78] sm:$0xff]   ;;  %7032 = vst [vmem:[#allocation23_spill] sm:$0xff] %v5217_v45 }
 0x293   : > { %3082 = vmatprep.subr.bf16.mxu1 %v6946_v52 }
 0x295   : > { %2539 = vmatmul.mubr.bf16.vlgmr.msra.gmra.mrb[4].mxu1 %v6946_v52 }
 0x338   : > { %v752_v44 = vpop.f32.mrb[2].mxu1 }
 0x339   : > { %v4105_v3 = vpop.f32.mrb[3].mxu1  ;;  %4115 = vmatmul.mubr.msk.f32.vlgmr.msra.gmra.mrb[2].mxu0 %vm471_vm2, %v752_v44  ;;  %v5134_v44 = vadd.s32 120, %v4811_v17 }
 0x33a   : > { %2314 = vmatpush1.bf16.msra.mxu0 %v4211_v9  ;;  %v5138_v3 = vadd.s32 136, %v4811_v17  ;;  %v5198_v9 = vadd.s32 112, %v4811_v17 }
 0x33b   : > { %2315 = vmatprep.subr.bf16.mxu0 %v6946_v52  ;;  %7018 = vst [vmem:[#allocation9_spill] sm:$0xff] %v5134_v44  ;;  %v7038_v44 = vmov 0  }
 0x33c   : > { %7019 = vst [vmem:[#allocation10_spill] sm:$0xff] %v5138_v3  ;;  %7028 = vst [vmem:[#allocation19_spill] sm:$0xff] %v5198_v9 }
 0x33e   : > { %2316 = vmatpush1.bf16.msra.mxu0 %v4212_v20  ;;  %v5169_v20 = vadd.s32 232, %v4811_v17 }
 0x33f   : > { %2317 = vmatprep.subr.bf16.mxu0 %v6946_v52 }
 0x340   : > { %7026 = vst [vmem:[#allocation17_spill] sm:$0xff] %v5169_v20  ;;  %v5226_v20 = vadd.s32 192, %v4811_v17 }
 0x342   : > { %2318 = vmatpush1.bf16.msra.mxu0 %v4213_v43  ;;  %v5192_v43 = vadd.s32 80, %v4811_v17  ;;  %7035 = vst [vmem:[#allocation26_spill] sm:$0xff] %v5226_v20 }
 0x343   : > { %2319 = vmatprep.subr.bf16.mxu0 %v6946_v52 }
 0x346   : > { %2320 = vmatpush1.bf16.msra.mxu0 %v4214_v14  ;;  %v5223_v14 = vadd.s32 208, %v4811_v17 }
 0x347   : > { %2321 = vmatprep.subr.bf16.mxu0 %v6946_v52 }
 0x348   : > { %7034 = vst [vmem:[#allocation25_spill] sm:$0xff] %v5223_v14 }
 0x40c   : > { %v825_v50 = vpop.f32.mrb[2].mxu0 }
 0x40d   : > { %v826_v5 = vadd.f32 1e-05, %v825_v50  ;;  %v4116_v12 = vpop.f32.mrb[3].mxu0  ;;  %v5173_v50 = vadd.s32 32, %v4811_v17 }
 0x40e   : > { %v4215_v12 = vld [vmem:[%s6922_s5 + $0x80] sm:$0xff]  }
 0x40f   : > { %4271 = vrsqrt.f32 %v826_v5  ;;  %v5207_v5 = vadd.s32 96, %v4811_v17  ;;  %2322 = vmatpush1.bf16.msra.mxu0 %v4215_v12 }
 0x410   : > { %2323 = vmatprep.subr.bf16.mxu0 %v7038_v44 }
 0x411   : > { %7029 = vst [vmem:[#allocation20_spill] sm:$0xff] %v5207_v5 }
 0x413   : > { %2324 = vmatpush1.bf16.msra.mxu0 %v4216_v54 }
 0x414   : > { %2325 = vmatprep.subr.bf16.mxu0 %v7038_v44 }
 0x417   : > { %2326 = vmatpush1.bf16.msra.mxu0 %v4217_v55 }
 0x418   : > { %2327 = vmatprep.subr.bf16.mxu0 %v7038_v44 }
 0x419   : > { %v4272_v52 = vpop.eup %4271 }
 0x41a   : > { %v831_v59 = vmul.f32 %v4272_v52, %v830_v0  ;;  %v7039_v0 = vsub.s32 0, %v4811_v17 }
 0x41c   : > { %v5247_v12 = vrot.slane %v831_v59, %v7039_v0 }
 0x41e   : > { %v840_v0 = vmul.f32 %v5247_v12, %v4840_v19  ;;  %v841_v51 = vmul.f32 %v5247_v12, %v4846_v21  ;;  %v836_v3 = vmul.f32 %v5247_v12, %v4820_v10  ;;  %v837_v53 = vmul.f32 %v5247_v12, %v4824_v18 }
 0x41f   : > { %v842_v59 = vmul.f32 %v5247_v12, %v4854_v16  ;;  %v843_v19 = vmul.f32 %v5247_v12, %v4861_v24  ;;  %v838_v21 = vmul.f32 %v5247_v12, %v4828_v33  ;;  %v839_v10 = vmul.f32 %v5247_v12, %v4832_v7 }
 0x420   : > { %v5282_v18 = vadd.f32 %v5255_v8, %v840_v0  ;;  %v5285_v54 = vadd.f32 %v5255_v8, %v841_v51  ;;  %v5288_v52 = vadd.f32 %v5255_v8, %v836_v3  ;;  %v5291_v16 = vadd.f32 %v5255_v8, %v837_v53  ;;  %v4218_v3 = vld [vmem:[%s6922_s5 + $0x98] sm:$0xff]  }
 0x421   : > { %v5294_v24 = vadd.f32 %v5255_v8, %v842_v59  ;;  %v5297_v33 = vadd.f32 %v5255_v8, %v843_v19  ;;  %v5300_v7 = vadd.f32 %v5255_v8, %v838_v21  ;;  %v5303_v0 = vadd.f32 %v5255_v8, %v839_v10  ;;  %2328 = vmatpush1.bf16.msra.mxu0 %v4218_v3 }
 0x422   : > { %v3761_v51 = vmul.f32 -1.442695, %v5282_v18  ;;  %v3762_v53 = vmul.f32 -1.442695, %v5285_v54  ;;  %v3757_v59 = vmul.f32 -1.442695, %v5288_v52  ;;  %v846_v19 = vmul.f32 %v5247_v12, %v4882_v30  ;;  %2329 = vmatprep.subr.bf16.mxu0 %v7038_v44 }
 0x423   : > { %v3758_v21 = vmul.f32 -1.442695, %v5291_v16  ;;  %v3763_v37 = vmul.f32 -1.442695, %v5294_v24  ;;  %v3764_v10 = vmul.f32 -1.442695, %v5297_v33  ;;  %v847_v56 = vmul.f32 %v5247_v12, %v4889_v34 }
 0x424   : > { %4273 = vpow2.f32 %v3761_v51  ;;  %v3759_v60 = vmul.f32 -1.442695, %v5300_v7  ;;  %v3760_v20 = vmul.f32 -1.442695, %v5303_v0  ;;  %v5322_v14 = vadd.f32 %v5255_v8, %v846_v19 }
 0x425   : > { %4275 = vpow2.f32 %v3762_v53  ;;  %v5325_v30 = vadd.f32 %v5255_v8, %v847_v56  ;;  %v844_v55 = vmul.f32 %v5247_v12, %v4868_v28  ;;  %v845_v34 = vmul.f32 %v5247_v12, %v4875_v29  ;;  %v4219_v56 = vld [vmem:[%s6922_s5 + $0xa0] sm:$0xff]  }
 0x426   : > { %4277 = vpow2.f32 %v3757_v59  ;;  %v3767_v51 = vmul.f32 -1.442695, %v5322_v14  ;;  %v850_v57 = vmul.f32 %v5247_v12, %v4910_v40  ;;  %v851_v19 = vmul.f32 %v5247_v12, %v4917_v41  ;;  %2330 = vmatpush1.bf16.msra.mxu0 %v4219_v56 }
 0x427   : > { %4279 = vpow2.f32 %v3758_v21  ;;  %v3768_v28 = vmul.f32 -1.442695, %v5325_v30  ;;  %v5341_v53 = vadd.f32 %v5255_v8, %v844_v55  ;;  %v5344_v29 = vadd.f32 %v5255_v8, %v845_v34  ;;  %2331 = vmatprep.subr.bf16.mxu0 %v7038_v44 }
 0x428   : > { %4281 = vpow2.f32 %v3763_v37  ;;  %v5348_v40 = vadd.f32 %v5255_v8, %v850_v57  ;;  %v5351_v41 = vadd.f32 %v5255_v8, %v851_v19  ;;  %v848_v3 = vmul.f32 %v5247_v12, %v4896_v35  ;;  %v4220_v35 = vld [vmem:[%s6922_s5 + $0xa8] sm:$0xff]  }
 0x429   : > { %4283 = vpow2.f32 %v3764_v10  ;;  %v3765_v59 = vmul.f32 -1.442695, %v5341_v53  ;;  %v3766_v21 = vmul.f32 -1.442695, %v5344_v29  ;;  %v849_v55 = vmul.f32 %v5247_v12, %v4903_v36 }
 0x42a   : > { %4285 = vpow2.f32 %v3759_v60  ;;  %v3771_v37 = vmul.f32 -1.442695, %v5348_v40  ;;  %v5361_v57 = vmul.f32 -1.442695, %v5351_v41  ;;  %v5364_v34 = vadd.f32 %v5255_v8, %v848_v3  ;;  %2332 = vmatpush1.bf16.msra.mxu0 %v4220_v35 }
 0x42b   : > { %4287 = vpow2.f32 %v3760_v20  ;;  %v5370_v10 = vadd.f32 %v5255_v8, %v849_v55  ;;  %v854_v36 = vmul.f32 %v5247_v12, %v4938_v15  ;;  %v855_v60 = vmul.f32 %v5247_v12, %v4945_v31  ;;  %2333 = vmatprep.subr.bf16.mxu0 %v7038_v44 }
 0x42c   : > { %4289 = vpow2.f32 %v3767_v51  ;;  %v5378_v19 = vmul.f32 -1.442695, %v5364_v34  ;;  %v852_v56 = vmul.f32 %v5247_v12, %v4924_v42  ;;  %v853_v20 = vmul.f32 %v5247_v12, %v4931_v11 }
 0x42d   : > { %4291 = vpow2.f32 %v3768_v28  ;;  %v5385_v3 = vmul.f32 -1.442695, %v5370_v10  ;;  %v5388_v15 = vadd.f32 %v5255_v8, %v854_v36  ;;  %v5391_v31 = vadd.f32 %v5255_v8, %v855_v60 }
 0x42e   : > { %v4274_v51 = vpop.eup %4273  ;;  %4293 = vpow2.f32 %v3765_v59  ;;  %v5394_v55 = vadd.f32 %v5255_v8, %v852_v56  ;;  %v5397_v42 = vadd.f32 %v5255_v8, %v853_v20  ;;  %v858_v11 = vmul.f32 %v5247_v12, %v4966_v49 }
 0x42f   : > { %7040 = vst [vmem:[#allocation29_spill] sm:$0xff] %v5391_v31  ;;  %v4276_v28 = vpop.eup %4275  ;;  %v1007_v45 = vadd.f32 1.0, %v4274_v51  ;;  %4295 = vpow2.f32 %v3766_v21  ;;  %v5402_v36 = vmul.f32 -1.442695, %v5388_v15  ;;  %v5405_v60 = vmul.f32 -1.442695, %v5391_v31 }
 0x430   : > { %7041 = vst [vmem:[#allocation30_spill] sm:$0xff] %v5394_v55  ;;  %7042 = vst [vmem:[#allocation31_spill] sm:$0xff] %v5397_v42  ;;  %v4278_v59 = vpop.eup %4277  ;;  %v1008_v56 = vadd.f32 1.0, %v4276_v28  ;;  %4297 = vpow2.f32 %v3771_v37  ;;  %v5409_v20 = vmul.f32 -1.442695, %v5394_v55  ;;  %v859_v51 = vmul.f32 %v5247_v12, %v4973_v58 }
 0x431   : > { %v5412_v49 = vmul.f32 -1.442695, %v5397_v42  ;;  %v4280_v35 = vpop.eup %4279  ;;  %4299 = vrcp.f32 %v1007_v45  ;;  %v1003_v21 = vadd.f32 1.0, %v4278_v59  ;;  %v5417_v2 = vadd.f32 %v5255_v8, %v858_v11 }
 0x432   : > { %v4282_v48 = vpop.eup %4281  ;;  %4301 = vrcp.f32 %v1008_v56  ;;  %v1004_v5 = vadd.f32 1.0, %v4280_v35  ;;  %v856_v37 = vmul.f32 %v5247_v12, %v4952_v38  ;;  %v857_v28 = vmul.f32 %v5247_v12, %v4959_v46 }
 0x433   : > { %7043 = vst [vmem:[#allocation32_spill] sm:$0xff] %v5417_v2  ;;  %v4284_v42 = vpop.eup %4283  ;;  %4303 = vrcp.f32 %v1003_v21  ;;  %v1009_v55 = vadd.f32 1.0, %v4282_v48  ;;  %v5424_v45 = vadd.f32 %v5255_v8, %v859_v51  ;;  %v5427_v58 = vmul.f32 -1.442695, %v5417_v2 }
 0x434   : > { %v4286_v11 = vpop.eup %4285  ;;  %4305 = vrcp.f32 %v1004_v5  ;;  %v1010_v59 = vadd.f32 1.0, %v4284_v42  ;;  %v5430_v56 = vadd.f32 %v5255_v8, %v856_v37  ;;  %v5433_v38 = vadd.f32 %v5255_v8, %v857_v28 }
 0x435   : > { %7044 = vst [vmem:[#allocation33_spill] sm:$0xff] %v5424_v45  ;;  %v4288_v35 = vpop.eup %4287  ;;  %4307 = vrcp.f32 %v1009_v55  ;;  %v1005_v46 = vadd.f32 1.0, %v4286_v11  ;;  %v5436_v48 = vmul.f32 -1.442695, %v5424_v45  ;;  %v862_v21 = vmul.f32 %v5247_v12, %v4994_v13  ;;  %v4221_v13 = vld [vmem:[%s6922_s5 + $0xb0] sm:$0xff]  }
 0x436   : > { %7045 = vst [vmem:[#allocation34_spill] sm:$0xff] %v5430_v56  ;;  %7046 = vst [vmem:[#allocation35_spill] sm:$0xff] %v5433_v38  ;;  %v4290_v51 = vpop.eup %4289  ;;  %4309 = vrcp.f32 %v1010_v59  ;;  %v1006_v5 = vadd.f32 1.0, %v4288_v35  ;;  %v5442_v42 = vmul.f32 -1.442695, %v5430_v56  ;;  %v863_v11 = vmul.f32 %v5247_v12, %v5001_v32  ;;  %2334 = vmatpush1.bf16.msra.mxu0 %v4221_v13 }
 0x437   : > { %v5445_v37 = vmul.f32 -1.442695, %v5433_v38  ;;  %v4292_v28 = vpop.eup %4291  ;;  %4311 = vrcp.f32 %v1005_v46  ;;  %v1013_v55 = vadd.f32 1.0, %v4290_v51  ;;  %v5450_v45 = vadd.f32 %v5255_v8, %v862_v21  ;;  %2335 = vmatprep.subr.bf16.mxu0 %v7038_v44 }
 0x438   : > { %v4294_v59 = vpop.eup %4293  ;;  %4313 = vrcp.f32 %v1006_v5  ;;  %v1014_v35 = vadd.f32 1.0, %v4292_v28  ;;  %v860_v38 = vmul.f32 %v5247_v12, %v4980_v6  ;;  %v861_v46 = vmul.f32 %v5247_v12, %v4987_v4 }
 0x439   : > { %7047 = vst [vmem:[#allocation36_spill] sm:$0xff] %v5450_v45  ;;  %v4296_v51 = vpop.eup %4295  ;;  %4315 = vrcp.f32 %v1013_v55  ;;  %v1011_v56 = vadd.f32 1.0, %v4294_v59  ;;  %v5460_v32 = vadd.f32 %v5255_v8, %v863_v11  ;;  %v5463_v21 = vmul.f32 -1.442695, %v5450_v45 }
 0x43a   : > { %v4298_v2 = vpop.eup %4297  ;;  %v7049_v5 = vand.u32 15, %v5108_v22  ;;  %4317 = vrcp.f32 %v1014_v35  ;;  %v1012_v6 = vadd.f32 1.0, %v4296_v51  ;;  %v5472_v4 = vadd.f32 %v5255_v8, %v860_v38  ;;  %v4222_v35 = vld [vmem:[%s6922_s5 + $0xb8] sm:$0xff]  }
 0x43b   : > { %7048 = vst [vmem:[#allocation37_spill] sm:$0xff] %v5460_v32  ;;  %v5475_v55 = vadd.f32 %v5255_v8, %v861_v46  ;;  %v4300_v11 = vpop.eup %4299  ;;  %4319 = vrcp.f32 %v1011_v56  ;;  %v1017_v13 = vadd.f32 1.0, %v4298_v2  ;;  %v5479_v59 = vmul.f32 -1.442695, %v5460_v32  ;;  %2336 = vmatpush1.bf16.msra.mxu0 %v4222_v35 }
 0x43c   : > { %vm5467_vm4 = vcmp.eq.s32.totalorder %v7049_v5, 15  ;;  %7052 = vst [vmem:[#allocation38_spill] sm:$0xff] %v5472_v4  ;;  %v866_v22 = vmul.f32 %v5247_v12, %v5022_v47  ;;  %v4302_v38 = vpop.eup %4301  ;;  %v5487_v51 = vmul.f32 %v4300_v11, %v5282_v18  ;;  %v7054_v46 = vand.u32 15, %v5112_v23  ;;  %2746 = vmatprep.subr.bf16.mxu0 %v7038_v44 }
 0x43d   : > { %7053 = vst [vmem:[#allocation39_spill] sm:$0xff] %v5475_v55  ;;  %4321 = vrcp.f32 %v1012_v6  ;;  %v5496_v2 = vmul.f32 -1.442695, %v5472_v4  ;;  %v5499_v47 = vmul.f32 -1.442695, %v5475_v55  ;;  %v4304_v56 = vpop.eup %4303  ;;  %v5502_v32 = vmul.f32 %v4302_v38, %v5285_v54 }
 0x43e   : > { %vm5491_vm5 = vcmp.eq.s32.totalorder %v7054_v46, 15  ;;  %v7057_v18 = vand.u32 15, %v5115_v25  ;;  %4323 = vpow2.f32 %v5361_v57  ;;  %v867_v23 = vmul.f32 %v5247_v12, %v5029_v61  ;;  %v4306_v46 = vpop.eup %4305 }
 0x43f   : > { %v5514_v6 = vadd.f32 %v5255_v8, %v866_v22  ;;  %v1777_v54 = vrot.slane %v5487_v51, 1  ;;  %v5519_v25 = vmul.f32 %v4304_v56, %v5288_v52  ;;  %4325 = vrcp.f32 %v1017_v13  ;;  %v4308_v38 = vpop.eup %4307 }
 0x440   : > { %vm5506_vm6 = vcmp.eq.s32.totalorder %v7057_v18, 15  ;;  %v1778_v61 = vrot.slane %v5502_v32, 1  ;;  %v1952_v22 = vpack.c.bf16 %v5502_v32, %v5487_v51  ;;  %v5527_v35 = vmul.f32 %v4306_v46, %v5291_v16  ;;  %v4310_v18 = vpop.eup %4309 }
 0x441   : > { %v5532_v13 = vmul.f32 %v4308_v38, %v5294_v24  ;;  %4327 = vpow2.f32 %v5378_v19  ;;  %v4312_v56 = vpop.eup %4311  ;;  %v4224_v24 = vld [vmem:[%s6922_s5 + $0x60] sm:$0xff]   ;;  %v5546_v19 = vmul.f32 %v4310_v18, %v5297_v33  ;;  %v7060_v4 = vrot.slane %v5519_v25, 1 }
 0x442   : > { %2002 = vrot.lane.b32.xlu1 %v1952_v22, %s4470_s29  ;;  %v1832_v57 = vsel %vm1805_vm3, %v1777_v54, %v1778_v61  ;;  %v1774_v46 = vrot.slane %v5527_v35, 1  ;;  %v1950_v55 = vpack.c.bf16 %v5527_v35, %v5519_v25  ;;  %v4314_v38 = vpop.eup %4313  ;;  %v5550_v52 = vmul.f32 %v4312_v56, %v5300_v7  ;;  %3083 = vmatpush1.bf16.msra.mxu1 %v4224_v24 }
 0x443   : > { %v1779_v22 = vrot.slane %v5532_v13, 1  ;;  %4329 = vpow2.f32 %v5385_v3  ;;  %v4316_v16 = vpop.eup %4315  ;;  %v5559_v31 = vmul.f32 %v4314_v38, %v5303_v0  ;;  %v7061_v33 = vand.u32 15, %v5118_v26  ;;  %3084 = vmatprep.subr.bf16.mxu1 %v7038_v44 }
 0x444   : > { %1998 = vrot.lane.b32.xlu0 %v1950_v55, %s4470_s29  ;;  %v1836_v45 = vsel %vm1805_vm3, %v7060_v4, %v1774_v46  ;;  %v7064_v7 = vand.u32 15, %v5121_v27  ;;  %4331 = vpow2.f32 %v5402_v36  ;;  %v5575_v55 = vadd.f32 %v5255_v8, %v867_v23  ;;  %v4318_v0 = vpop.eup %4317 }
 0x445   : > { %vm5563_vm7 = vcmp.eq.s32.totalorder %v7061_v33, 15  ;;  %v1780_v4 = vrot.slane %v5546_v19, 1  ;;  %v1831_v26 = vsel %vm1805_vm3, %v1778_v61, %v1779_v22  ;;  %v1953_v56 = vpack.c.bf16 %v5546_v19, %v5532_v13  ;;  %v4320_v38 = vpop.eup %4319 }
 0x446   : > { %vm5569_vm8 = vcmp.eq.s32.totalorder %v7064_v7, 15  ;;  %v1775_v27 = vrot.slane %v5550_v52, 1  ;;  %v1907_v36 = vsel %vm5467_vm4, 0.0, %v1831_v26  ;;  %v1776_v23 = vrot.slane %v5559_v31, 1 }
 0x447   : > { %v1951_v24 = vpack.c.bf16 %v5559_v31, %v5550_v52  ;;  %v5590_v33 = vmul.f32 %v4316_v16, %v5322_v14  ;;  %v4322_v61 = vpop.eup %4321  ;;  %v1830_v7 = vsel %vm1805_vm3, %v1779_v22, %v1780_v4  ;;  %2004 = vrot.lane.b32.xlu1 %v1953_v56, %s4470_s29  ;;  %v1968_v44 = vpack.c.bf16 %v1907_v36, %v1832_v57 }
 0x448   : > { %v1835_v28 = vsel %vm1805_vm3, %v1774_v46, %v1775_v27  ;;  %v5599_v26 = vmul.f32 %v4318_v0, %v5325_v30  ;;  %v4324_v9 = vpop.eup %4323  ;;  %v1833_v14 = vsel %vm1805_vm3, %v1776_v23, %v1777_v54  ;;  %v1834_v16 = vsel %vm1805_vm3, %v1775_v27, %v1776_v23 }
 0x449   : > { %v1903_v1 = vsel %vm5491_vm5, 0.0, %v1835_v28  ;;  %2000 = vrot.lane.b32.xlu0 %v1951_v24, %s4470_s29  ;;  %v1783_v57 = vrot.slane %v5590_v33, 1  ;;  %v4326_v22 = vpop.eup %4325  ;;  %2099 = vst.msk [vmem:[#allocation2 + $0x38] sm:$0xff] %vm279_vm1, %v1968_v44  ;;  %v1905_v30 = vsel %vm5506_vm6, 0.0, %v1833_v14  ;;  %v7067_v56 = vand.u32 15, %v5173_v50 }
 0x44a   : > { %v1966_v46 = vpack.c.bf16 %v1903_v1, %v1836_v45  ;;  %v1784_v0 = vrot.slane %v5599_v26, 1  ;;  %v1955_v54 = vpack.c.bf16 %v5599_v26, %v5590_v33  ;;  %v1967_v27 = vpack.c.bf16 %v1905_v30, %v1834_v16 }
 0x44b   : > { %vm5617_vm10 = vcmp.eq.s32.totalorder %v7067_v56, 0  ;;  %v5622_v36 = vmul.f32 %v4320_v38, %v5341_v53  ;;  %v5625_v23 = vmul.f32 %v4322_v61, %v5344_v29  ;;  %v1018_v11 = vadd.f32 1.0, %v4324_v9  ;;  %v4328_v1 = vpop.eup %4327 }
 0x44c   : > { %2095 = vst.msk [vmem:[#allocation2 + $0x18] sm:$0xff] %vm279_vm1, %v1966_v46  ;;  %v5632_v50 = vsel %vm1805_vm3, %v1783_v57, %v1784_v0  ;;  %2008 = vrot.lane.b32.xlu1 %v1955_v54, %s4470_s29  ;;  %v5636_v45 = vmul.f32 %v4326_v22, %v5348_v40  ;;  %4333 = vpow2.f32 %v5405_v60  ;;  %v5640_v53 = vmul.f32 -1.442695, %v5514_v6  ;;  %2097 = vst.msk [vmem:[#allocation2 + $0x28] sm:$0xff] %vm279_vm1, %v1967_v27 }
 0x44d   : > { %v7070_v9 = vand.u32 15, %v5182_v63  ;;  %v1781_v38 = vrot.slane %v5622_v36, 1  ;;  %v1782_v24 = vrot.slane %v5625_v23, 1  ;;  %v1954_v40 = vpack.c.bf16 %v5625_v23, %v5622_v36  ;;  %v4330_v60 = vpop.eup %4329 }
 0x44e   : > { %4335 = vrcp.f32 %v1018_v11  ;;  %v1787_v61 = vrot.slane %v5636_v45, 1  ;;  %v1015_v44 = vadd.f32 1.0, %v4328_v1  ;;  %v5656_v63 = vmul.f32 -1.442695, %v5575_v55  ;;  %v4332_v28 = vpop.eup %4331 }
 0x44f   : > { %vm5644_vm11 = vcmp.eq.s32.totalorder %v7070_v9, 0  ;;  %4337 = vpow2.f32 %v5409_v20  ;;  %v1827_v14 = vsel %vm1805_vm3, %v1782_v24, %v1783_v57  ;;  %v1828_v16 = vsel %vm1805_vm3, %v1781_v38, %v1782_v24  ;;  %2006 = vrot.lane.b32.xlu0 %v1954_v40, %s4470_s29 }
 0x450   : > { %v1829_v22 = vsel %vm1805_vm3, %v1780_v4, %v1781_v38  ;;  %v1016_v30 = vadd.f32 1.0, %v4330_v60  ;;  %v7073_v46 = vand.u32 15, %v5185_v62  ;;  %v1911_v57 = vsel %vm5569_vm8, 0.0, %v1827_v14  ;;  %v7076_v62 = vld [vmem:[#allocation6_spill] sm:$0xff]  ;;  %v7082_v14 = vld [vmem:[#allocation7_spill] sm:$0xff] }
 0x451   : > { %v1909_v54 = vsel %vm5563_vm7, 0.0, %v1829_v22  ;;  %4339 = vrcp.f32 %v1015_v44  ;;  %v1021_v56 = vadd.f32 1.0, %v4332_v28  ;;  %v1970_v11 = vpack.c.bf16 %v1911_v57, %v1828_v16 }
 0x452   : > { %vm5667_vm12 = vcmp.eq.s32.totalorder %v7073_v46, 0  ;;  %v1969_v27 = vpack.c.bf16 %v1909_v54, %v1830_v7  ;;  %4341 = vrcp.f32 %v1016_v30  ;;  %v864_v4 = vmul.f32 %v5247_v12, %v5008_v39  ;;  %v7087_v46 = vld [vmem:[#allocation8_spill] sm:$0xff] }
 0x453   : > { %4343 = vrcp.f32 %v1021_v56  ;;  %v865_v1 = vmul.f32 %v5247_v12, %v7076_v62  ;;  %v1583_v9 = vrot.slane %v5559_v31, 7  ;;  %v7077_v18 = vrot.slane %v5502_v32, 7  ;;  %2103 = vst.msk [vmem:[#allocation2 + $0x58] sm:$0xff] %vm279_vm1, %v1970_v11  ;;  %v2177_v7 = vld [vmem:[#allocation2 + $0x18] sm:$0xff] }
 0x454   : > { %v7078_v38 = vrot.slane %v5487_v51, 7  ;;  %2101 = vst.msk [vmem:[#allocation2 + $0x48] sm:$0xff] %vm279_vm1, %v1969_v27  ;;  %4345 = vpow2.f32 %v5412_v49  ;;  %v5690_v39 = vadd.f32 %v5255_v8, %v864_v4  ;;  %v7079_v12 = vrot.slane %v5527_v35, 7  ;;  %3825 = vmatprep.mubr.msk.bf16.mxu0 %vm279_vm1, %v2177_v7  ;;  %3846 = vmatprep.mubr.msk.bf16.mxu1 %vm279_vm1, %v2177_v7 }
 0x455   : > { %v7080_v31 = vrot.slane %v5519_v25, 7  ;;  %v1586_v40 = vrot.slane %v5532_v13, 7  ;;  %4347 = vpow2.f32 %v5427_v58  ;;  %v5705_v49 = vadd.f32 %v5255_v8, %v865_v1 }
 0x456   : > { %v1639_v3 = vsel %vm1612_vm9, %v7078_v38, %v7077_v18  ;;  %v7081_v60 = vmov %v7078_v38  ;;  %v1587_v28 = vrot.slane %v5546_v19, 7  ;;  %v7083_v16 = vand.u32 15, %v7082_v14  ;;  %v4334_v30 = vpop.eup %4333  ;;  %v4228_v19 = vld [vmem:[%s6922_s5 + $0x70] sm:$0xff]  }
 0x457   : > { %v5698_v24 = vsel %vm1612_vm9, %v7080_v31, %v7079_v12  ;;  %v1640_v44 = vsel %vm1612_vm9, %v1583_v9, %v7081_v60  ;;  %4349 = vpow2.f32 %v5436_v48  ;;  %v5720_v58 = vmul.f32 -1.442695, %v5690_v39 }
 0x458   : > { %vm5714_vm13 = vcmp.eq.s32.totalorder %v7083_v16, 15  ;;  %v1713_v8 = vsel %vm5617_vm10, 0.0, %v1640_v44  ;;  %v7086_v51 = vmov %v7077_v18  ;;  %v7088_v54 = vand.u32 15, %v7087_v46  ;;  %v4336_v5 = vpop.eup %4335 }
 0x459   : > { %v1638_v22 = vsel %vm1612_vm9, %v7086_v51, %v1586_v40  ;;  %4351 = vpow2.f32 %v5442_v42  ;;  %v5736_v48 = vmul.f32 -1.442695, %v5705_v49  ;;  %v5738_v56 = vpack.c.bf16 %v1639_v3, %v1713_v8  ;;  %v4338_v42 = vpop.eup %4337 }
 0x45a   : > { %vm5730_vm14 = vcmp.eq.s32.totalorder %v7088_v54, 15  ;;  %v1637_v32 = vsel %vm1612_vm9, %v1586_v40, %v1587_v28  ;;  %v1022_v27 = vadd.f32 1.0, %v4334_v30  ;;  %4353 = vpow2.f32 %v5445_v37 }
 0x45b   : > { %v1715_v11 = vsel %vm5644_vm11, 0.0, %v1638_v22  ;;  %v1582_v4 = vrot.slane %v5550_v52, 7  ;;  %v5749_v62 = vmul.f32 %v4336_v5, %v5351_v41  ;;  %4355 = vpow2.f32 %v5463_v21  ;;  %v4340_v3 = vpop.eup %4339  ;;  %v7095_v22 = vld [vmem:[#allocation18_spill] sm:$0xff] }
 0x45c   : > { %v5752_v1 = vpack.c.bf16 %v1637_v32, %v1715_v11  ;;  %v7091_v18 = vand.u32 15, %v5192_v43  ;;  %v1589_v37 = vrot.slane %v5625_v23, 7  ;;  %4357 = vrcp.f32 %v1022_v27  ;;  %v4342_v31 = vpop.eup %4341 }
 0x45d   : > { %v1019_v29 = vadd.f32 1.0, %v4338_v42  ;;  %v1641_v52 = vsel %vm1612_vm9, %v1582_v4, %v1583_v9  ;;  %v7094_v41 = vmov %v7079_v12  ;;  %v1788_v7 = vrot.slane %v5749_v62, 1  ;;  %v4344_v60 = vpop.eup %4343 }
 0x45e   : > { %vm5756_vm15 = vcmp.eq.s32.totalorder %v7091_v18, 0  ;;  %v1642_v21 = vsel %vm1612_vm9, %v7094_v41, %v1582_v4  ;;  %v1957_v43 = vpack.c.bf16 %v5749_v62, %v5636_v45  ;;  %4359 = vpow2.f32 %v5479_v59  ;;  %v4346_v44 = vpop.eup %4345 }
 0x45f   : > { %v1711_v12 = vsel %vm5667_vm12, 0.0, %v1642_v21  ;;  %v5774_v40 = vmul.f32 %v4340_v3, %v5364_v34  ;;  %4361 = vrcp.f32 %v1019_v29  ;;  %v1590_v9 = vrot.slane %v5590_v33, 7  ;;  %v4348_v8 = vpop.eup %4347  ;;  %v7103_v3 = vld [vmem:[#allocation19_spill] sm:$0xff] }
 0x460   : > { %v5776_v35 = vpack.c.bf16 %v1641_v52, %v1711_v12  ;;  %v5785_v59 = vsel %vm1805_vm3, %v1787_v61, %v1788_v7  ;;  %2012 = vrot.lane.b32.xlu1 %v1957_v43, %s4470_s29  ;;  %v5789_v20 = vmul.f32 %v4342_v31, %v5370_v10  ;;  %4363 = vpow2.f32 %v5496_v2 }
 0x461   : > { %v1591_v34 = vrot.slane %v5599_v26, 7  ;;  %v1785_v33 = vrot.slane %v5774_v40, 1  ;;  %v5795_v14 = vmul.f32 %v4344_v60, %v5388_v15  ;;  %4365 = vpow2.f32 %v5499_v47  ;;  %v4350_v47 = vpop.eup %4349  ;;  %v4236_v26 = vld [vmem:[%s6922_s5 + $0x90] sm:$0xff]  }
 0x462   : > { %v1634_v16 = vsel %vm1612_vm9, %v1589_v37, %v1590_v9  ;;  %v1786_v10 = vrot.slane %v5789_v20, 1  ;;  %v1956_v2 = vpack.c.bf16 %v5789_v20, %v5774_v40  ;;  %v1020_v51 = vadd.f32 1.0, %v4346_v44 }
 0x463   : > { %4367 = vpow2.f32 %v5640_v53  ;;  %v7096_v30 = vand.u32 15, %v7095_v22  ;;  %v1825_v46 = vsel %vm1805_vm3, %v1784_v0, %v1785_v33  ;;  %v1791_v54 = vrot.slane %v5795_v14, 1  ;;  %v4352_v5 = vpop.eup %4351  ;;  %v7099_v0 = vld [vmem:[#allocation9_spill] sm:$0xff] }
 0x464   : > { %v1025_v32 = vadd.f32 1.0, %v4348_v8  ;;  %4369 = vpow2.f32 %v5656_v63  ;;  %v1823_v53 = vsel %vm1805_vm3, %v1786_v10, %v1787_v61  ;;  %v1824_v27 = vsel %vm1805_vm3, %v1785_v33, %v1786_v10  ;;  %2010 = vrot.lane.b32.xlu0 %v1956_v2, %s4470_s29  ;;  %v4354_v63 = vpop.eup %4353  ;;  %v7107_v33 = vld [vmem:[#allocation29_spill] sm:$0xff] }
 0x465   : > { %vm5808_vm0 = vcmp.eq.s32.totalorder %v7096_v30, 0  ;;  %v1913_v11 = vsel %vm5714_vm13, 0.0, %v1825_v46  ;;  %4371 = vrcp.f32 %v1020_v51  ;;  %v7100_v4 = vand.u32 15, %v7099_v0  ;;  %v4356_v52 = vpop.eup %4355 }
 0x466   : > { %v1915_v18 = vsel %vm5730_vm14, 0.0, %v1823_v53  ;;  %v1971_v61 = vpack.c.bf16 %v1913_v11, %v5632_v50  ;;  %v1026_v29 = vadd.f32 1.0, %v4350_v47  ;;  %4373 = vrcp.f32 %v1025_v32  ;;  %v4358_v31 = vpop.eup %4357 }
 0x467   : > { %vm5829_vm4 = vcmp.eq.s32.totalorder %v7100_v4, 15  ;;  %v1972_v13 = vpack.c.bf16 %v1915_v18, %v1824_v27  ;;  %v1023_v41 = vadd.f32 1.0, %v4352_v5  ;;  %v1024_v21 = vadd.f32 1.0, %v4354_v63  ;;  %v7112_v5 = vld [vmem:[#allocation30_spill] sm:$0xff] }
 0x468   : > { %4375 = vpow2.f32 %v5720_v58  ;;  %v7104_v43 = vand.u32 15, %v7103_v3  ;;  %2105 = vst.msk [vmem:[#allocation2 + $0x68] sm:$0xff] %vm279_vm1, %v1971_v61  ;;  %v1029_v57 = vadd.f32 1.0, %v4356_v52  ;;  %v1633_v50 = vsel %vm1612_vm9, %v1590_v9, %v1591_v34  ;;  %v4226_v58 = vld [vmem:[%s6922_s5 + $0x68] sm:$0xff]   ;;  %v4360_v44 = vpop.eup %4359  ;;  %v7108_v9 = vld [vmem:[#allocation10_spill] sm:$0xff] }
 0x469   : > { %4377 = vrcp.f32 %v1026_v29  ;;  %v1719_v60 = vsel %vm5756_vm15, 0.0, %v1634_v16  ;;  %2107 = vst.msk [vmem:[#allocation2 + $0x78] sm:$0xff] %vm279_vm1, %v1972_v13  ;;  %v5855_v8 = vmul.f32 %v4358_v31, %v7107_v33  ;;  %v1588_v2 = vrot.slane %v5622_v36, 7  ;;  %v4362_v51 = vpop.eup %4361  ;;  %3085 = vmatpush1.bf16.msra.mxu1 %v4226_v58  ;;  %v5874_v27 = vld [vmem:[#allocation2] sm:$0xff]  ;;  %v7121_v58 = vld [vmem:[#allocation31_spill] sm:$0xff] }
 0x46a   : > { %vm5839_vm5 = vcmp.eq.s32.totalorder %v7104_v43, 0  ;;  %4379 = vrcp.f32 %v1023_v41  ;;  %v5857_v10 = vpack.c.bf16 %v1633_v50, %v1719_v60  ;;  %v7109_v22 = vand.u32 15, %v7108_v9  ;;  %v4364_v46 = vpop.eup %4363  ;;  %3086 = vmatprep.subr.bf16.mxu1 %v5874_v27  ;;  %v7117_v43 = vld [vmem:[#allocation12_spill] sm:$0xff] }
 0x46b   : > { %4381 = vrcp.f32 %v1024_v21  ;;  %v1030_v16 = vadd.f32 1.0, %v4360_v44  ;;  %v1593_v30 = vrot.slane %v5789_v20, 7  ;;  %v1594_v47 = vrot.slane %v5636_v45, 7  ;;  %v4366_v11 = vpop.eup %4365  ;;  %v7122_v9 = vld [vmem:[#allocation32_spill] sm:$0xff] }
 0x46c   : > { %vm5862_vm6 = vcmp.eq.s32.totalorder %v7109_v22, 15  ;;  %v1792_v32 = vrot.slane %v5855_v8, 1  ;;  %v1959_v36 = vpack.c.bf16 %v5855_v8, %v5795_v14  ;;  %v5872_v53 = vmul.f32 %v4362_v51, %v7112_v5 }
 0x46d   : > { %4383 = vrcp.f32 %v1029_v57  ;;  %v1027_v0 = vadd.f32 1.0, %v4364_v46  ;;  %v1635_v45 = vsel %vm1612_vm9, %v1588_v2, %v1589_v37  ;;  %v1636_v4 = vsel %vm1612_vm9, %v1587_v28, %v1588_v2  ;;  %v4368_v63 = vpop.eup %4367  ;;  %v7113_v37 = vld [vmem:[#allocation11_spill] sm:$0xff]  ;;  %3087 = vmatpush1.bf16.msra.mxu1 %v4228_v19 }
 0x46e   : > { %4385 = vrcp.f32 %v1030_v16  ;;  %v5891_v18 = vsel %vm1805_vm3, %v1791_v54, %v1792_v32  ;;  %2016 = vrot.lane.b32.xlu1 %v1959_v36, %s4470_s29  ;;  %v1789_v23 = vrot.slane %v5872_v53, 1  ;;  %v1028_v61 = vadd.f32 1.0, %v4366_v11  ;;  %v4370_v28 = vpop.eup %4369  ;;  %3088 = vmatprep.subr.bf16.mxu1 %v5874_v27  ;;  %v7123_v16 = vld [vmem:[#allocation20_spill] sm:$0xff] }
 0x46f   : > { %4387 = vpow2.f32 %v5736_v48  ;;  %v7114_v29 = vand.u32 15, %v7113_v37  ;;  %v1033_v13 = vadd.f32 1.0, %v4368_v63  ;;  %v1717_v41 = vsel %vm5808_vm0, 0.0, %v1636_v4  ;;  %v4372_v3 = vpop.eup %4371  ;;  %v4230_v37 = vld [vmem:[%s6922_s5 + $0x78] sm:$0xff]  }
 0x470   : > { %4389 = vrcp.f32 %v1027_v0  ;;  %v1595_v21 = vrot.slane %v5749_v62, 7  ;;  %v1821_v48 = vsel %vm1805_vm3, %v1788_v7, %v1789_v23  ;;  %v7118_v31 = vand.u32 15, %v7117_v43  ;;  %v4374_v15 = vpop.eup %4373 }
 0x471   : > { %vm5901_vm7 = vcmp.eq.s32.totalorder %v7114_v29, 15  ;;  %4391 = vrcp.f32 %v1028_v61  ;;  %v1034_v50 = vadd.f32 1.0, %v4370_v28  ;;  %v5918_v60 = vpack.c.bf16 %v1635_v45, %v1717_v41  ;;  %v7128_v41 = vld [vmem:[#allocation34_spill] sm:$0xff]  ;;  %3089 = vmatpush1.bf16.msra.mxu1 %v4230_v37  ;;  %v7143_v37 = vld [vmem:[#allocation37_spill] sm:$0xff] }
 0x472   : > { %vm5914_vm8 = vcmp.eq.s32.totalorder %v7118_v31, 15  ;;  %v5921_v44 = vmul.f32 %v4372_v3, %v7121_v58  ;;  %v1917_v33 = vsel %vm5829_vm4, 0.0, %v1821_v48  ;;  %4393 = vrcp.f32 %v1033_v13  ;;  %v4376_v2 = vpop.eup %4375  ;;  %v7129_v48 = vld [vmem:[#allocation13_spill] sm:$0xff]  ;;  %3090 = vmatprep.subr.bf16.mxu1 %v5874_v27 }
 0x473   : > { %v1629_v7 = vsel %vm1612_vm9, %v1594_v47, %v1595_v21  ;;  %v1973_v51 = vpack.c.bf16 %v1917_v33, %v5785_v59  ;;  %v5932_v22 = vmul.f32 %v4374_v15, %v7122_v9  ;;  %4395 = vrcp.f32 %v1034_v50  ;;  %v4378_v5 = vpop.eup %4377  ;;  %v7133_v15 = vld [vmem:[#allocation35_spill] sm:$0xff]  ;;  %v7134_v33 = vld [vmem:[#allocation14_spill] sm:$0xff] }
 0x474   : > { %v1630_v42 = vsel %vm1612_vm9, %v1593_v30, %v1594_v47  ;;  %v7124_v46 = vand.u32 15, %v7123_v16  ;;  %v1790_v11 = vrot.slane %v5921_v44, 1  ;;  %v1958_v59 = vpack.c.bf16 %v5921_v44, %v5872_v53  ;;  %v4380_v4 = vpop.eup %4379  ;;  %v7127_v47 = vld [vmem:[#allocation33_spill] sm:$0xff] }
 0x475   : > { %v1031_v0 = vadd.f32 1.0, %v4376_v2  ;;  %v1723_v45 = vsel %vm5839_vm5, 0.0, %v1630_v42  ;;  %2109 = vst.msk [vmem:[#allocation2 + $0x88] sm:$0xff] %vm279_vm1, %v1973_v51  ;;  %v5951_v63 = vmul.f32 %v4378_v5, %v7127_v47  ;;  %v1795_v61 = vrot.slane %v5932_v22, 1  ;;  %v4382_v29 = vpop.eup %4381  ;;  %v7138_v42 = vld [vmem:[#allocation36_spill] sm:$0xff]  ;;  %v7170_v2 = vld [vmem:[#allocation25_spill] sm:$0xff] }
 0x476   : > { %vm5940_vm10 = vcmp.eq.s32.totalorder %v7124_v46, 0  ;;  %v5954_v19 = vpack.c.bf16 %v1629_v7, %v1723_v45  ;;  %v1592_v28 = vrot.slane %v5774_v40, 7  ;;  %v1819_v12 = vsel %vm1805_vm3, %v1790_v11, %v1791_v54  ;;  %2014 = vrot.lane.b32.xlu0 %v1958_v59, %s4470_s29  ;;  %v7139_v46 = vld [vmem:[#allocation15_spill] sm:$0xff] }
 0x477   : > { %v1820_v13 = vsel %vm1805_vm3, %v1789_v23, %v1790_v11  ;;  %v5968_v3 = vmul.f32 %v4380_v4, %v7128_v41  ;;  %v7130_v40 = vand.u32 15, %v7129_v48  ;;  %4397 = vrcp.f32 %v1031_v0  ;;  %v4384_v31 = vpop.eup %4383  ;;  %v4234_v11 = vld [vmem:[%s6922_s5 + $0x88] sm:$0xff]  }
 0x478   : > { %v1919_v50 = vsel %vm5862_vm6, 0.0, %v1819_v12  ;;  %v1796_v54 = vrot.slane %v5951_v63, 1  ;;  %v1961_v23 = vpack.c.bf16 %v5951_v63, %v5932_v22  ;;  %v5982_v58 = vmul.f32 %v4382_v29, %v7133_v15  ;;  %v4386_v51 = vpop.eup %4385 }
 0x479   : > { %vm5972_vm11 = vcmp.eq.s32.totalorder %v7130_v40, 15  ;;  %v7135_v7 = vand.u32 15, %v7134_v33  ;;  %v1974_v9 = vpack.c.bf16 %v1919_v50, %v1820_v13  ;;  %v1793_v38 = vrot.slane %v5968_v3, 1  ;;  %v4388_v0 = vpop.eup %4387  ;;  %v7147_v33 = vld [vmem:[#allocation16_spill] sm:$0xff] }
 0x47a   : > { %v5992_v16 = vmul.f32 %v4384_v31, %v7138_v42  ;;  %v7140_v5 = vand.u32 15, %v7139_v46  ;;  %v1631_v59 = vsel %vm1612_vm9, %v1592_v28, %v1593_v30  ;;  %v1814_v45 = vsel %vm1805_vm3, %v1795_v61, %v1796_v54  ;;  %2020 = vrot.lane.b32.xlu1 %v1961_v23, %s4470_s29  ;;  %v4390_v12 = vpop.eup %4389  ;;  %v7179_v30 = vld [vmem:[#allocation26_spill] sm:$0xff] }
 0x47b   : > { %vm5986_vm12 = vcmp.eq.s32.totalorder %v7135_v7, 15  ;;  %v1794_v4 = vrot.slane %v5982_v58, 1  ;;  %v1960_v47 = vpack.c.bf16 %v5982_v58, %v5968_v3  ;;  %v6012_v29 = vmul.f32 %v4386_v51, %v7143_v37  ;;  %2111 = vst.msk [vmem:[#allocation2 + $0x98] sm:$0xff] %vm279_vm1, %v1974_v9  ;;  %v4392_v31 = vpop.eup %4391  ;;  %v7151_v51 = vld [vmem:[#allocation38_spill] sm:$0xff] }
 0x47c   : > { %vm5996_vm13 = vcmp.eq.s32.totalorder %v7140_v5, 15  ;;  %v7144_v20 = vand.u32 15, %v4811_v17  ;;  %v1817_v13 = vsel %vm1805_vm3, %v1792_v32, %v1793_v38  ;;  %v1799_v41 = vrot.slane %v5992_v16, 1  ;;  %v4243_v17 = vld [vmem:[%s6922_s5 + $0xb0] sm:$0xff]  }
 0x47d   : > { %v1032_v48 = vadd.f32 1.0, %v4388_v0  ;;  %v1632_v40 = vsel %vm1612_vm9, %v1591_v34, %v1592_v28  ;;  %v1815_v50 = vsel %vm1805_vm3, %v1794_v4, %v1795_v61  ;;  %v1816_v23 = vsel %vm1805_vm3, %v1793_v38, %v1794_v4  ;;  %2018 = vrot.lane.b32.xlu0 %v1960_v47, %s4470_s29  ;;  %v4394_v34 = vpop.eup %4393  ;;  %v7152_v38 = vld [vmem:[#allocation21_spill] sm:$0xff]  ;;  %v7156_v4 = vld [vmem:[#allocation39_spill] sm:$0xff] }
 0x47e   : > { %vm6016_vm14 = vcmp.eq.s32.totalorder %v7144_v20, 0  ;;  %v1921_v15 = vsel %vm5901_vm7, 0.0, %v1817_v13  ;;  %v1800_v32 = vrot.slane %v6012_v29, 1  ;;  %v7148_v7 = vand.u32 15, %v7147_v33  ;;  %v4396_v5 = vpop.eup %4395  ;;  %v7157_v13 = vld [vmem:[#allocation22_spill] sm:$0xff] }
 0x47f   : > { %v1923_v61 = vsel %vm5914_vm8, 0.0, %v1815_v50  ;;  %v1975_v28 = vpack.c.bf16 %v1921_v15, %v5891_v18  ;;  %v1963_v52 = vpack.c.bf16 %v6012_v29, %v5992_v16  ;;  %v6050_v9 = vmul.f32 %v4390_v12, %v7151_v51 }
 0x480   : > { %vm6040_vm15 = vcmp.eq.s32.totalorder %v7148_v7, 15  ;;  %v7153_v42 = vand.u32 15, %v7152_v38  ;;  %v1976_v0 = vpack.c.bf16 %v1923_v61, %v1816_v23  ;;  %v1810_v57 = vsel %vm1805_vm3, %v1799_v41, %v1800_v32  ;;  %v4232_v38 = vld [vmem:[%s6922_s5 + $0x80] sm:$0xff]  }
 0x481   : > { %v6061_v47 = vmul.f32 %v4392_v31, %v7156_v4  ;;  %v6064_v18 = vmul.f32 %v4394_v34, %v5514_v6  ;;  %2113 = vst.msk [vmem:[#allocation2 + $0xa8] sm:$0xff] %vm279_vm1, %v1975_v28  ;;  %2024 = vrot.lane.b32.xlu1 %v1963_v52, %s4470_s29  ;;  %v1797_v37 = vrot.slane %v6050_v9, 1  ;;  %v6070_v20 = vmul.f32 %v4396_v5, %v5575_v55  ;;  %v7161_v6 = vld [vmem:[#allocation23_spill] sm:$0xff]  ;;  %v4398_v33 = vpop.eup %4397 }
 0x482   : > { %vm6054_vm0 = vcmp.eq.s32.totalorder %v7153_v42, 0  ;;  %4399 = vrcp.f32 %v1032_v48  ;;  %v1721_v12 = vsel %vm5940_vm10, 0.0, %v1632_v40  ;;  %v7158_v50 = vand.u32 15, %v7157_v13  ;;  %2115 = vst.msk [vmem:[#allocation2 + $0xb8] sm:$0xff] %vm279_vm1, %v1976_v0  ;;  %v7166_v0 = vld [vmem:[#allocation24_spill] sm:$0xff]  ;;  %3091 = vmatpush1.bf16.msra.mxu1 %v4232_v38 }
 0x483   : > { %v7162_v23 = vand.u32 15, %v7161_v6  ;;  %v1798_v55 = vrot.slane %v6061_v47, 1  ;;  %v1962_v36 = vpack.c.bf16 %v6061_v47, %v6050_v9  ;;  %v1803_v48 = vrot.slane %v6064_v18, 1  ;;  %v7174_v6 = vld [vmem:[#allocation17_spill] sm:$0xff]  ;;  %3092 = vmatprep.subr.bf16.mxu1 %v5874_v27 }
 0x484   : > { %vm6076_vm4 = vcmp.eq.s32.totalorder %v7158_v50, 0  ;;  %v6091_v40 = vpack.c.bf16 %v1631_v59, %v1721_v12  ;;  %v1813_v7 = vsel %vm1805_vm3, %v1796_v54, %v1797_v37  ;;  %v1804_v34 = vrot.slane %v6070_v20, 1  ;;  %v4239_v12 = vld [vmem:[%s6922_s5 + $0xa0] sm:$0xff]  }
 0x485   : > { %vm6082_vm5 = vcmp.eq.s32.totalorder %v7162_v23, 0  ;;  %v1965_v61 = vpack.c.bf16 %v6070_v20, %v6064_v18  ;;  %v1611_v28 = vrot.slane %v6070_v20, 7  ;;  %v1811_v52 = vsel %vm1805_vm3, %v1798_v55, %v1799_v41  ;;  %2022 = vrot.lane.b32.xlu0 %v1962_v36, %s4470_s29  ;;  %v4241_v20 = vld [vmem:[%s6922_s5 + $0xa8] sm:$0xff]  }
 0x486   : > { %v1812_v51 = vsel %vm1805_vm3, %v1797_v37, %v1798_v55  ;;  %v1925_v59 = vsel %vm5972_vm11, 0.0, %v1813_v7  ;;  %v6107_v54 = vmul.f32 %v4398_v33, %v5690_v39  ;;  %v1927_v42 = vsel %vm5986_vm12, 0.0, %v1811_v52  ;;  %3093 = vmatpush1.bf16.msra.mxu1 %v4234_v11 }
 0x487   : > { %v1977_v5 = vpack.c.bf16 %v1925_v59, %v1814_v45  ;;  %v1806_v41 = vsel %vm1805_vm3, %v1803_v48, %v1804_v34  ;;  %2028 = vrot.lane.b32.xlu1 %v1965_v61, %s4470_s29  ;;  %v7165_v43 = vrot.slane %v5519_v25, 1  ;;  %v7167_v4 = vand.u32 15, %v7166_v0  ;;  %3094 = vmatprep.subr.bf16.mxu1 %v5874_v27 }
 0x488   : > { %v7171_v45 = vand.u32 15, %v7170_v2  ;;  %v1978_v13 = vpack.c.bf16 %v1927_v42, %v1812_v51  ;;  %v7175_v23 = vand.u32 15, %v7174_v6  ;;  %v1801_v36 = vrot.slane %v6107_v54, 1 }
 0x489   : > { %v1837_v39 = vsel %vm1805_vm3, %v1804_v34, %v7165_v43  ;;  %vm6125_vm6 = vcmp.eq.s32.totalorder %v7167_v4, 0  ;;  %v7178_v33 = vrot.slane %v5519_v25, 7  ;;  %2117 = vst.msk [vmem:[#allocation2 + $0xc8] sm:$0xff] %vm279_vm1, %v1977_v5  ;;  %v1597_v52 = vrot.slane %v5921_v44, 7 }
 0x48a   : > { %vm6131_vm7 = vcmp.eq.s32.totalorder %v7171_v45, 0  ;;  %v1933_v50 = vsel %vm5996_vm13, 0.0, %v1837_v39  ;;  %vm6139_vm8 = vcmp.eq.s32.totalorder %v7175_v23, 15  ;;  %v1598_v25 = vrot.slane %v5795_v14, 7  ;;  %2119 = vst.msk [vmem:[#allocation2 + $0xd8] sm:$0xff] %vm279_vm1, %v1978_v13  ;;  %3095 = vmatpush1.bf16.msra.mxu1 %v4236_v26  ;;  %v4244_v26 = vld [vmem:[%s6922_s5 + $0xb8] sm:$0xff]  }
 0x48b   : > { %v1644_v7 = vsel %vm1612_vm9, %v1611_v28, %v7178_v33  ;;  %v1981_v34 = vpack.c.bf16 %v1933_v50, %v1806_v41  ;;  %v1809_v51 = vsel %vm1805_vm3, %v1800_v32, %v1801_v36  ;;  %v1599_v38 = vrot.slane %v5855_v8, 7  ;;  %3096 = vmatprep.subr.bf16.mxu1 %v5874_v27 }
 0x48c   : > { %v1709_v61 = vsel %vm6016_vm14, 0.0, %v1644_v7  ;;  %v1596_v42 = vrot.slane %v5872_v53, 7  ;;  %v7180_v5 = vand.u32 15, %v7179_v30  ;;  %v1929_v14 = vsel %vm6040_vm15, 0.0, %v1809_v51  ;;  %v4400_v0 = vpop.eup %4399 }
 0x48d   : > { %v6163_v59 = vpack.c.bf16 %v5698_v24, %v1709_v61  ;;  %2125 = vst.msk [vmem:[#allocation2 + $0x108] sm:$0xff] %vm279_vm1, %v1981_v34  ;;  %v1626_v32 = vsel %vm1612_vm9, %v1597_v52, %v1598_v25  ;;  %v1601_v24 = vrot.slane %v5982_v58, 7  ;;  %v1602_v8 = vrot.slane %v5932_v22, 7 }
 0x48e   : > { %vm6169_vm10 = vcmp.eq.s32.totalorder %v7180_v5, 0  ;;  %v1979_v41 = vpack.c.bf16 %v1929_v14, %v1810_v57  ;;  %v1625_v53 = vsel %vm1612_vm9, %v1598_v25, %v1599_v38  ;;  %v1727_v43 = vsel %vm6054_vm0, 0.0, %v1626_v32  ;;  %v7183_v57 = vld [vmem:[#allocation27_spill] sm:$0xff]  ;;  %v7187_v14 = vld [vmem:[#allocation28_spill] sm:$0xff] }
 0x48f   : > { %v1627_v39 = vsel %vm1612_vm9, %v1596_v42, %v1597_v52  ;;  %v6189_v4 = vpack.c.bf16 %v1625_v53, %v1727_v43  ;;  %v1628_v22 = vsel %vm1612_vm9, %v1595_v21, %v1596_v42  ;;  %v1603_v58 = vrot.slane %v5951_v63, 7 }
 0x490   : > { %v1622_v46 = vsel %vm1612_vm9, %v1601_v24, %v1602_v8  ;;  %v7184_v2 = vand.u32 15, %v7183_v57  ;;  %v1128_v13 = vmul.f32 %v4400_v0, %v5705_v49  ;;  %2121 = vst.msk [vmem:[#allocation2 + $0xe8] sm:$0xff] %vm279_vm1, %v1979_v41  ;;  %v1725_v62 = vsel %vm6076_vm4, 0.0, %v1628_v22 }
 0x491   : > { %v1731_v21 = vsel %vm6082_vm5, 0.0, %v1622_v46  ;;  %v1600_v63 = vrot.slane %v5968_v3, 7  ;;  %v6212_v50 = vpack.c.bf16 %v1627_v39, %v1725_v62  ;;  %v1621_v6 = vsel %vm1612_vm9, %v1602_v8, %v1603_v58  ;;  %v4237_v3 = vld [vmem:[%s6922_s5 + $0x98] sm:$0xff]  }
 0x492   : > { %vm6200_vm11 = vcmp.eq.s32.totalorder %v7184_v2, 0  ;;  %v1605_v23 = vrot.slane %v6061_v47, 7  ;;  %v1606_v33 = vrot.slane %v5992_v16, 7  ;;  %v1802_v49 = vrot.slane %v1128_v13, 1  ;;  %3097 = vmatpush1.bf16.msra.mxu1 %v4237_v3  ;;  %v6307_v2 = vld [vmem:[#allocation2 + $0x28] sm:$0xff]  ;;  %v4235_v3 = vld [vmem:[%s6922_s5 + $0xf0] sm:$0xff]  }
 0x493   : > { %v1964_v7 = vpack.c.bf16 %v1128_v13, %v6107_v54  ;;  %v6219_v11 = vpack.c.bf16 %v1621_v6, %v1731_v21  ;;  %v1623_v31 = vsel %vm1612_vm9, %v1600_v63, %v1601_v24  ;;  %v1624_v15 = vsel %vm1612_vm9, %v1599_v38, %v1600_v63  ;;  %3098 = vmatprep.subr.bf16.mxu1 %v5874_v27 }
 0x494   : > { %v1607_v47 = vrot.slane %v6012_v29, 7  ;;  %v1618_v16 = vsel %vm1612_vm9, %v1605_v23, %v1606_v33  ;;  %v1604_v34 = vrot.slane %v6050_v9, 7  ;;  %v1807_v61 = vsel %vm1805_vm3, %v1802_v49, %v1803_v48 }
 0x495   : > { %v1808_v52 = vsel %vm1805_vm3, %v1801_v36, %v1802_v49  ;;  %2026 = vrot.lane.b32.xlu0 %v1964_v7, %s4470_s29  ;;  %v1729_v29 = vsel %vm6125_vm6, 0.0, %v1624_v15  ;;  %v1735_v25 = vsel %vm6131_vm7, 0.0, %v1618_v16  ;;  %v1931_v9 = vsel %vm6139_vm8, 0.0, %v1807_v61  ;;  %v4233_v49 = vld [vmem:[%s6922_s5 + $0xe8] sm:$0xff]   ;;  %v6375_v15 = vld [vmem:[#allocation2 + $0x58] sm:$0xff]  ;;  %s6714_s29 = scalar_lea.vmem [#allocation3], %s3749_s8 }
 0x496   : > { %v6246_v51 = vpack.c.bf16 %v1623_v31, %v1729_v29  ;;  %v1617_v38 = vsel %vm1612_vm9, %v1606_v33, %v1607_v47  ;;  %v1619_v48 = vsel %vm1612_vm9, %v1604_v34, %v1605_v23  ;;  %v1980_v36 = vpack.c.bf16 %v1931_v9, %v1808_v52  ;;  %3099 = vmatpush1.bf16.msra.mxu1 %v4239_v12  ;;  %v6335_v23 = vld [vmem:[#allocation2 + $0x38] sm:$0xff]  ;;  %v4231_v33 = vld [vmem:[%s6922_s5 + $0xe0] sm:$0xff]   ;;  %v4242_v29 = vld [vmem:[%s6922_s5 + $0x108] sm:$0xff]   ;;  %s3674_s15 = sshll.u32 %s6714_s29, 4  ;;  %s6867_s15 = int_to_ptr.vmem [resolvable:$true] %s3674_s15 }
 0x497   : > { %v6252_v42 = vpack.c.bf16 %v1617_v38, %v1735_v25  ;;  %v1620_v37 = vsel %vm1612_vm9, %v1603_v58, %v1604_v34  ;;  %v1609_v30 = vrot.slane %v1128_v13, 7  ;;  %v1610_v5 = vrot.slane %v6064_v18, 7  ;;  %3100 = vmatprep.subr.bf16.mxu1 %v5874_v27  ;;  %v4223_v58 = vld [vmem:[%s6922_s5 + $0xc0] sm:$0xff]   ;;  %v4238_v16 = vld [vmem:[%s6922_s5 + $0xf8] sm:$0xff]   ;;  %v4245_v25 = vld [vmem:[%s6922_s5 + $0x110] sm:$0xff]   ;;  %s4402_s19 = scalar_lea.vmem %s6867_s15, 4096  ;;  %p4409_p0 = scmp.lt.s32.totalorder %s6867_s15, %s4407_s21 }
 0x498   : > { %v1733_v55 = vsel %vm6169_vm10, 0.0, %v1620_v37  ;;  %v7188_v32 = vand.u32 15, %v7187_v14  ;;  %v1608_v24 = vrot.slane %v6107_v54, 7  ;;  %2123 = vst.msk [vmem:[#allocation2 + $0xf8] sm:$0xff] %vm279_vm1, %v1980_v36  ;;  %v4240_v34 = vld [vmem:[%s6922_s5 + $0x100] sm:$0xff]   ;;  %p4403_p11 = scmp.ne.s32.totalorder %s6867_s15, %s4402_s19  ;;  %p4410_p1 = scmp.lt.s32.totalorder %s4408_s22, %s4402_s19 }
 0x499   : > { %v6267_v8 = vpack.c.bf16 %v1619_v48, %v1733_v55  ;;  %v1613_v41 = vsel %vm1612_vm9, %v1610_v5, %v1611_v28  ;;  %v1614_v44 = vsel %vm1612_vm9, %v1609_v30, %v1610_v5  ;;  %v4246_v48 = vld [vmem:[%s6922_s5 + $0x118] sm:$0xff]   ;;  %v6440_v55 = vld [vmem:[#allocation2 + $0x88] sm:$0xff] }
 0x49a   : > { %vm1576_vm3 = vcmp.eq.s32.totalorder %v7188_v32, 0  ;;  %v1615_v18 = vsel %vm1612_vm9, %v1608_v24, %v1609_v30  ;;  %v1616_v54 = vsel %vm1612_vm9, %v1607_v47, %v1608_v24  ;;  %v1739_v53 = vsel %vm6200_vm11, 0.0, %v1614_v44  ;;  %3101 = vmatpush1.bf16.msra.mxu1 %v4241_v20  ;;  %v6442_v5 = vld [vmem:[#allocation2 + $0x98] sm:$0xff]  ;;  %v6467_v44 = vpop.f32.mrb[4].mxu1  ;;  %p4404_p12 = pnand %p4403_p11, %p4552_p5  ;;  %p4411_p2 = por %p4410_p1, %p4409_p0 }
 0x49b   : > { %v1737_v43 = vsel %vm1576_vm3, 0.0, %v1616_v54  ;;  %v6284_v39 = vpack.c.bf16 %v1613_v41, %v1739_v53  ;;  %3102 = vmatprep.subr.bf16.mxu1 %v5874_v27  ;;  %v6465_v41 = vld [vmem:[#allocation2 + $0xa8] sm:$0xff] }
 0x49c   : > { %v6286_v28 = vpack.c.bf16 %v1615_v18, %v1737_v43  ;;  %v4250_v18 = vld [vmem:[%s6922_s5 + $0xc8] sm:$0xff]   ;;  %v4247_v43 = vld [vmem:[%s6922_s5] sm:$0xff]   ;;  %p4405_p13 = pneg %p4404_p12 }
 0x49e   : > { %3103 = vmatpush1.bf16.msra.mxu1 %v4243_v17  ;;  %p4412_p3 = pnand %p4411_p2, %p4405_p13 }
 0x49f   : > { %3104 = vmatprep.subr.bf16.mxu1 %v5874_v27 }
 0x4a2   : > { %3105 = vmatpush1.bf16.msra.mxu1 %v4244_v26  ;;  %v6494_v26 = vld [vmem:[#allocation2 + $0xb8] sm:$0xff] }
 0x4a3   : > { %3514 = vmatprep.subr.bf16.mxu1 %v5874_v27 }
 0x4b4   : > { %v2003_v0 = vpop.permute.xlu1 %2002 }
 0x4b5   : > { %v6300_v22 = vsel %vm279_vm1, %v5738_v56, %v2003_v0  ;;  %v4225_v56 = vld [vmem:[%s6922_s5 + $0xc8] sm:$0xff]  }
 0x4b6   : > { %v1999_v46 = vpop.permute.xlu0 %1998  ;;  %v4249_v0 = vld [vmem:[%s6922_s5 + $0x8] sm:$0xff]  }
 0x4b7   : > { %v2032_v57 = vsel %vm279_vm1, %v6163_v59, %v1999_v46  ;;  %v4256_v46 = vld [vmem:[%s6922_s5 + $0xe0] sm:$0xff]  }
 0x4b8   : > { %2346 = vmatmul.mubr.bf16.vlgmr.msra.gmra.mrb[4].mxu0 %v2032_v57  ;;  %2547 = vmatmul.mubr.bf16.gmra.mrb[8].mxu1 %v2032_v57  ;;  %v6515_v57 = vld [vmem:[#allocation2 + $0xc8] sm:$0xff] }
 0x4b9   : > { %v2005_v45 = vpop.permute.xlu1 %2004  ;;  %2747 = vmatpush1.bf16.msra.mxu0 %v4223_v58  ;;  %3826 = vmatprep.mubr.msk.bf16.mxu0 %vm279_vm1, %v6307_v2  ;;  %v4251_v58 = vld [vmem:[%s6922_s5 + $0x10] sm:$0xff]  }
 0x4ba   : > { %v6316_v13 = vsel %vm279_vm1, %v5752_v1, %v2005_v45  ;;  %3847 = vmatprep.mubr.msk.bf16.mxu1 %vm279_vm1, %v6307_v2  ;;  %2748 = vmatprep.subr.bf16.mxu0 %v5874_v27  ;;  %v4227_v1 = vld [vmem:[%s6922_s5 + $0xd0] sm:$0xff]   ;;  %v4255_v45 = vld [vmem:[%s6922_s5 + $0x20] sm:$0xff]  }
 0x4bb   : > { %v2001_v62 = vpop.permute.xlu0 %2000 }
 0x4bc   : > { %v6323_v59 = vsel %vm279_vm1, %v5776_v35, %v2001_v62  ;;  %v6539_v62 = vld [vmem:[#allocation2 + $0xd8] sm:$0xff] }
 0x4bd   : > { %2749 = vmatpush1.bf16.msra.mxu0 %v4225_v56  ;;  %v4260_v56 = vld [vmem:[%s6922_s5 + $0xf0] sm:$0xff]  }
 0x4be   : > { %v2009_v21 = vpop.permute.xlu1 %2008  ;;  %2750 = vmatprep.subr.bf16.mxu0 %v5874_v27 }
 0x4bf   : > { %v6327_v63 = vsel %vm279_vm1, %v5857_v10, %v2009_v21  ;;  %v4229_v10 = vld [vmem:[%s6922_s5 + $0xd8] sm:$0xff]   ;;  %v4259_v21 = vld [vmem:[%s6922_s5 + $0x30] sm:$0xff]  }
 0x4c0   : > { %2354 = vmatmul.mubr.bf16.gmra.mrb[8].mxu0 %v6323_v59  ;;  %2555 = vmatmul.mubr.bf16.gmra.mrb[12].mxu1 %v6323_v59 }
 0x4c1   : > { %v2007_v6 = vpop.permute.xlu0 %2006  ;;  %3827 = vmatprep.mubr.msk.bf16.mxu0 %vm279_vm1, %v6335_v23  ;;  %3848 = vmatprep.mubr.msk.bf16.mxu1 %vm279_vm1, %v6335_v23 }
 0x4c2   : > { %v6339_v35 = vsel %vm279_vm1, %v5918_v60, %v2007_v6  ;;  %2751 = vmatpush1.bf16.msra.mxu0 %v4227_v1  ;;  %v6355_v60 = vld [vmem:[#allocation2 + $0x48] sm:$0xff]  ;;  %v4263_v1 = vld [vmem:[%s6922_s5 + $0x100] sm:$0xff]  }
 0x4c3   : > { %2752 = vmatprep.subr.bf16.mxu0 %v5874_v27  ;;  %v6563_v6 = vld [vmem:[#allocation2 + $0xe8] sm:$0xff] }
 0x4c6   : > { %2753 = vmatpush1.bf16.msra.mxu0 %v4229_v10  ;;  %v4264_v10 = vld [vmem:[%s6922_s5 + $0x40] sm:$0xff]  }
 0x4c7   : > { %2754 = vmatprep.subr.bf16.mxu0 %v5874_v27 }
 0x4c8   : > { %2362 = vmatmul.mubr.bf16.gmra.mrb[12].mxu0 %v6300_v22  ;;  %2563 = vmatmul.mubr.bf16.gmra.mrb[16].mxu1 %v6300_v22 }
 0x4c9   : > { %3828 = vmatprep.mubr.msk.bf16.mxu0 %vm279_vm1, %v6355_v60  ;;  %3849 = vmatprep.mubr.msk.bf16.mxu1 %vm279_vm1, %v6355_v60 }
 0x4ca   : > { %2755 = vmatpush1.bf16.msra.mxu0 %v4231_v33  ;;  %v4267_v33 = vld [vmem:[%s6922_s5 + $0x110] sm:$0xff]  }
 0x4cb   : > { %2756 = vmatprep.subr.bf16.mxu0 %v5874_v27 }
 0x4ce   : > { %2757 = vmatpush1.bf16.msra.mxu0 %v4233_v49  ;;  %v4266_v49 = vld [vmem:[%s6922_s5 + $0x48] sm:$0xff]  }
 0x4cf   : > { %2758 = vmatprep.subr.bf16.mxu0 %v5874_v27 }
 0x4d0   : > { %2370 = vmatmul.mubr.bf16.gmra.mrb[16].mxu0 %v6316_v13  ;;  %2571 = vmatmul.mubr.bf16.gmra.mrb[20].mxu1 %v6316_v13 }
 0x4d1   : > { %3829 = vmatprep.mubr.msk.bf16.mxu0 %vm279_vm1, %v6375_v15  ;;  %3850 = vmatprep.mubr.msk.bf16.mxu1 %vm279_vm1, %v6375_v15 }
 0x4d2   : > { %v2013_v7 = vpop.permute.xlu1 %2012  ;;  %2759 = vmatpush1.bf16.msra.mxu0 %v4235_v3  ;;  %v2961_v3 = vld [vmem:[#allocation2 + $0x108] sm:$0xff] }
 0x4d3   : > { %v6367_v31 = vsel %vm279_vm1, %v5954_v19, %v2013_v7  ;;  %2760 = vmatprep.subr.bf16.mxu0 %v5874_v27  ;;  %v4269_v7 = vld [vmem:[%s6922_s5 + $0x50] sm:$0xff]  }
 0x4d6   : > { %v2011_v47 = vpop.permute.xlu0 %2010  ;;  %2761 = vmatpush1.bf16.msra.mxu0 %v4238_v16 }
 0x4d7   : > { %v6383_v19 = vsel %vm279_vm1, %v6091_v40, %v2011_v47  ;;  %2762 = vmatprep.subr.bf16.mxu0 %v5874_v27  ;;  %v6395_v40 = vld [vmem:[#allocation2 + $0x68] sm:$0xff] }
 0x4d8   : > { %2378 = vmatmul.mubr.bf16.gmra.mrb[20].mxu0 %v6339_v35  ;;  %2579 = vmatmul.mubr.bf16.gmra.mrb[24].mxu1 %v6339_v35 }
 0x4d9   : > { %3830 = vmatprep.mubr.msk.bf16.mxu0 %vm279_vm1, %v6395_v40  ;;  %3851 = vmatprep.mubr.msk.bf16.mxu1 %vm279_vm1, %v6395_v40 }
 0x4da   : > { %2763 = vmatpush1.bf16.msra.mxu0 %v4240_v34 }
 0x4db   : > { %2764 = vmatprep.subr.bf16.mxu0 %v5874_v27 }
 0x4de   : > { %2765 = vmatpush1.bf16.msra.mxu0 %v4242_v29 }
 0x4df   : > { %2766 = vmatprep.subr.bf16.mxu0 %v5874_v27 }
 0x4e0   : > { %v2017_v61 = vpop.permute.xlu1 %2016  ;;  %2386 = vmatmul.mubr.bf16.gmra.mrb[24].mxu0 %v6327_v63  ;;  %2587 = vmatmul.mubr.bf16.gmra.mrb[28].mxu1 %v6327_v63 }
 0x4e1   : > { %v6403_v52 = vsel %vm279_vm1, %v6189_v4, %v2017_v61  ;;  %v6415_v4 = vld [vmem:[#allocation2 + $0x78] sm:$0xff] }
 0x4e2   : > { %3831 = vmatprep.mubr.msk.bf16.mxu0 %vm279_vm1, %v6415_v4  ;;  %3852 = vmatprep.mubr.msk.bf16.mxu1 %vm279_vm1, %v6415_v4 }
 0x4e3   : > { %2767 = vmatpush1.bf16.msra.mxu0 %v4245_v25 }
 0x4e4   : > { %2768 = vmatprep.subr.bf16.mxu0 %v5874_v27 }
 0x4e7   : > { %2769 = vmatpush1.bf16.msra.mxu0 %v4246_v48 }
 0x4e8   : > { %v2015_v9 = vpop.permute.xlu0 %2014  ;;  %3275 = vmatprep.subr.bf16.mxu0 %v5874_v27  ;;  %2394 = vmatmul.mubr.bf16.gmra.mrb[28].mxu0 %v6383_v19 }
 0x4e9   : > { %v6419_v38 = vsel %vm279_vm1, %v6212_v50, %v2015_v9  ;;  %2595 = vmatmul.mubr.bf16.gmra.mrb[32].mxu1 %v6383_v19  ;;  %3832 = vmatprep.mubr.msk.bf16.mxu0 %vm279_vm1, %v6440_v55 }
 0x4ea   : > { %3934 = vmatprep.mubr.msk.bf16.mxu1 %vm279_vm1, %v6442_v5 }
 0x4ec   : > { %v2021_v36 = vpop.permute.xlu1 %2020 }
 0x4ed   : > { %v6431_v37 = vsel %vm279_vm1, %v6219_v11, %v2021_v36 }
 0x4ef   : > { %v2019_v50 = vpop.permute.xlu0 %2018 }
 0x4f0   : > { %v6435_v30 = vsel %vm279_vm1, %v6246_v51, %v2019_v50  ;;  %2402 = vmatmul.mubr.bf16.gmra.mrb[32].mxu0 %v6367_v31 }
 0x4f1   : > { %3115 = vmatmul.mubr.bf16.vlgmr.msra.gmra.mrb[36].mxu1 %v6419_v38  ;;  %3889 = vmatprep.mubr.msk.bf16.mxu0 %vm279_vm1, %v6307_v2  ;;  %v4253_v2 = vld [vmem:[%s6922_s5 + $0x18] sm:$0xff]  }
 0x4f2   : > { %3935 = vmatprep.mubr.msk.bf16.mxu1 %vm279_vm1, %v6465_v41 }
 0x4f3   : > { %v2025_v12 = vpop.permute.xlu1 %2024 }
 0x4f4   : > { %v6446_v11 = vsel %vm279_vm1, %v6252_v42, %v2025_v12  ;;  %v4248_v42 = vld [vmem:[%s6922_s5 + $0xc0] sm:$0xff]  }
 0x4f5   : > { %3515 = vmatpush1.bf16.msra.mxu1 %v4248_v42 }
 0x4f6   : > { %3516 = vmatprep.subr.bf16.mxu1 %v5874_v27 }
 0x4f7   : > { %v2023_v51 = vpop.permute.xlu0 %2022 }
 0x4f8   : > { %v6454_v14 = vsel %vm279_vm1, %v6267_v8, %v2023_v51  ;;  %v2542_v8 = vpop.f32.mrb[5].mxu1  ;;  %2779 = vmatmul.mubr.bf16.vlgmr.msra.gmra.mrb[36].mxu0 %v6323_v59  ;;  %v4257_v59 = vld [vmem:[%s6922_s5 + $0x28] sm:$0xff]  }
 0x4f9   : > { %v2029_v32 = vpop.permute.xlu1 %2028  ;;  %v6476_v54 = vpop.f32.mrb[6].mxu1  ;;  %3517 = vmatpush1.bf16.msra.mxu1 %v4250_v18  ;;  %3276 = vmatpush1.bf16.msra.mxu0 %v4247_v43 }
 0x4fa   : > { %v6458_v24 = vsel %vm279_vm1, %v6284_v39, %v2029_v32  ;;  %v2545_v53 = vpop.f32.mrb[7].mxu1  ;;  %3518 = vmatprep.subr.bf16.mxu1 %v5874_v27  ;;  %v4252_v39 = vld [vmem:[%s6922_s5 + $0xd0] sm:$0xff]   ;;  %3123 = vmatmul.mubr.bf16.gmra.mrb[40].mxu1 %v6403_v52 }
 0x4fb   : > { %3890 = vmatprep.mubr.msk.bf16.mxu0 %vm279_vm1, %v6335_v23  ;;  %3936 = vmatprep.mubr.msk.bf16.mxu1 %vm279_vm1, %v6494_v26  ;;  %v4262_v23 = vld [vmem:[%s6922_s5 + $0x38] sm:$0xff]  }
 0x4fc   : > { %3277 = vmatprep.subr.bf16.mxu0 %v5874_v27 }
 0x4fd   : > { %3519 = vmatpush1.bf16.msra.mxu1 %v4252_v39  ;;  %3278 = vmatpush1.bf16.msra.mxu0 %v4249_v0 }
 0x4fe   : > { %3520 = vmatprep.subr.bf16.mxu1 %v5874_v27  ;;  %3279 = vmatprep.subr.bf16.mxu0 %v5874_v27 }
 0x500   : > { %2787 = vmatmul.mubr.bf16.gmra.mrb[40].mxu0 %v6300_v22  ;;  %v4258_v22 = vld [vmem:[%s6922_s5 + $0xe8] sm:$0xff]  }
 0x501   : > { %3891 = vmatprep.mubr.msk.bf16.mxu0 %vm279_vm1, %v6355_v60  ;;  %3280 = vmatpush1.bf16.msra.mxu0 %v4251_v58  ;;  %v2959_v60 = vld [vmem:[#allocation2 + $0xf8] sm:$0xff] }
 0x502   : > { %3131 = vmatmul.mubr.bf16.gmra.mrb[44].mxu1 %v6435_v30  ;;  %3281 = vmatprep.subr.bf16.mxu0 %v5874_v27 }
 0x503   : > { %3937 = vmatprep.mubr.msk.bf16.mxu1 %vm279_vm1, %v6515_v57 }
 0x505   : > { %3282 = vmatpush1.bf16.msra.mxu0 %v4253_v2 }
 0x506   : > { %3283 = vmatprep.subr.bf16.mxu0 %v5874_v27 }
 0x507   : > { %v2027_v20 = vpop.permute.xlu0 %2026 }
 0x508   : > { %v6488_v17 = vsel %vm279_vm1, %v6286_v28, %v2027_v20  ;;  %v4254_v28 = vld [vmem:[%s6922_s5 + $0xd8] sm:$0xff]   ;;  %2795 = vmatmul.mubr.bf16.gmra.mrb[44].mxu0 %v6316_v13 }
 0x509   : > { %3521 = vmatpush1.bf16.msra.mxu1 %v4254_v28  ;;  %3892 = vmatprep.mubr.msk.bf16.mxu0 %vm279_vm1, %v6375_v15  ;;  %v4261_v13 = vld [vmem:[%s6922_s5 + $0xf8] sm:$0xff]  }
 0x50a   : > { %3522 = vmatprep.subr.bf16.mxu1 %v5874_v27  ;;  %3139 = vmatmul.mubr.bf16.gmra.mrb[48].mxu1 %v6431_v37  ;;  %v4270_v15 = vld [vmem:[%s6922_s5 + $0x58] sm:$0xff]  }
 0x50b   : > { %3938 = vmatprep.mubr.msk.bf16.mxu1 %vm279_vm1, %v6539_v62  ;;  %3284 = vmatpush1.bf16.msra.mxu0 %v4255_v45 }
 0x50c   : > { %3285 = vmatprep.subr.bf16.mxu0 %v5874_v27 }
 0x50d   : > { %3523 = vmatpush1.bf16.msra.mxu1 %v4256_v46 }
 0x50e   : > { %3524 = vmatprep.subr.bf16.mxu1 %v5874_v27 }
 0x50f   : > { %3286 = vmatpush1.bf16.msra.mxu0 %v4257_v59 }
 0x510   : > { %3287 = vmatprep.subr.bf16.mxu0 %v5874_v27  ;;  %2803 = vmatmul.mubr.bf16.gmra.mrb[48].mxu0 %v6339_v35  ;;  %v4265_v35 = vld [vmem:[%s6922_s5 + $0x108] sm:$0xff]  }
 0x511   : > { %3525 = vmatpush1.bf16.msra.mxu1 %v4258_v22  ;;  %3893 = vmatprep.mubr.msk.bf16.mxu0 %vm279_vm1, %v6395_v40 }
 0x512   : > { %3526 = vmatprep.subr.bf16.mxu1 %v5874_v27  ;;  %3147 = vmatmul.mubr.bf16.gmra.mrb[52].mxu1 %v6454_v14 }
 0x513   : > { %3939 = vmatprep.mubr.msk.bf16.mxu1 %vm279_vm1, %v6563_v6  ;;  %3288 = vmatpush1.bf16.msra.mxu0 %v4259_v21 }
 0x514   : > { %3289 = vmatprep.subr.bf16.mxu0 %v5874_v27 }
 0x515   : > { %3527 = vmatpush1.bf16.msra.mxu1 %v4260_v56 }
 0x516   : > { %3528 = vmatprep.subr.bf16.mxu1 %v5874_v27 }
 0x517   : > { %3290 = vmatpush1.bf16.msra.mxu0 %v4262_v23 }
 0x518   : > { %3291 = vmatprep.subr.bf16.mxu0 %v5874_v27  ;;  %2811 = vmatmul.mubr.bf16.gmra.mrb[52].mxu0 %v6327_v63  ;;  %v4268_v63 = vld [vmem:[%s6922_s5 + $0x118] sm:$0xff]  }
 0x519   : > { %3529 = vmatpush1.bf16.msra.mxu1 %v4261_v13  ;;  %3894 = vmatprep.mubr.msk.bf16.mxu0 %vm279_vm1, %v6415_v4 }
 0x51a   : > { %3530 = vmatprep.subr.bf16.mxu1 %v5874_v27  ;;  %3155 = vmatmul.mubr.bf16.gmra.mrb[56].mxu1 %v6446_v11 }
 0x51b   : > { %3940 = vmatprep.mubr.msk.bf16.mxu1 %vm279_vm1, %v2959_v60  ;;  %3292 = vmatpush1.bf16.msra.mxu0 %v4264_v10 }
 0x51c   : > { %3293 = vmatprep.subr.bf16.mxu0 %v5874_v27 }
 0x51d   : > { %3531 = vmatpush1.bf16.msra.mxu1 %v4263_v1 }
 0x51e   : > { %3532 = vmatprep.subr.bf16.mxu1 %v5874_v27 }
 0x51f   : > { %3294 = vmatpush1.bf16.msra.mxu0 %v4266_v49 }
 0x520   : > { %3295 = vmatprep.subr.bf16.mxu0 %v5874_v27  ;;  %2819 = vmatmul.mubr.bf16.gmra.mrb[56].mxu0 %v6383_v19 }
 0x521   : > { %3533 = vmatpush1.bf16.msra.mxu1 %v4265_v35  ;;  %3895 = vmatprep.mubr.msk.bf16.mxu0 %vm279_vm1, %v6440_v55 }
 0x522   : > { %3534 = vmatprep.subr.bf16.mxu1 %v5874_v27  ;;  %3163 = vmatmul.mubr.bf16.gmra.mrb[60].mxu1 %v6488_v17 }
 0x523   : > { %3941 = vmatprep.mubr.msk.bf16.mxu1 %vm279_vm1, %v2961_v3  ;;  %3296 = vmatpush1.bf16.msra.mxu0 %v4269_v7 }
 0x524   : > { %3297 = vmatprep.subr.bf16.mxu0 %v5874_v27 }
 0x525   : > { %3535 = vmatpush1.bf16.msra.mxu1 %v4267_v33 }
 0x526   : > { %3536 = vmatprep.subr.bf16.mxu1 %v5874_v27 }
 0x527   : > { %3298 = vmatpush1.bf16.msra.mxu0 %v4270_v15 }
 0x528   : > { %2827 = vmatmul.mubr.bf16.gmra.mrb[60].mxu0 %v6367_v31 }
 0x529   : > { %3537 = vmatpush1.bf16.msra.mxu1 %v4268_v63  ;;  %3896 = vmatprep.mubr.msk.bf16.mxu0 %vm279_vm1, %v6442_v5 }
 0x52a   : > { %3171 = vmatmul.mubr.bf16.gmra.mrb[64].mxu1 %v6458_v24 }
 0x52b   : > { %3998 = vmatprep.mubr.msk.bf16.mxu1 %vm279_vm1, %v6465_v41 }
 0x530   : > { %2835 = vmatmul.mubr.bf16.gmra.mrb[64].mxu0 %v6419_v38 }
 0x531   : > { %3954 = vmatprep.mubr.msk.bf16.mxu0 %vm279_vm1, %v6440_v55 }
 0x532   : > { %3547 = vmatmul.mubr.bf16.vlgmr.msra.gmra.mrb[68].mxu1 %v6403_v52 }
 0x533   : > { %3999 = vmatprep.mubr.msk.bf16.mxu1 %vm279_vm1, %v6494_v26 }
 0x538   : > { %3308 = vmatmul.mubr.bf16.vlgmr.msra.gmra.mrb[68].mxu0 %v6367_v31  ;;  %v3393_v31 = vld [vmem:[#allocation2 + $0x118] sm:$0xff] }
 0x539   : > { %3955 = vmatprep.mubr.msk.bf16.mxu0 %vm279_vm1, %v6442_v5 }
 0x53a   : > { %3555 = vmatmul.mubr.bf16.gmra.mrb[72].mxu1 %v6435_v30 }
 0x53b   : > { %4000 = vmatprep.mubr.msk.bf16.mxu1 %vm279_vm1, %v6515_v57 }
 0x540   : > { %3316 = vmatmul.mubr.bf16.gmra.mrb[72].mxu0 %v6419_v38 }
 0x541   : > { %3956 = vmatprep.mubr.msk.bf16.mxu0 %vm279_vm1, %v6465_v41 }
 0x542   : > { %3563 = vmatmul.mubr.bf16.gmra.mrb[76].mxu1 %v6431_v37 }
 0x543   : > { %4001 = vmatprep.mubr.msk.bf16.mxu1 %vm279_vm1, %v6539_v62 }
 0x548   : > { %3324 = vmatmul.mubr.bf16.gmra.mrb[76].mxu0 %v6403_v52 }
 0x549   : > { %3957 = vmatprep.mubr.msk.bf16.mxu0 %vm279_vm1, %v6494_v26 }
 0x54a   : > { %3571 = vmatmul.mubr.bf16.gmra.mrb[80].mxu1 %v6454_v14 }
 0x54b   : > { %4002 = vmatprep.mubr.msk.bf16.mxu1 %vm279_vm1, %v6563_v6 }
 0x550   : > { %3332 = vmatmul.mubr.bf16.gmra.mrb[80].mxu0 %v6435_v30 }
 0x551   : > { %3958 = vmatprep.mubr.msk.bf16.mxu0 %vm279_vm1, %v6515_v57 }
 0x552   : > { %3579 = vmatmul.mubr.bf16.gmra.mrb[84].mxu1 %v6446_v11 }
 0x553   : > { %4003 = vmatprep.mubr.msk.bf16.mxu1 %vm279_vm1, %v2959_v60 }
 0x558   : > { %3340 = vmatmul.mubr.bf16.gmra.mrb[84].mxu0 %v6431_v37 }
 0x559   : > { %3959 = vmatprep.mubr.msk.bf16.mxu0 %vm279_vm1, %v6539_v62 }
 0x55a   : > { %3587 = vmatmul.mubr.bf16.gmra.mrb[88].mxu1 %v6488_v17 }
 0x55b   : > { %4004 = vmatprep.mubr.msk.bf16.mxu1 %vm279_vm1, %v2961_v3 }
 0x560   : > { %3348 = vmatmul.mubr.bf16.gmra.mrb[88].mxu0 %v6454_v14 }
 0x561   : > { %3960 = vmatprep.mubr.msk.bf16.mxu0 %vm279_vm1, %v6563_v6 }
 0x562   : > { %3595 = vmatmul.mubr.bf16.gmra.mrb[92].mxu1 %v6458_v24 }
 0x563   : > { %4005 = vmatprep.mubr.msk.bf16.mxu1 %vm279_vm1, %v3393_v31 }
 0x568   : > { %3356 = vmatmul.mubr.bf16.gmra.mrb[92].mxu0 %v6446_v11 }
 0x569   : > { %3961 = vmatprep.mubr.msk.bf16.mxu0 %vm279_vm1, %v2959_v60 }
 0x56a   : > { %3603 = vmatmul.mubr.bf16.gmra.mrb[96].mxu1 %v5874_v27 }
 0x570   : > { %3364 = vmatmul.mubr.bf16.gmra.mrb[96].mxu0 %v6488_v17 }
 0x58b   : > { %v2347_v47 = vpop.f32.mrb[4].mxu0  ;;  %v2548_v19 = vpop.f32.mrb[8].mxu1 }
 0x58c   : > { %v6662_v16 = vadd.f32 %v6467_v44, %v2347_v47  ;;  %v2349_v34 = vpop.f32.mrb[5].mxu0  ;;  %v2550_v40 = vpop.f32.mrb[9].mxu1 }
 0x58d   : > { %v2350_v61 = vpop.f32.mrb[6].mxu0  ;;  %v2551_v52 = vpop.f32.mrb[10].mxu1 }
 0x58e   : > { %v6665_v29 = vadd.f32 %v6476_v54, %v2350_v61  ;;  %v2352_v25 = vpop.f32.mrb[7].mxu0  ;;  %v2553_v9 = vpop.f32.mrb[11].mxu1 }
 0x593   : > { %v2355_v4 = vpop.f32.mrb[8].mxu0  ;;  %v2556_v27 = vpop.f32.mrb[12].mxu1 }
 0x594   : > { %v6667_v38 = vadd.f32 %v2548_v19, %v2355_v4  ;;  %v2357_v48 = vpop.f32.mrb[9].mxu0  ;;  %v2558_v36 = vpop.f32.mrb[13].mxu1 }
 0x595   : > { %v2358_v37 = vpop.f32.mrb[10].mxu0  ;;  %v2559_v50 = vpop.f32.mrb[14].mxu1 }
 0x596   : > { %v6669_v30 = vadd.f32 %v2551_v52, %v2358_v37  ;;  %v2360_v12 = vpop.f32.mrb[11].mxu0  ;;  %v2561_v55 = vpop.f32.mrb[15].mxu1 }
 0x59b   : > { %v2363_v5 = vpop.f32.mrb[12].mxu0  ;;  %v2564_v11 = vpop.f32.mrb[16].mxu1 }
 0x59c   : > { %v6671_v51 = vadd.f32 %v2556_v27, %v2363_v5  ;;  %v2365_v14 = vpop.f32.mrb[13].mxu0  ;;  %v2566_v32 = vpop.f32.mrb[17].mxu1  ;;  %v6705_v5 = vld [vmem:[%s6923_s6] ss:$0 sm:$0xff] }
 0x59d   : > { %v2366_v24 = vpop.f32.mrb[14].mxu0  ;;  %v2567_v42 = vpop.f32.mrb[18].mxu1 }
 0x59e   : > { %v6673_v41 = vadd.f32 %v2559_v50, %v2366_v24  ;;  %v2368_v44 = vpop.f32.mrb[15].mxu0  ;;  %v2569_v8 = vpop.f32.mrb[19].mxu1 }
 0x5a3   : > { %v2371_v18 = vpop.f32.mrb[16].mxu0  ;;  %v2572_v54 = vpop.f32.mrb[20].mxu1 }
 0x5a4   : > { %v6675_v53 = vadd.f32 %v2564_v11, %v2371_v18  ;;  %v2373_v43 = vpop.f32.mrb[17].mxu0  ;;  %v2574_v20 = vpop.f32.mrb[21].mxu1 }
 0x5a5   : > { %v2374_v39 = vpop.f32.mrb[18].mxu0  ;;  %v2575_v17 = vpop.f32.mrb[22].mxu1 }
 0x5a6   : > { %v6677_v26 = vadd.f32 %v2567_v42, %v2374_v39  ;;  %v2376_v0 = vpop.f32.mrb[19].mxu0  ;;  %v2577_v28 = vpop.f32.mrb[23].mxu1 }
 0x5ab   : > { %v2379_v58 = vpop.f32.mrb[20].mxu0  ;;  %v2580_v46 = vpop.f32.mrb[24].mxu1 }
 0x5ac   : > { %v6679_v57 = vadd.f32 %v2572_v54, %v2379_v58  ;;  %v2381_v2 = vpop.f32.mrb[21].mxu0  ;;  %v2582_v22 = vpop.f32.mrb[25].mxu1 }
 0x5ad   : > { %v2382_v45 = vpop.f32.mrb[22].mxu0  ;;  %v2583_v56 = vpop.f32.mrb[26].mxu1 }
 0x5ae   : > { %v6681_v62 = vadd.f32 %v2575_v17, %v2382_v45  ;;  %v2384_v59 = vpop.f32.mrb[23].mxu0  ;;  %v2585_v13 = vpop.f32.mrb[27].mxu1 }
 0x5b3   : > { %v2387_v21 = vpop.f32.mrb[24].mxu0  ;;  %v2588_v1 = vpop.f32.mrb[28].mxu1 }
 0x5b4   : > { %v6683_v6 = vadd.f32 %v2580_v46, %v2387_v21  ;;  %v2389_v23 = vpop.f32.mrb[25].mxu0  ;;  %v2590_v35 = vpop.f32.mrb[29].mxu1 }
 0x5b5   : > { %v2390_v10 = vpop.f32.mrb[26].mxu0  ;;  %v2591_v33 = vpop.f32.mrb[30].mxu1 }
 0x5b6   : > { %v6685_v60 = vadd.f32 %v2583_v56, %v2390_v10  ;;  %v2392_v49 = vpop.f32.mrb[27].mxu0  ;;  %v2593_v63 = vpop.f32.mrb[31].mxu1 }
 0x5bb   : > { %v2395_v7 = vpop.f32.mrb[28].mxu0 }
 0x5bc   : > { %v2596_v3 = vpop.f32.mrb[32].mxu1  ;;  %v6687_v15 = vadd.f32 %v2588_v1, %v2395_v7  ;;  %v2397_v31 = vpop.f32.mrb[29].mxu0 }
 0x5bd   : > { %v2598_v47 = vpop.f32.mrb[33].mxu1  ;;  %v2398_v19 = vpop.f32.mrb[30].mxu0 }
 0x5be   : > { %v2599_v34 = vpop.f32.mrb[34].mxu1  ;;  %v6689_v40 = vadd.f32 %v2591_v33, %v2398_v19  ;;  %v2400_v61 = vpop.f32.mrb[31].mxu0 }
 0x5bf   : > { %v2601_v52 = vpop.f32.mrb[35].mxu1 }
 0x5c3   : > { %v2403_v25 = vpop.f32.mrb[32].mxu0 }
 0x5c4   : > { %v6691_v9 = vpop.f32.mrb[36].mxu1  ;;  %v6693_v4 = vadd.f32 %v2596_v3, %v2403_v25  ;;  %v2405_v27 = vpop.f32.mrb[33].mxu0 }
 0x5c5   : > { %v3118_v48 = vpop.f32.mrb[37].mxu1  ;;  %v2406_v36 = vpop.f32.mrb[34].mxu0 }
 0x5c6   : > { %v6695_v37 = vpop.f32.mrb[38].mxu1  ;;  %v6697_v50 = vadd.f32 %v2599_v34, %v2406_v36  ;;  %v2408_v12 = vpop.f32.mrb[35].mxu0 }
 0x5c7   : > { %v3121_v55 = vpop.f32.mrb[39].mxu1 }
 0x5cb   : > { %v2780_v11 = vpop.f32.mrb[36].mxu0 }
 0x5cc   : > { %v2843_v32 = vadd.f32 %v2780_v11, %v6662_v16  ;;  %v2782_v24 = vpop.f32.mrb[37].mxu0 }
 0x5cd   : > { %v6707_v14 = vpop.f32.mrb[40].mxu1  ;;  %v2783_v44 = vpop.f32.mrb[38].mxu0 }
 0x5ce   : > { %v3126_v42 = vpop.f32.mrb[41].mxu1  ;;  %v2865_v18 = vadd.f32 %v6705_v5, %v2843_v32  ;;  %v2844_v54 = vadd.f32 %v2783_v44, %v6665_v29  ;;  %v2785_v43 = vpop.f32.mrb[39].mxu0 }
 0x5cf   : > { %v6710_v8 = vpop.f32.mrb[42].mxu1 }
 0x5d0   : > { %v3129_v20 = vpop.f32.mrb[43].mxu1  ;;  %2881 = vst.msk [vmem:[%s6714_s29] sm:$0xff] %vm471_vm2, %v2865_v18  ;;  %v2866_v16 = vadd.f32 %v6705_v5, %v2844_v54 }
 0x5d2   : > { %2882 = vst.msk [vmem:[%s6714_s29 + $0x8] sm:$0xff] %vm471_vm2, %v2866_v16 }
 0x5d3   : > { %v2788_v39 = vpop.f32.mrb[40].mxu0 }
 0x5d4   : > { %v2845_v0 = vadd.f32 %v2788_v39, %v6667_v38  ;;  %v2790_v29 = vpop.f32.mrb[41].mxu0 }
 0x5d5   : > { %v6721_v17 = vpop.f32.mrb[44].mxu1  ;;  %v2791_v58 = vpop.f32.mrb[42].mxu0 }
 0x5d6   : > { %v3134_v28 = vpop.f32.mrb[45].mxu1  ;;  %v2867_v2 = vadd.f32 %v6705_v5, %v2845_v0  ;;  %v2846_v22 = vadd.f32 %v2791_v58, %v6669_v30  ;;  %v2793_v45 = vpop.f32.mrb[43].mxu0 }
 0x5d7   : > { %v6724_v46 = vpop.f32.mrb[46].mxu1 }
 0x5d8   : > { %v3137_v56 = vpop.f32.mrb[47].mxu1  ;;  %2883 = vst.msk [vmem:[%s6714_s29 + $0x10] sm:$0xff] %vm471_vm2, %v2867_v2  ;;  %v2868_v59 = vadd.f32 %v6705_v5, %v2846_v22 }
 0x5da   : > { %2884 = vst.msk [vmem:[%s6714_s29 + $0x18] sm:$0xff] %vm471_vm2, %v2868_v59 }
 0x5db   : > { %v2796_v38 = vpop.f32.mrb[44].mxu0 }
 0x5dc   : > { %v2847_v21 = vadd.f32 %v2796_v38, %v6671_v51  ;;  %v2798_v1 = vpop.f32.mrb[45].mxu0 }
 0x5dd   : > { %v6733_v13 = vpop.f32.mrb[48].mxu1  ;;  %v2799_v35 = vpop.f32.mrb[46].mxu0 }
 0x5de   : > { %v3142_v23 = vpop.f32.mrb[49].mxu1  ;;  %v2869_v30 = vadd.f32 %v6705_v5, %v2847_v21  ;;  %v2848_v33 = vadd.f32 %v2799_v35, %v6673_v41  ;;  %v2801_v49 = vpop.f32.mrb[47].mxu0 }
 0x5df   : > { %v6736_v10 = vpop.f32.mrb[50].mxu1 }
 0x5e0   : > { %v3145_v63 = vpop.f32.mrb[51].mxu1  ;;  %2885 = vst.msk [vmem:[%s6714_s29 + $0x20] sm:$0xff] %vm471_vm2, %v2869_v30  ;;  %v2870_v7 = vadd.f32 %v6705_v5, %v2848_v33 }
 0x5e2   : > { %2886 = vst.msk [vmem:[%s6714_s29 + $0x28] sm:$0xff] %vm471_vm2, %v2870_v7 }
 0x5e3   : > { %v2804_v51 = vpop.f32.mrb[48].mxu0 }
 0x5e4   : > { %v2849_v31 = vadd.f32 %v2804_v51, %v6675_v53  ;;  %v2806_v47 = vpop.f32.mrb[49].mxu0 }
 0x5e5   : > { %v6745_v3 = vpop.f32.mrb[52].mxu1  ;;  %v2807_v34 = vpop.f32.mrb[50].mxu0 }
 0x5e6   : > { %v3150_v19 = vpop.f32.mrb[53].mxu1  ;;  %v2871_v41 = vadd.f32 %v6705_v5, %v2849_v31  ;;  %v2850_v52 = vadd.f32 %v2807_v34, %v6677_v26  ;;  %v2809_v25 = vpop.f32.mrb[51].mxu0 }
 0x5e7   : > { %v6748_v61 = vpop.f32.mrb[54].mxu1 }
 0x5e8   : > { %v3153_v27 = vpop.f32.mrb[55].mxu1  ;;  %2887 = vst.msk [vmem:[%s6714_s29 + $0x30] sm:$0xff] %vm471_vm2, %v2871_v41  ;;  %v2872_v48 = vadd.f32 %v6705_v5, %v2850_v52 }
 0x5ea   : > { %2888 = vst.msk [vmem:[%s6714_s29 + $0x38] sm:$0xff] %vm471_vm2, %v2872_v48 }
 0x5eb   : > { %v2812_v53 = vpop.f32.mrb[52].mxu0 }
 0x5ec   : > { %v2851_v12 = vadd.f32 %v2812_v53, %v6679_v57  ;;  %v2814_v55 = vpop.f32.mrb[53].mxu0 }
 0x5ed   : > { %v6757_v36 = vpop.f32.mrb[56].mxu1  ;;  %v2815_v32 = vpop.f32.mrb[54].mxu0 }
 0x5ee   : > { %v3158_v11 = vpop.f32.mrb[57].mxu1  ;;  %v2873_v26 = vadd.f32 %v6705_v5, %v2851_v12  ;;  %v2852_v42 = vadd.f32 %v2815_v32, %v6681_v62  ;;  %v2817_v44 = vpop.f32.mrb[55].mxu0 }
 0x5ef   : > { %v6760_v24 = vpop.f32.mrb[58].mxu1 }
 0x5f0   : > { %v3161_v18 = vpop.f32.mrb[59].mxu1  ;;  %2889 = vst.msk [vmem:[%s6714_s29 + $0x40] sm:$0xff] %vm471_vm2, %v2873_v26  ;;  %v2874_v54 = vadd.f32 %v6705_v5, %v2852_v42 }
 0x5f2   : > { %2890 = vst.msk [vmem:[%s6714_s29 + $0x48] sm:$0xff] %vm471_vm2, %v2874_v54 }
 0x5f3   : > { %v2820_v57 = vpop.f32.mrb[56].mxu0 }
 0x5f4   : > { %v2853_v20 = vadd.f32 %v2820_v57, %v6683_v6  ;;  %v2822_v16 = vpop.f32.mrb[57].mxu0 }
 0x5f5   : > { %v6769_v43 = vpop.f32.mrb[60].mxu1  ;;  %v2823_v0 = vpop.f32.mrb[58].mxu0 }
 0x5f6   : > { %v3166_v39 = vpop.f32.mrb[61].mxu1  ;;  %v2875_v62 = vadd.f32 %v6705_v5, %v2853_v20  ;;  %v2854_v28 = vadd.f32 %v2823_v0, %v6685_v60  ;;  %v2825_v58 = vpop.f32.mrb[59].mxu0 }
 0x5f7   : > { %v6772_v29 = vpop.f32.mrb[62].mxu1 }
 0x5f8   : > { %v3169_v2 = vpop.f32.mrb[63].mxu1  ;;  %2891 = vst.msk [vmem:[%s6714_s29 + $0x50] sm:$0xff] %vm471_vm2, %v2875_v62  ;;  %v2876_v22 = vadd.f32 %v6705_v5, %v2854_v28 }
 0x5fa   : > { %2892 = vst.msk [vmem:[%s6714_s29 + $0x58] sm:$0xff] %vm471_vm2, %v2876_v22 }
 0x5fb   : > { %v2828_v6 = vpop.f32.mrb[60].mxu0 }
 0x5fc   : > { %v2855_v56 = vadd.f32 %v2828_v6, %v6687_v15  ;;  %v2830_v59 = vpop.f32.mrb[61].mxu0 }
 0x5fd   : > { %v6781_v45 = vpop.f32.mrb[64].mxu1  ;;  %v2831_v21 = vpop.f32.mrb[62].mxu0 }
 0x5fe   : > { %v3174_v38 = vpop.f32.mrb[65].mxu1  ;;  %v2877_v60 = vadd.f32 %v6705_v5, %v2855_v56  ;;  %v2856_v23 = vadd.f32 %v2831_v21, %v6689_v40  ;;  %v2833_v35 = vpop.f32.mrb[63].mxu0 }
 0x5ff   : > { %v6784_v1 = vpop.f32.mrb[66].mxu1 }
 0x600   : > { %v3177_v30 = vpop.f32.mrb[67].mxu1  ;;  %2893 = vst.msk [vmem:[%s6714_s29 + $0x60] sm:$0xff] %vm471_vm2, %v2877_v60  ;;  %v2878_v33 = vadd.f32 %v6705_v5, %v2856_v23 }
 0x602   : > { %2894 = vst.msk [vmem:[%s6714_s29 + $0x68] sm:$0xff] %vm471_vm2, %v2878_v33 }
 0x603   : > { %v2836_v15 = vpop.f32.mrb[64].mxu0 }
 0x604   : > { %v2857_v63 = vadd.f32 %v2836_v15, %v6693_v4  ;;  %v2838_v7 = vpop.f32.mrb[65].mxu0 }
 0x605   : > { %v3548_v49 = vpop.f32.mrb[68].mxu1  ;;  %v2839_v31 = vpop.f32.mrb[66].mxu0 }
 0x606   : > { %v3550_v51 = vpop.f32.mrb[69].mxu1  ;;  %v2879_v40 = vadd.f32 %v6705_v5, %v2857_v63  ;;  %v2858_v19 = vadd.f32 %v2839_v31, %v6697_v50  ;;  %v2841_v34 = vpop.f32.mrb[67].mxu0 }
 0x607   : > { %v3551_v47 = vpop.f32.mrb[70].mxu1 }
 0x608   : > { %v3553_v41 = vpop.f32.mrb[71].mxu1  ;;  %2895 = vst.msk [vmem:[%s6714_s29 + $0x70] sm:$0xff] %vm471_vm2, %v2879_v40  ;;  %v2880_v52 = vadd.f32 %v6705_v5, %v2858_v19 }
 0x60a   : > { %2896 = vst.msk [vmem:[%s6714_s29 + $0x78] sm:$0xff] %vm471_vm2, %v2880_v52 }
 0x60b   : > { %v3309_v25 = vpop.f32.mrb[68].mxu0 }
 0x60c   : > { %v3310_v4 = vadd.f32 %v3309_v25, %v6691_v9  ;;  %v3311_v48 = vpop.f32.mrb[69].mxu0 }
 0x60d   : > { %v3556_v27 = vpop.f32.mrb[72].mxu1  ;;  %v3312_v12 = vpop.f32.mrb[70].mxu0 }
 0x60e   : > { %v3558_v53 = vpop.f32.mrb[73].mxu1  ;;  %v3611_v11 = vadd.f32 %v3548_v49, %v3310_v4  ;;  %v3313_v50 = vadd.f32 %v3312_v12, %v6695_v37  ;;  %v3314_v32 = vpop.f32.mrb[71].mxu0 }
 0x60f   : > { %v3559_v55 = vpop.f32.mrb[74].mxu1 }
 0x610   : > { %v3561_v26 = vpop.f32.mrb[75].mxu1  ;;  %v3627_v42 = vadd.f32 %v6705_v5, %v3611_v11  ;;  %v3612_v44 = vadd.f32 %v3551_v47, %v3313_v50 }
 0x612   : > { %4006 = vst.msk [vmem:[%s6714_s29 + $0x80] sm:$0xff] %vm471_vm2, %v3627_v42  ;;  %v3628_v18 = vadd.f32 %v6705_v5, %v3612_v44 }
 0x613   : > { %v3317_v54 = vpop.f32.mrb[72].mxu0 }
 0x614   : > { %4007 = vst.msk [vmem:[%s6714_s29 + $0x88] sm:$0xff] %vm471_vm2, %v3628_v18  ;;  %v3318_v9 = vadd.f32 %v3317_v54, %v6707_v14  ;;  %v3319_v20 = vpop.f32.mrb[73].mxu0 }
 0x615   : > { %v3564_v57 = vpop.f32.mrb[76].mxu1  ;;  %v3320_v37 = vpop.f32.mrb[74].mxu0 }
 0x616   : > { %v3566_v16 = vpop.f32.mrb[77].mxu1  ;;  %v3613_v0 = vadd.f32 %v3556_v27, %v3318_v9  ;;  %v3321_v62 = vadd.f32 %v3320_v37, %v6710_v8  ;;  %v3322_v28 = vpop.f32.mrb[75].mxu0 }
 0x617   : > { %v3567_v39 = vpop.f32.mrb[78].mxu1 }
 0x618   : > { %v3569_v58 = vpop.f32.mrb[79].mxu1  ;;  %v3629_v2 = vadd.f32 %v6705_v5, %v3613_v0  ;;  %v3614_v22 = vadd.f32 %v3559_v55, %v3321_v62 }
 0x61a   : > { %4008 = vst.msk [vmem:[%s6714_s29 + $0x90] sm:$0xff] %vm471_vm2, %v3629_v2  ;;  %v3630_v6 = vadd.f32 %v6705_v5, %v3614_v22 }
 0x61b   : > { %v3325_v56 = vpop.f32.mrb[76].mxu0 }
 0x61c   : > { %4009 = vst.msk [vmem:[%s6714_s29 + $0x98] sm:$0xff] %vm471_vm2, %v3630_v6  ;;  %v3326_v14 = vadd.f32 %v3325_v56, %v6721_v17  ;;  %v3327_v38 = vpop.f32.mrb[77].mxu0 }
 0x61d   : > { %v3572_v59 = vpop.f32.mrb[80].mxu1  ;;  %v3328_v8 = vpop.f32.mrb[78].mxu0 }
 0x61e   : > { %v3574_v21 = vpop.f32.mrb[81].mxu1  ;;  %v3615_v23 = vadd.f32 %v3564_v57, %v3326_v14  ;;  %v3329_v35 = vadd.f32 %v3328_v8, %v6724_v46  ;;  %v3330_v30 = vpop.f32.mrb[79].mxu0 }
 0x61f   : > { %v3575_v60 = vpop.f32.mrb[82].mxu1 }
 0x620   : > { %v3577_v33 = vpop.f32.mrb[83].mxu1  ;;  %v3631_v15 = vadd.f32 %v6705_v5, %v3615_v23  ;;  %v3616_v49 = vadd.f32 %v3567_v39, %v3329_v35 }
 0x622   : > { %4010 = vst.msk [vmem:[%s6714_s29 + $0xa0] sm:$0xff] %vm471_vm2, %v3631_v15  ;;  %v3632_v63 = vadd.f32 %v6705_v5, %v3616_v49 }
 0x623   : > { %v3333_v7 = vpop.f32.mrb[80].mxu0 }
 0x624   : > { %4011 = vst.msk [vmem:[%s6714_s29 + $0xa8] sm:$0xff] %vm471_vm2, %v3632_v63  ;;  %v3334_v17 = vadd.f32 %v3333_v7, %v6733_v13  ;;  %v3335_v31 = vpop.f32.mrb[81].mxu0 }
 0x625   : > { %v3580_v51 = vpop.f32.mrb[84].mxu1  ;;  %v3336_v46 = vpop.f32.mrb[82].mxu0 }
 0x626   : > { %v3582_v47 = vpop.f32.mrb[85].mxu1  ;;  %v3617_v19 = vadd.f32 %v3572_v59, %v3334_v17  ;;  %v3337_v34 = vadd.f32 %v3336_v46, %v6736_v10  ;;  %v3338_v41 = vpop.f32.mrb[83].mxu0 }
 0x627   : > { %v3583_v40 = vpop.f32.mrb[86].mxu1 }
 0x628   : > { %v3585_v52 = vpop.f32.mrb[87].mxu1  ;;  %v3633_v25 = vadd.f32 %v6705_v5, %v3617_v19  ;;  %v3618_v27 = vadd.f32 %v3575_v60, %v3337_v34 }
 0x62a   : > { %4012 = vst.msk [vmem:[%s6714_s29 + $0xb0] sm:$0xff] %vm471_vm2, %v3633_v25  ;;  %v3634_v4 = vadd.f32 %v6705_v5, %v3618_v27 }
 0x62b   : > { %v3341_v48 = vpop.f32.mrb[84].mxu0 }
 0x62c   : > { %4013 = vst.msk [vmem:[%s6714_s29 + $0xb8] sm:$0xff] %vm471_vm2, %v3634_v4  ;;  %v3342_v13 = vadd.f32 %v3341_v48, %v6745_v3  ;;  %v3343_v12 = vpop.f32.mrb[85].mxu0 }
 0x62d   : > { %v3588_v53 = vpop.f32.mrb[88].mxu1  ;;  %v3344_v10 = vpop.f32.mrb[86].mxu0 }
 0x62e   : > { %v3590_v55 = vpop.f32.mrb[89].mxu1  ;;  %v3619_v50 = vadd.f32 %v3580_v51, %v3342_v13  ;;  %v3345_v32 = vadd.f32 %v3344_v10, %v6748_v61  ;;  %v3346_v26 = vpop.f32.mrb[87].mxu0 }
 0x62f   : > { %v3591_v11 = vpop.f32.mrb[90].mxu1 }
 0x630   : > { %v3593_v42 = vpop.f32.mrb[91].mxu1  ;;  %v3635_v44 = vadd.f32 %v6705_v5, %v3619_v50  ;;  %v3620_v18 = vadd.f32 %v3583_v40, %v3345_v32 }
 0x632   : > { %4014 = vst.msk [vmem:[%s6714_s29 + $0xc0] sm:$0xff] %vm471_vm2, %v3635_v44  ;;  %v3636_v54 = vadd.f32 %v6705_v5, %v3620_v18 }
 0x633   : > { %v3349_v57 = vpop.f32.mrb[88].mxu0 }
 0x634   : > { %4015 = vst.msk [vmem:[%s6714_s29 + $0xc8] sm:$0xff] %vm471_vm2, %v3636_v54  ;;  %v3350_v3 = vadd.f32 %v3349_v57, %v6757_v36  ;;  %v3351_v20 = vpop.f32.mrb[89].mxu0 }
 0x635   : > { %v3596_v9 = vpop.f32.mrb[92].mxu1  ;;  %v3352_v61 = vpop.f32.mrb[90].mxu0 }
 0x636   : > { %v3598_v16 = vpop.f32.mrb[93].mxu1  ;;  %v3621_v39 = vadd.f32 %v3588_v53, %v3350_v3  ;;  %v3353_v0 = vadd.f32 %v3352_v61, %v6760_v24  ;;  %v3354_v62 = vpop.f32.mrb[91].mxu0 }
 0x637   : > { %v3599_v37 = vpop.f32.mrb[94].mxu1 }
 0x638   : > { %v3601_v28 = vpop.f32.mrb[95].mxu1  ;;  %v3637_v58 = vadd.f32 %v6705_v5, %v3621_v39  ;;  %v3622_v2 = vadd.f32 %v3591_v11, %v3353_v0 }
 0x63a   : > { %4016 = vst.msk [vmem:[%s6714_s29 + $0xd0] sm:$0xff] %vm471_vm2, %v3637_v58  ;;  %v3638_v22 = vadd.f32 %v6705_v5, %v3622_v2 }
 0x63b   : > { %v3357_v6 = vpop.f32.mrb[92].mxu0 }
 0x63c   : > { %4017 = vst.msk [vmem:[%s6714_s29 + $0xd8] sm:$0xff] %vm471_vm2, %v3638_v22  ;;  %v3358_v36 = vadd.f32 %v3357_v6, %v6769_v43  ;;  %v3359_v59 = vpop.f32.mrb[93].mxu0 }
 0x63d   : > { %v3604_v56 = vpop.f32.mrb[96].mxu1  ;;  %v3360_v24 = vpop.f32.mrb[94].mxu0 }
 0x63e   : > { %v3606_v14 = vpop.f32.mrb[97].mxu1  ;;  %v3623_v21 = vadd.f32 %v3596_v9, %v3358_v36  ;;  %v3361_v8 = vadd.f32 %v3360_v24, %v6772_v29  ;;  %v3362_v60 = vpop.f32.mrb[95].mxu0 }
 0x63f   : > { %v3607_v38 = vpop.f32.mrb[98].mxu1 }
 0x640   : > { %v3609_v23 = vpop.f32.mrb[99].mxu1  ;;  %v3639_v35 = vadd.f32 %v6705_v5, %v3623_v21  ;;  %v3624_v30 = vadd.f32 %v3599_v37, %v3361_v8 }
 0x642   : > { %4018 = vst.msk [vmem:[%s6714_s29 + $0xe0] sm:$0xff] %vm471_vm2, %v3639_v35  ;;  %v3640_v33 = vadd.f32 %v6705_v5, %v3624_v30 }
 0x643   : > { %v3365_v43 = vpop.f32.mrb[96].mxu0 }
 0x644   : > { %4019 = vst.msk [vmem:[%s6714_s29 + $0xe8] sm:$0xff] %vm471_vm2, %v3640_v33  ;;  %v3366_v15 = vadd.f32 %v3365_v43, %v6781_v45  ;;  %v3367_v49 = vpop.f32.mrb[97].mxu0 }
 0x645   : > { %v3368_v29 = vpop.f32.mrb[98].mxu0 }
 0x646   : > { %v3625_v63 = vadd.f32 %v3604_v56, %v3366_v15  ;;  %v3369_v7 = vadd.f32 %v3368_v29, %v6784_v1  ;;  %v3370_v51 = vpop.f32.mrb[99].mxu0 }
 0x648   : > { %v3641_v17 = vadd.f32 %v6705_v5, %v3625_v63  ;;  %v3626_v31 = vadd.f32 %v3607_v38, %v3369_v7 }
 0x64a   : > { %4020 = vst.msk [vmem:[%s6714_s29 + $0xf0] sm:$0xff] %vm471_vm2, %v3641_v17  ;;  %v3642_v45 = vadd.f32 %v6705_v5, %v3626_v31 }
 0x64c   : > { %4021 = vst.msk [vmem:[%s6714_s29 + $0xf8] sm:$0xff] %vm471_vm2, %v3642_v45 }
 0x64d   : > { %4415 = shalt.err (!%p4412_p3)
}
 0x64e   : > { %s4416_s23 = scalar_lea.hbm %s6865_s18, 4096  ;;  %s4420_s14 = scalar_lea.hbm %s6924_s7, 8192 }
 0x64f   : > { %p4417_p4 = scmp.ne.s32.totalorder %s6865_s18, %s4416_s23  ;;  %p4421_p9 = scmp.lt.u32.totalorder %s6865_s18, %s6924_s7 }
 0x650   : > { %p4422_p10 = scmp.lt.u32.totalorder %s4420_s14, %s4416_s23  ;;  %p4424_p12 = scmp.lt.u32.totalorder %s4416_s23, %s6865_s18 }
 0x651   : > { %p4418_p7 = pnand %p4417_p4, %p4552_p5 }
 0x652   : > { %p4423_p11 = por %p4422_p10, %p4421_p9 }
 0x653   : > { %p4419_p8 = pneg %p4418_p7 }
 0x654   : > { %p4425_p13 = por %p4424_p12, %p4423_p11 }
 0x656   : > { %p4426_p0 = pnand %p4425_p13, %p4419_p8 }
 0x658   : > { %4429 = shalt.err (!%p4426_p0)
}
 0x659   : > { %s4472_s16 = smov 128   ;;  %s4473_s17 = smov 8  }
 0x65a   : > { %4153 = dma.vmem_to_hbm [thread:$0]  (%p4552_p5), %s6867_s15, 4096, %s6865_s18, %s6876_s28, %s4472_s16, %s4472_s16, %s4473_s17  }
 0x65b PF: > { %p4159_p1 = scmp.ge.s32.totalorder %s4464_s27, 2  ;;  %s3689_s19 = sand.u32 1, %s4452_s24  }
 0x65c   : > { %s3690_s20 = scalar_lea.sflag [#allocation4], %s3689_s19 }
 0x65d   : > { %p4156_p2 = pnand %p4159_p1, %p4556_p6 }
 0x65f   : > { %4447 = dma.done.wait (!%p4156_p2), %s3690_s20, 4096  }
 0x660   : > { %4449 = vsyncadd (!%p4156_p2), %s3690_s20, 4294963200  ;;  %p17_p3 = scmp.ge.s32.totalorder %s4539_s30, 4   ;;  %s7189_s24 = smov %s4456_s25 }
 0x661   : > { %s7190_s25 = smov %s4460_s26  ;;  %s7191_s26 = smov %s4550_s10 }
 0x662   : > { %s7192_s27 = smov %s4539_s30  ;;  %19 = sbr.rel (!%p17_p3) target bundleno = 3 (0x3), region = 92 }
 0x669   :  { %3695 = vsyncpa [#allocation4], 1 }
 0x66a   :  { %3697 = vsyncpa [#allocation4 + $0x1], 1 }

</bundles_post_ra>
